<compile_context>
chip_gen: v7x
topology: tpu7x:2x2x1
jax: 0.10.0
libtpu: 0.0.40
codegen_flags: <defaults>
</compile_context>

<pallas_src>
import functools

import jax
import jax.numpy as jnp
from jax import lax
from jax.experimental import pallas as pl
from jax.experimental.pallas import tpu as pltpu


def _bplstm_kernel(nh_p, sl, T, inv_sl, unroll, needs_tail,
                   emb_ref, wih0_ref, b0_ref, whh0_ref,
                   wih1_ref, whh1_ref, b1_ref,
                   wo_last_ref, wo_avg_ref, wo_max_ref, wo_min_ref, bo_ref,
                   out_ref,
                   h0_ref, c0_ref, h1_ref, c1_ref,
                   sum_ref, max_ref, min_ref, g0buf_ref):
    tb = pl.program_id(0)
    n_blk = pl.num_programs(0)
    bs = h0_ref.shape[0]
    em = emb_ref.shape[2]
    cdt = whh0_ref.dtype          # MXU-operand dtype; state/accumulators stay f32

    @pl.when(tb == 0)
    def _init():
        z = jnp.zeros((bs, nh_p), jnp.float32)
        h0_ref[...] = z
        c0_ref[...] = z
        h1_ref[...] = z
        c1_ref[...] = z
        sum_ref[...] = z
        max_ref[...] = jnp.full((bs, nh_p), -jnp.inf, jnp.float32)
        min_ref[...] = jnp.full((bs, nh_p), jnp.inf, jnp.float32)

    # Whole-chunk layer-0 input projection: one big MXU dot on the streamed
    # embeddings (replaces the precomputed (sl, bs, 4nh) f32 HBM tensor).
    x2d = emb_ref[...].reshape(T * bs, em)
    gin = jnp.dot(x2d, wih0_ref[...], preferred_element_type=jnp.float32)
    g0buf_ref[...] = (gin + b0_ref[...]).reshape(T, bs, 4 * nh_p)

    # Resident weights + hoisted bias broadcast (JAX does not CSE broadcasts).
    whh0 = whh0_ref[...]
    wih1 = wih1_ref[...]
    whh1 = whh1_ref[...]
    b1_b = jnp.broadcast_to(b1_ref[...], (bs, 4 * nh_p))

    def gates(gm):
        # nh_p % 128 == 0 -> every gate slice is 128-lane aligned (free).
        i = jax.nn.sigmoid(gm[:, 0 * nh_p:1 * nh_p])
        f = jax.nn.sigmoid(gm[:, 1 * nh_p:2 * nh_p])
        gg = jnp.tanh(gm[:, 2 * nh_p:3 * nh_p])
        o = jax.nn.sigmoid(gm[:, 3 * nh_p:4 * nh_p])
        return i, f, gg, o

    def l1_step(x_c, h1, c1):
        # No concat: two separate dots, MXU accumulates into the same result.
        g1 = (jnp.dot(x_c, wih1, preferred_element_type=jnp.float32)
              + jnp.dot(h1.astype(cdt), whh1, preferred_element_type=jnp.float32)
              + b1_b)
        i1, f1, gg1, o1 = gates(g1)
        c1n = f1 * c1 + i1 * gg1
        h1n = o1 * jnp.tanh(c1n)
        return h1n, c1n

    def step(t, carry):
        h0, c0, h1, c1, s, mx, mn = carry
        g_idx = tb * T + t
        h0_c = h0.astype(cdt)
        # Layer 1 for time g_idx-1 (one-step skew): depends only on carry
        # values, so its MXU/EUP work overlaps with the layer-0 dot below.
        h1n, c1n = l1_step(h0_c, h1, c1)
        # Layer 0 for time g_idx (input projection precomputed per chunk).
        g0 = g0buf_ref[t] + jnp.dot(h0_c, whh0,
                                    preferred_element_type=jnp.float32)
        i0, f0, gg0, o0 = gates(g0)
        c0 = f0 * c0 + i0 * gg0
        h0 = o0 * jnp.tanh(c0)
        # Commit layer-1 state / pooling only for valid time indices (skip the
        # g_idx == 0 warm-up and any zero-padded tail iterations).
        valid = jnp.logical_and(g_idx >= 1, g_idx <= sl)
        h1 = jnp.where(valid, h1n, h1)
        c1 = jnp.where(valid, c1n, c1)
        s = jnp.where(valid, s + h1n, s)
        mx = jnp.where(valid, jnp.maximum(mx, h1n), mx)
        mn = jnp.where(valid, jnp.minimum(mn, h1n), mn)
        return (h0, c0, h1, c1, s, mx, mn)

    carry0 = (h0_ref[...], c0_ref[...], h1_ref[...], c1_ref[...],
              sum_ref[...], max_ref[...], min_ref[...])
    h0, c0, h1, c1, s, mx, mn = lax.fori_loop(0, T, step, carry0, unroll=unroll)
    h0_ref[...] = h0
    c0_ref[...] = c0
    h1_ref[...] = h1
    c1_ref[...] = c1
    sum_ref[...] = s
    max_ref[...] = mx
    min_ref[...] = mn

    @pl.when(tb == n_blk - 1)
    def _finalize():
        if needs_tail:
            # sl % T == 0: the skewed layer-1 step for the last time index is
            # still pending -- run it here and fold it into the pools.
            h1_last, _ = l1_step(h0.astype(cdt), h1, c1)
            s_f = s + h1_last
            mx_f = jnp.maximum(mx, h1_last)
            mn_f = jnp.minimum(mn, h1_last)
        else:
            # Padded tail iterations already consumed the pending step.
            h1_last, s_f, mx_f, mn_f = h1, s, mx, mn
        avgp = s_f * inv_sl
        # Four lane-aligned (bs, nh_p) dots instead of a 4*nh lane concat.
        out = (jnp.dot(h1_last.astype(cdt), wo_last_ref[...],
                       preferred_element_type=jnp.float32)
               + jnp.dot(avgp.astype(cdt), wo_avg_ref[...],
                         preferred_element_type=jnp.float32)
               + jnp.dot(mx_f.astype(cdt), wo_max_ref[...],
                         preferred_element_type=jnp.float32)
               + jnp.dot(mn_f.astype(cdt), wo_min_ref[...],
                         preferred_element_type=jnp.float32))
        out_ref[...] = out + bo_ref[...]


def _pad_gate_rows(w, nh, nh_p):
    """Pad each of the 4 PyTorch gate blocks ([i,f,g,o] along dim 0) to nh_p."""
    if nh_p == nh:
        return w
    pads = [(0, nh_p - nh)] + [(0, 0)] * (w.ndim - 1)
    return jnp.concatenate(
        [jnp.pad(w[k * nh:(k + 1) * nh], pads) for k in range(4)], axis=0)


def balanced_pool_lstm_forward(inp, params, *, compute_dtype=jnp.bfloat16,
                               time_chunk=None):
    (emb_table, wih0, whh0, bih0, bhh0,
     wih1, whh1, bih1, bhh1, wout, bout) = params
    sl, bs = inp.shape
    em = emb_table.shape[1]
    nh = whh0.shape[1]
    out_cat = wout.shape[0]
    cdt = jnp.dtype(compute_dtype)
    f32 = jnp.float32

    # Lane-align the gates: pad nh to a multiple of 128 so every per-gate slice
    # of the (bs, 4*nh_p) preactivation is free; padded lanes stay exactly 0.
    nh_p = -(-nh // 128) * 128
    # Pad batch to a multiple of 8 sublanes (extra rows discarded at the end).
    bs_p = max(8, -(-bs // 8) * 8)

    # ----- weight packing (gate-block padded, pre-transposed, compute dtype) --
    wih0_t = _pad_gate_rows(wih0, nh, nh_p).T.astype(cdt)                # (em, 4nh_p)
    whh0_t = jnp.pad(_pad_gate_rows(whh0, nh, nh_p),
                     ((0, 0), (0, nh_p - nh))).T.astype(cdt)             # (nh_p, 4nh_p)
    b0 = _pad_gate_rows(bih0 + bhh0, nh, nh_p).reshape(1, 4 * nh_p).astype(f32)
    # Layer-1 weights kept SEPARATE (no per-step concat in the kernel).
    wih1_t = jnp.pad(_pad_gate_rows(wih1, nh, nh_p),
                     ((0, 0), (0, nh_p - nh))).T.astype(cdt)             # (nh_p, 4nh_p)
    whh1_t = jnp.pad(_pad_gate_rows(whh1, nh, nh_p),
                     ((0, 0), (0, nh_p - nh))).T.astype(cdt)             # (nh_p, 4nh_p)
    b1 = _pad_gate_rows(bih1 + bhh1, nh, nh_p).reshape(1, 4 * nh_p).astype(f32)
    # Output head split into the 4 pooled features; rows padded to nh_p.
    wo = wout.T.astype(f32)                                              # (4nh, out_cat)

    def _pad_rows(w):
        return jnp.pad(w, ((0, nh_p - nh), (0, 0))).astype(cdt)

    wo_last = _pad_rows(wo[0 * nh:1 * nh])
    wo_avg = _pad_rows(wo[1 * nh:2 * nh])
    wo_max = _pad_rows(wo[2 * nh:3 * nh])
    wo_min = _pad_rows(wo[3 * nh:4 * nh])
    bo = bout.reshape(1, out_cat).astype(f32)

    # Embedding gather (glue); padding_idx=0 row is zero; eval dropout = id.
    # TODO(synk): train-mode dropout (emb/inter-layer/out) not implemented.
    emb = jnp.take(emb_table, inp, axis=0).astype(cdt)                   # (sl, bs, em)
    if bs_p != bs:
        emb = jnp.pad(emb, ((0, 0), (0, bs_p - bs), (0, 0)))

    # ----- generation-aware VMEM budget and budget-driven time chunk ----------
    try:
        kind = jax.devices()[0].device_kind.lower()
    except Exception:
        kind = ""
    is_v7 = ("v7" in kind) or ("7x" in kind)
    phys_vmem = (64 << 20) if is_v7 else (128 << 20)
    vmem_cap = min(phys_vmem - (16 << 20), 100 << 20)   # ~48 MiB v7x / 100 MiB v5e,v6e

    cd_b = cdt.itemsize
    resident_b = 2 * cd_b * (em * 4 * nh_p + 3 * nh_p * 4 * nh_p
                             + 4 * nh_p * out_cat)
    resident_b += 2 * 4 * (2 * 4 * nh_p + out_cat)      # f32 biases
    state_b = 7 * bs_p * nh_p * 4 + 2 * bs_p * out_cat * 4
    per_t_b = bs_p * (2 * em * cd_b + 4 * nh_p * 4)     # emb stream (x2) + g0buf (f32)
    if time_chunk is None:
        budget = vmem_cap - resident_b - state_b - (4 << 20)
        T = int(max(1, min(sl, 256, budget // per_t_b)))
    else:
        T = int(time_chunk)
    n_chunks = -(-sl // T)
    sl_p = n_chunks * T
    needs_tail = (sl_p == sl)
    if sl_p != sl:          # ragged tail handled by in-kernel masking
        emb = jnp.pad(emb, ((0, sl_p - sl), (0, 0), (0, 0)))

    # Unroll bounded by the per-step live vreg footprint of the gate tensors.
    gate_vregs = max(1, (bs_p // 8) * ((4 * nh_p) // 128))
    unroll = int(max(1, min(8, 48 // gate_vregs, T)))

    def resident(shape):
        zeros = (0,) * len(shape)
        return pl.BlockSpec(shape, lambda t: zeros)
    # TODO(synk): pipeline_mode=pl.Buffered(1) on resident specs would halve
    # their VMEM footprint (v7x win); left at the default for compatibility.

    in_specs = [
        pl.BlockSpec((T, bs_p, em), lambda t: (t, 0, 0)),   # streamed embeddings
        resident((em, 4 * nh_p)),       # wih0_t
        resident((1, 4 * nh_p)),        # b0
        resident((nh_p, 4 * nh_p)),     # whh0_t
        resident((nh_p, 4 * nh_p)),     # wih1_t
        resident((nh_p, 4 * nh_p)),     # whh1_t
        resident((1, 4 * nh_p)),        # b1
        resident((nh_p, out_cat)),      # wo_last
        resident((nh_p, out_cat)),      # wo_avg
        resident((nh_p, out_cat)),      # wo_max
        resident((nh_p, out_cat)),      # wo_min
        resident((1, out_cat)),         # bo
    ]
    out_spec = pl.BlockSpec((bs_p, out_cat), lambda t: (0, 0))
    scratch = ([pltpu.VMEM((bs_p, nh_p), jnp.float32) for _ in range(7)]
               + [pltpu.VMEM((T, bs_p, 4 * nh_p), jnp.float32)])

    est = resident_b + state_b + T * per_t_b + (2 << 20)
    vmem_limit = int(min(vmem_cap, max(2 * est, 16 << 20)))

    kernel = functools.partial(_bplstm_kernel, nh_p, sl, T, 1.0 / sl,
                               unroll, needs_tail)
    out_p = pl.pallas_call(
        kernel,
        out_shape=jax.ShapeDtypeStruct((bs_p, out_cat), jnp.float32),
        grid_spec=pltpu.PrefetchScalarGridSpec(
            num_scalar_prefetch=0,
            grid=(n_chunks,),
            in_specs=in_specs,
            out_specs=out_spec,
            scratch_shapes=scratch),
        compiler_params=pltpu.CompilerParams(
            dimension_semantics=("arbitrary",),
            vmem_limit_bytes=vmem_limit),
    )(emb, wih0_t, b0, whh0_t, wih1_t, whh1_t, b1,
      wo_last, wo_avg, wo_max, wo_min, bo)
    return out_p[:bs]


def reference_forward(inp, params):
    """Pure-JAX reference mirroring the PyTorch module (eval mode)."""
    (emb_table, wih0, whh0, bih0, bhh0,
     wih1, whh1, bih1, bhh1, wout, bout) = params
    sl, bs = inp.shape
    nh = whh0.shape[1]
    hi = lax.Precision.HIGHEST
    emb = jnp.take(emb_table, inp, axis=0)

    def run_layer(x_seq, wih, whh, bih, bhh):
        def cell(carry, x):
            h, c = carry
            g = (jnp.dot(x, wih.T, precision=hi)
                 + jnp.dot(h, whh.T, precision=hi) + bih + bhh)
            i, f, gg, o = jnp.split(g, 4, axis=1)
            i = jax.nn.sigmoid(i)
            f = jax.nn.sigmoid(f)
            gg = jnp.tanh(gg)
            o = jax.nn.sigmoid(o)
            c = f * c + i * gg
            h = o * jnp.tanh(c)
            return (h, c), h
        z = jnp.zeros((bs, nh), jnp.float32)
        _, hs = lax.scan(cell, (z, z), x_seq)
        return hs

    h0_seq = run_layer(emb, wih0, whh0, bih0, bhh0)
    h1_seq = run_layer(h0_seq, wih1, whh1, bih1, bhh1)
    last = h1_seq[-1]
    avgp = jnp.mean(h1_seq, axis=0)
    maxp = jnp.max(h1_seq, axis=0)
    minp = jnp.min(h1_seq, axis=0)
    feat = jnp.concatenate([last, avgp, maxp, minp], axis=1)
    return jnp.dot(feat, wout.T, precision=hi) + bout


if __name__ == "__main__":
    # Module hyper-params: BalancedPoolLSTM(n_inp, em_sz, nh, out_cat, nl=2)
    n_inp, em_sz, nh, out_cat = 20, 32, 32, 5
    sl, bs = 8, 2

    key = jax.random.PRNGKey(0)
    keys = jax.random.split(key, 12)

    def u(k, shape, scale=0.1):
        return jax.random.uniform(k, shape, jnp.float32, -1.0, 1.0) * scale

    emb_table = u(keys[0], (n_inp, em_sz)).at[0].set(0.0)    # padding_idx=0
    wih0 = u(keys[1], (4 * nh, em_sz))
    whh0 = u(keys[2], (4 * nh, nh))
    bih0 = u(keys[3], (4 * nh,))
    bhh0 = u(keys[4], (4 * nh,))
    wih1 = u(keys[5], (4 * nh, nh))
    whh1 = u(keys[6], (4 * nh, nh))
    bih1 = u(keys[7], (4 * nh,))
    bhh1 = u(keys[8], (4 * nh,))
    wout = u(keys[9], (out_cat, 4 * nh))
    bout = u(keys[10], (out_cat,))
    params = (emb_table, wih0, whh0, bih0, bhh0,
              wih1, whh1, bih1, bhh1, wout, bout)

    inp = jax.random.randint(keys[11], (sl, bs), 0, n_inp, jnp.int32)
    ref = reference_forward(inp, params)

    # f32 path, auto time_chunk (single chunk; pending layer-1 tail step).
    out_a = jax.block_until_ready(
        balanced_pool_lstm_forward(inp, params, compute_dtype=jnp.float32))
    assert out_a.shape == (bs, out_cat)
    assert jnp.allclose(out_a, ref, rtol=1e-3, atol=1e-3), (out_a, ref)

    # f32 path, T=3 -> 3 chunks with a ragged masked tail + cross-chunk carry.
    out_b = jax.block_until_ready(
        balanced_pool_lstm_forward(inp, params, compute_dtype=jnp.float32,
                                   time_chunk=3))
    assert jnp.allclose(out_b, ref, rtol=1e-3, atol=1e-3), (out_b, ref)

    # Default bf16 MXU-operand path (f32 state/accumulators), 2 chunks.
    out_c = jax.block_until_ready(
        balanced_pool_lstm_forward(inp, params, time_chunk=4))
    assert jnp.allclose(out_c, ref, rtol=2e-2, atol=2e-2), (out_c, ref)

    print("KERNEL_OK")
</pallas_src>

<mosaic_0001>
module attributes {stable_mosaic.version = 11 : i64} {
  func.func @_bplstm_kernel(%arg0: i32, %arg1: memref<8x8x32xf32, #tpu.memory_space<vmem>>, %arg2: memref<32x512xf32, #tpu.memory_space<vmem>>, %arg3: memref<1x512xf32, #tpu.memory_space<vmem>>, %arg4: memref<128x512xf32, #tpu.memory_space<vmem>>, %arg5: memref<128x512xf32, #tpu.memory_space<vmem>>, %arg6: memref<128x512xf32, #tpu.memory_space<vmem>>, %arg7: memref<1x512xf32, #tpu.memory_space<vmem>>, %arg8: memref<128x5xf32, #tpu.memory_space<vmem>>, %arg9: memref<128x5xf32, #tpu.memory_space<vmem>>, %arg10: memref<128x5xf32, #tpu.memory_space<vmem>>, %arg11: memref<128x5xf32, #tpu.memory_space<vmem>>, %arg12: memref<1x5xf32, #tpu.memory_space<vmem>>, %arg13: memref<8x5xf32, #tpu.memory_space<vmem>>, %arg14: memref<8x128xf32, #tpu.memory_space<vmem>>, %arg15: memref<8x128xf32, #tpu.memory_space<vmem>>, %arg16: memref<8x128xf32, #tpu.memory_space<vmem>>, %arg17: memref<8x128xf32, #tpu.memory_space<vmem>>, %arg18: memref<8x128xf32, #tpu.memory_space<vmem>>, %arg19: memref<8x128xf32, #tpu.memory_space<vmem>>, %arg20: memref<8x128xf32, #tpu.memory_space<vmem>>, %arg21: memref<8x8x512xf32, #tpu.memory_space<vmem>>) attributes {dimension_semantics = [#tpu.dimension_semantics<arbitrary>], iteration_bounds = array<i64: 1>, scalar_prefetch = 0 : i64, scratch_operands = 8 : i64, tpu.core_type = #tpu.core_type<tc>, window_params = [{transform_indices = @transform_0, window_bounds = array<i64: 8, 8, 32>}, {pipeline_mode = #tpu.pipeline_mode<synchronous>, transform_indices = @transform_1, window_bounds = array<i64: 32, 512>}, {pipeline_mode = #tpu.pipeline_mode<synchronous>, transform_indices = @transform_2, window_bounds = array<i64: 1, 512>}, {pipeline_mode = #tpu.pipeline_mode<synchronous>, transform_indices = @transform_3, window_bounds = array<i64: 128, 512>}, {pipeline_mode = #tpu.pipeline_mode<synchronous>, transform_indices = @transform_4, window_bounds = array<i64: 128, 512>}, {pipeline_mode = #tpu.pipeline_mode<synchronous>, transform_indices = @transform_5, window_bounds = array<i64: 128, 512>}, {pipeline_mode = #tpu.pipeline_mode<synchronous>, transform_indices = @transform_6, window_bounds = array<i64: 1, 512>}, {pipeline_mode = #tpu.pipeline_mode<synchronous>, transform_indices = @transform_7, window_bounds = array<i64: 128, 5>}, {pipeline_mode = #tpu.pipeline_mode<synchronous>, transform_indices = @transform_8, window_bounds = array<i64: 128, 5>}, {pipeline_mode = #tpu.pipeline_mode<synchronous>, transform_indices = @transform_9, window_bounds = array<i64: 128, 5>}, {pipeline_mode = #tpu.pipeline_mode<synchronous>, transform_indices = @transform_10, window_bounds = array<i64: 128, 5>}, {pipeline_mode = #tpu.pipeline_mode<synchronous>, transform_indices = @transform_11, window_bounds = array<i64: 1, 5>}, {pipeline_mode = #tpu.pipeline_mode<synchronous>, transform_indices = @transform_12, window_bounds = array<i64: 8, 5>}]} {
    %c0_i32 = arith.constant 0 : i32
    %0 = arith.cmpi eq, %arg0, %c0_i32 : i32
    %1 = arith.extui %0 : i1 to i32
    %c0_i32_0 = arith.constant 0 : i32
    %2 = arith.cmpi ne, %1, %c0_i32_0 : i32
    scf.if %2 {
      %cst_161 = arith.constant 0.000000e+00 : f32
      %611 = vector.broadcast %cst_161 : f32 to vector<8x128xf32>
      %c0_162 = arith.constant 0 : index
      %c0_163 = arith.constant 0 : index
      %612 = vector.load %arg14[%c0_162, %c0_163] : memref<8x128xf32, #tpu.memory_space<vmem>>, vector<8x128xf32>
      tpu.vector_store %arg14[%c0_162, %c0_163], %611 {strides = array<i32>} : memref<8x128xf32, #tpu.memory_space<vmem>>, vector<8x128xf32>,
      %c0_164 = arith.constant 0 : index
      %c0_165 = arith.constant 0 : index
      %613 = vector.load %arg15[%c0_164, %c0_165] : memref<8x128xf32, #tpu.memory_space<vmem>>, vector<8x128xf32>
      tpu.vector_store %arg15[%c0_164, %c0_165], %611 {strides = array<i32>} : memref<8x128xf32, #tpu.memory_space<vmem>>, vector<8x128xf32>,
      %c0_166 = arith.constant 0 : index
      %c0_167 = arith.constant 0 : index
      %614 = vector.load %arg16[%c0_166, %c0_167] : memref<8x128xf32, #tpu.memory_space<vmem>>, vector<8x128xf32>
      tpu.vector_store %arg16[%c0_166, %c0_167], %611 {strides = array<i32>} : memref<8x128xf32, #tpu.memory_space<vmem>>, vector<8x128xf32>,
      %c0_168 = arith.constant 0 : index
      %c0_169 = arith.constant 0 : index
      %615 = vector.load %arg17[%c0_168, %c0_169] : memref<8x128xf32, #tpu.memory_space<vmem>>, vector<8x128xf32>
      tpu.vector_store %arg17[%c0_168, %c0_169], %611 {strides = array<i32>} : memref<8x128xf32, #tpu.memory_space<vmem>>, vector<8x128xf32>,
      %c0_170 = arith.constant 0 : index
      %c0_171 = arith.constant 0 : index
      %616 = vector.load %arg18[%c0_170, %c0_171] : memref<8x128xf32, #tpu.memory_space<vmem>>, vector<8x128xf32>
      tpu.vector_store %arg18[%c0_170, %c0_171], %611 {strides = array<i32>} : memref<8x128xf32, #tpu.memory_space<vmem>>, vector<8x128xf32>,
      %cst_172 = arith.constant 0xFF800000 : f32
      %617 = vector.broadcast %cst_172 : f32 to vector<8x128xf32>
      %c0_173 = arith.constant 0 : index
      %c0_174 = arith.constant 0 : index
      %618 = vector.load %arg19[%c0_173, %c0_174] : memref<8x128xf32, #tpu.memory_space<vmem>>, vector<8x128xf32>
      tpu.vector_store %arg19[%c0_173, %c0_174], %617 {strides = array<i32>} : memref<8x128xf32, #tpu.memory_space<vmem>>, vector<8x128xf32>,
      %cst_175 = arith.constant 0x7F800000 : f32
      %619 = vector.broadcast %cst_175 : f32 to vector<8x128xf32>
      %c0_176 = arith.constant 0 : index
      %c0_177 = arith.constant 0 : index
      %620 = vector.load %arg20[%c0_176, %c0_177] : memref<8x128xf32, #tpu.memory_space<vmem>>, vector<8x128xf32>
      tpu.vector_store %arg20[%c0_176, %c0_177], %619 {strides = array<i32>} : memref<8x128xf32, #tpu.memory_space<vmem>>, vector<8x128xf32>,
    } else {
    }
    %c0 = arith.constant 0 : index
    %c0_1 = arith.constant 0 : index
    %c0_2 = arith.constant 0 : index
    %3 = vector.load %arg1[%c0, %c0_1, %c0_2] : memref<8x8x32xf32, #tpu.memory_space<vmem>>, vector<8x8x32xf32>
    %4 = vector.shape_cast %3 : vector<8x8x32xf32> to vector<64x32xf32>
    %c0_3 = arith.constant 0 : index
    %c0_4 = arith.constant 0 : index
    %5 = vector.load %arg2[%c0_3, %c0_4] : memref<32x512xf32, #tpu.memory_space<vmem>>, vector<32x512xf32>
    %cst = arith.constant dense<0.000000e+00> : vector<64x512xf32>
    %6 = tpu.matmul %4, %5, %cst {dimension_numbers = #tpu.dot_dimension_numbers<[1], [0], [0], [1], [0, 0, 1, 1], [], []>} : vector<64x32xf32>, vector<32x512xf32>, vector<64x512xf32> -> vector<64x512xf32>
    %c0_5 = arith.constant 0 : index
    %c0_6 = arith.constant 0 : index
    %7 = vector.load %arg3[%c0_5, %c0_6] : memref<1x512xf32, #tpu.memory_space<vmem>>, vector<1x512xf32>
    %8 = vector.broadcast %7 : vector<1x512xf32> to vector<64x512xf32>
    %9 = arith.addf %6, %8 : vector<64x512xf32>
    %10 = vector.shape_cast %9 : vector<64x512xf32> to vector<8x8x512xf32>
    %c0_7 = arith.constant 0 : index
    %c0_8 = arith.constant 0 : index
    %c0_9 = arith.constant 0 : index
    %11 = vector.load %arg21[%c0_7, %c0_8, %c0_9] : memref<8x8x512xf32, #tpu.memory_space<vmem>>, vector<8x8x512xf32>
    tpu.vector_store %arg21[%c0_7, %c0_8, %c0_9], %10 {strides = array<i32>} : memref<8x8x512xf32, #tpu.memory_space<vmem>>, vector<8x8x512xf32>,
    %c0_10 = arith.constant 0 : index
    %c0_11 = arith.constant 0 : index
    %12 = vector.load %arg4[%c0_10, %c0_11] : memref<128x512xf32, #tpu.memory_space<vmem>>, vector<128x512xf32>
    %c0_12 = arith.constant 0 : index
    %c0_13 = arith.constant 0 : index
    %13 = vector.load %arg5[%c0_12, %c0_13] : memref<128x512xf32, #tpu.memory_space<vmem>>, vector<128x512xf32>
    %c0_14 = arith.constant 0 : index
    %c0_15 = arith.constant 0 : index
    %14 = vector.load %arg6[%c0_14, %c0_15] : memref<128x512xf32, #tpu.memory_space<vmem>>, vector<128x512xf32>
    %c0_16 = arith.constant 0 : index
    %c0_17 = arith.constant 0 : index
    %15 = vector.load %arg7[%c0_16, %c0_17] : memref<1x512xf32, #tpu.memory_space<vmem>>, vector<1x512xf32>
    %16 = vector.shape_cast %15 : vector<1x512xf32> to vector<1x512xf32>
    %17 = vector.broadcast %16 : vector<1x512xf32> to vector<8x512xf32>
    %c0_18 = arith.constant 0 : index
    %c0_19 = arith.constant 0 : index
    %18 = vector.load %arg14[%c0_18, %c0_19] : memref<8x128xf32, #tpu.memory_space<vmem>>, vector<8x128xf32>
    %c0_20 = arith.constant 0 : index
    %c0_21 = arith.constant 0 : index
    %19 = vector.load %arg15[%c0_20, %c0_21] : memref<8x128xf32, #tpu.memory_space<vmem>>, vector<8x128xf32>
    %c0_22 = arith.constant 0 : index
    %c0_23 = arith.constant 0 : index
    %20 = vector.load %arg16[%c0_22, %c0_23] : memref<8x128xf32, #tpu.memory_space<vmem>>, vector<8x128xf32>
    %c0_24 = arith.constant 0 : index
    %c0_25 = arith.constant 0 : index
    %21 = vector.load %arg17[%c0_24, %c0_25] : memref<8x128xf32, #tpu.memory_space<vmem>>, vector<8x128xf32>
    %c0_26 = arith.constant 0 : index
    %c0_27 = arith.constant 0 : index
    %22 = vector.load %arg18[%c0_26, %c0_27] : memref<8x128xf32, #tpu.memory_space<vmem>>, vector<8x128xf32>
    %c0_28 = arith.constant 0 : index
    %c0_29 = arith.constant 0 : index
    %23 = vector.load %arg19[%c0_28, %c0_29] : memref<8x128xf32, #tpu.memory_space<vmem>>, vector<8x128xf32>
    %c0_30 = arith.constant 0 : index
    %c0_31 = arith.constant 0 : index
    %24 = vector.load %arg20[%c0_30, %c0_31] : memref<8x128xf32, #tpu.memory_space<vmem>>, vector<8x128xf32>
    %c0_i32_32 = arith.constant 0 : i32
    %c8_i32 = arith.constant 8 : i32
    %25 = arith.muli %arg0, %c8_i32 : i32
    %26 = arith.addi %25, %c0_i32_32 : i32
    %cst_33 = arith.constant dense<0.000000e+00> : vector<8x512xf32>
    %27 = tpu.matmul %18, %13, %cst_33 {dimension_numbers = #tpu.dot_dimension_numbers<[1], [0], [0], [1], [0, 0, 1, 1], [], []>} : vector<8x128xf32>, vector<128x512xf32>, vector<8x512xf32> -> vector<8x512xf32>
    %cst_34 = arith.constant dense<0.000000e+00> : vector<8x512xf32>
    %28 = tpu.matmul %20, %14, %cst_34 {dimension_numbers = #tpu.dot_dimension_numbers<[1], [0], [0], [1], [0, 0, 1, 1], [], []>} : vector<8x128xf32>, vector<128x512xf32>, vector<8x512xf32> -> vector<8x512xf32>
    %29 = arith.addf %27, %28 : vector<8x512xf32>
    %30 = arith.addf %29, %17 : vector<8x512xf32>
    %31 = vector.extract_strided_slice %30 {offsets = [0, 0], sizes = [8, 128], strides = [1, 1]} : vector<8x512xf32> to vector<8x128xf32>
    %32 = arith.negf %31 : vector<8x128xf32>
    %33 = math.exp %32 : vector<8x128xf32>
    %cst_35 = arith.constant 1.000000e+00 : f32
    %34 = vector.broadcast %cst_35 : f32 to vector<8x128xf32>
    %35 = arith.addf %34, %33 : vector<8x128xf32>
    %36 = arith.divf %34, %35 : vector<8x128xf32>
    %37 = vector.extract_strided_slice %30 {offsets = [0, 128], sizes = [8, 128], strides = [1, 1]} : vector<8x512xf32> to vector<8x128xf32>
    %38 = arith.negf %37 : vector<8x128xf32>
    %39 = math.exp %38 : vector<8x128xf32>
    %cst_36 = arith.constant 1.000000e+00 : f32
    %40 = vector.broadcast %cst_36 : f32 to vector<8x128xf32>
    %41 = arith.addf %40, %39 : vector<8x128xf32>
    %42 = arith.divf %40, %41 : vector<8x128xf32>
    %43 = vector.extract_strided_slice %30 {offsets = [0, 256], sizes = [8, 128], strides = [1, 1]} : vector<8x512xf32> to vector<8x128xf32>
    %44 = math.tanh %43 : vector<8x128xf32>
    %45 = vector.extract_strided_slice %30 {offsets = [0, 384], sizes = [8, 128], strides = [1, 1]} : vector<8x512xf32> to vector<8x128xf32>
    %46 = arith.negf %45 : vector<8x128xf32>
    %47 = math.exp %46 : vector<8x128xf32>
    %cst_37 = arith.constant 1.000000e+00 : f32
    %48 = vector.broadcast %cst_37 : f32 to vector<8x128xf32>
    %49 = arith.addf %48, %47 : vector<8x128xf32>
    %50 = arith.divf %48, %49 : vector<8x128xf32>
    %51 = arith.mulf %42, %21 : vector<8x128xf32>
    %52 = arith.mulf %36, %44 : vector<8x128xf32>
    %53 = arith.addf %51, %52 : vector<8x128xf32>
    %54 = math.tanh %53 : vector<8x128xf32>
    %55 = arith.mulf %50, %54 : vector<8x128xf32>
    %56 = arith.index_cast %c0_i32_32 : i32 to index
    %c0_38 = arith.constant 0 : index
    %c0_39 = arith.constant 0 : index
    %57 = vector.load %arg21[%56, %c0_38, %c0_39] : memref<8x8x512xf32, #tpu.memory_space<vmem>>, vector<1x8x512xf32>
    %58 = vector.shape_cast %57 : vector<1x8x512xf32> to vector<8x512xf32>
    %cst_40 = arith.constant dense<0.000000e+00> : vector<8x512xf32>
    %59 = tpu.matmul %18, %12, %cst_40 {dimension_numbers = #tpu.dot_dimension_numbers<[1], [0], [0], [1], [0, 0, 1, 1], [], []>} : vector<8x128xf32>, vector<128x512xf32>, vector<8x512xf32> -> vector<8x512xf32>
    %60 = arith.addf %58, %59 : vector<8x512xf32>
    %61 = vector.extract_strided_slice %60 {offsets = [0, 0], sizes = [8, 128], strides = [1, 1]} : vector<8x512xf32> to vector<8x128xf32>
    %62 = arith.negf %61 : vector<8x128xf32>
    %63 = math.exp %62 : vector<8x128xf32>
    %cst_41 = arith.constant 1.000000e+00 : f32
    %64 = vector.broadcast %cst_41 : f32 to vector<8x128xf32>
    %65 = arith.addf %64, %63 : vector<8x128xf32>
    %66 = arith.divf %64, %65 : vector<8x128xf32>
    %67 = vector.extract_strided_slice %60 {offsets = [0, 128], sizes = [8, 128], strides = [1, 1]} : vector<8x512xf32> to vector<8x128xf32>
    %68 = arith.negf %67 : vector<8x128xf32>
    %69 = math.exp %68 : vector<8x128xf32>
    %cst_42 = arith.constant 1.000000e+00 : f32
    %70 = vector.broadcast %cst_42 : f32 to vector<8x128xf32>
    %71 = arith.addf %70, %69 : vector<8x128xf32>
    %72 = arith.divf %70, %71 : vector<8x128xf32>
    %73 = vector.extract_strided_slice %60 {offsets = [0, 256], sizes = [8, 128], strides = [1, 1]} : vector<8x512xf32> to vector<8x128xf32>
    %74 = math.tanh %73 : vector<8x128xf32>
    %75 = vector.extract_strided_slice %60 {offsets = [0, 384], sizes = [8, 128], strides = [1, 1]} : vector<8x512xf32> to vector<8x128xf32>
    %76 = arith.negf %75 : vector<8x128xf32>
    %77 = math.exp %76 : vector<8x128xf32>
    %cst_43 = arith.constant 1.000000e+00 : f32
    %78 = vector.broadcast %cst_43 : f32 to vector<8x128xf32>
    %79 = arith.addf %78, %77 : vector<8x128xf32>
    %80 = arith.divf %78, %79 : vector<8x128xf32>
    %81 = arith.mulf %72, %19 : vector<8x128xf32>
    %82 = arith.mulf %66, %74 : vector<8x128xf32>
    %83 = arith.addf %81, %82 : vector<8x128xf32>
    %84 = math.tanh %83 : vector<8x128xf32>
    %85 = arith.mulf %80, %84 : vector<8x128xf32>
    %c1_i32 = arith.constant 1 : i32
    %86 = arith.cmpi sge, %26, %c1_i32 : i32
    %c8_i32_44 = arith.constant 8 : i32
    %87 = arith.cmpi sle, %26, %c8_i32_44 : i32
    %88 = arith.andi %86, %87 : i1
    %89 = arith.select %88, %55, %20 : vector<8x128xf32>
    %90 = arith.select %88, %53, %21 : vector<8x128xf32>
    %91 = arith.addf %22, %55 : vector<8x128xf32>
    %92 = arith.select %88, %91, %22 : vector<8x128xf32>
    %93 = arith.maximumf %23, %55 : vector<8x128xf32>
    %94 = arith.select %88, %93, %23 : vector<8x128xf32>
    %95 = arith.minimumf %24, %55 : vector<8x128xf32>
    %96 = arith.select %88, %95, %24 : vector<8x128xf32>
    %c1_i32_45 = arith.constant 1 : i32
    %c8_i32_46 = arith.constant 8 : i32
    %97 = arith.muli %arg0, %c8_i32_46 : i32
    %98 = arith.addi %97, %c1_i32_45 : i32
    %cst_47 = arith.constant dense<0.000000e+00> : vector<8x512xf32>
    %99 = tpu.matmul %85, %13, %cst_47 {dimension_numbers = #tpu.dot_dimension_numbers<[1], [0], [0], [1], [0, 0, 1, 1], [], []>} : vector<8x128xf32>, vector<128x512xf32>, vector<8x512xf32> -> vector<8x512xf32>
    %cst_48 = arith.constant dense<0.000000e+00> : vector<8x512xf32>
    %100 = tpu.matmul %89, %14, %cst_48 {dimension_numbers = #tpu.dot_dimension_numbers<[1], [0], [0], [1], [0, 0, 1, 1], [], []>} : vector<8x128xf32>, vector<128x512xf32>, vector<8x512xf32> -> vector<8x512xf32>
    %101 = arith.addf %99, %100 : vector<8x512xf32>
    %102 = arith.addf %101, %17 : vector<8x512xf32>
    %103 = vector.extract_strided_slice %102 {offsets = [0, 0], sizes = [8, 128], strides = [1, 1]} : vector<8x512xf32> to vector<8x128xf32>
    %104 = arith.negf %103 : vector<8x128xf32>
    %105 = math.exp %104 : vector<8x128xf32>
    %cst_49 = arith.constant 1.000000e+00 : f32
    %106 = vector.broadcast %cst_49 : f32 to vector<8x128xf32>
    %107 = arith.addf %106, %105 : vector<8x128xf32>
    %108 = arith.divf %106, %107 : vector<8x128xf32>
    %109 = vector.extract_strided_slice %102 {offsets = [0, 128], sizes = [8, 128], strides = [1, 1]} : vector<8x512xf32> to vector<8x128xf32>
    %110 = arith.negf %109 : vector<8x128xf32>
    %111 = math.exp %110 : vector<8x128xf32>
    %cst_50 = arith.constant 1.000000e+00 : f32
    %112 = vector.broadcast %cst_50 : f32 to vector<8x128xf32>
    %113 = arith.addf %112, %111 : vector<8x128xf32>
    %114 = arith.divf %112, %113 : vector<8x128xf32>
    %115 = vector.extract_strided_slice %102 {offsets = [0, 256], sizes = [8, 128], strides = [1, 1]} : vector<8x512xf32> to vector<8x128xf32>
    %116 = math.tanh %115 : vector<8x128xf32>
    %117 = vector.extract_strided_slice %102 {offsets = [0, 384], sizes = [8, 128], strides = [1, 1]} : vector<8x512xf32> to vector<8x128xf32>
    %118 = arith.negf %117 : vector<8x128xf32>
    %119 = math.exp %118 : vector<8x128xf32>
    %cst_51 = arith.constant 1.000000e+00 : f32
    %120 = vector.broadcast %cst_51 : f32 to vector<8x128xf32>
    %121 = arith.addf %120, %119 : vector<8x128xf32>
    %122 = arith.divf %120, %121 : vector<8x128xf32>
    %123 = arith.mulf %114, %90 : vector<8x128xf32>
    %124 = arith.mulf %108, %116 : vector<8x128xf32>
    %125 = arith.addf %123, %124 : vector<8x128xf32>
    %126 = math.tanh %125 : vector<8x128xf32>
    %127 = arith.mulf %122, %126 : vector<8x128xf32>
    %128 = arith.index_cast %c1_i32_45 : i32 to index
    %c0_52 = arith.constant 0 : index
    %c0_53 = arith.constant 0 : index
    %129 = vector.load %arg21[%128, %c0_52, %c0_53] : memref<8x8x512xf32, #tpu.memory_space<vmem>>, vector<1x8x512xf32>
    %130 = vector.shape_cast %129 : vector<1x8x512xf32> to vector<8x512xf32>
    %cst_54 = arith.constant dense<0.000000e+00> : vector<8x512xf32>
    %131 = tpu.matmul %85, %12, %cst_54 {dimension_numbers = #tpu.dot_dimension_numbers<[1], [0], [0], [1], [0, 0, 1, 1], [], []>} : vector<8x128xf32>, vector<128x512xf32>, vector<8x512xf32> -> vector<8x512xf32>
    %132 = arith.addf %130, %131 : vector<8x512xf32>
    %133 = vector.extract_strided_slice %132 {offsets = [0, 0], sizes = [8, 128], strides = [1, 1]} : vector<8x512xf32> to vector<8x128xf32>
    %134 = arith.negf %133 : vector<8x128xf32>
    %135 = math.exp %134 : vector<8x128xf32>
    %cst_55 = arith.constant 1.000000e+00 : f32
    %136 = vector.broadcast %cst_55 : f32 to vector<8x128xf32>
    %137 = arith.addf %136, %135 : vector<8x128xf32>
    %138 = arith.divf %136, %137 : vector<8x128xf32>
    %139 = vector.extract_strided_slice %132 {offsets = [0, 128], sizes = [8, 128], strides = [1, 1]} : vector<8x512xf32> to vector<8x128xf32>
    %140 = arith.negf %139 : vector<8x128xf32>
    %141 = math.exp %140 : vector<8x128xf32>
    %cst_56 = arith.constant 1.000000e+00 : f32
    %142 = vector.broadcast %cst_56 : f32 to vector<8x128xf32>
    %143 = arith.addf %142, %141 : vector<8x128xf32>
    %144 = arith.divf %142, %143 : vector<8x128xf32>
    %145 = vector.extract_strided_slice %132 {offsets = [0, 256], sizes = [8, 128], strides = [1, 1]} : vector<8x512xf32> to vector<8x128xf32>
    %146 = math.tanh %145 : vector<8x128xf32>
    %147 = vector.extract_strided_slice %132 {offsets = [0, 384], sizes = [8, 128], strides = [1, 1]} : vector<8x512xf32> to vector<8x128xf32>
    %148 = arith.negf %147 : vector<8x128xf32>
    %149 = math.exp %148 : vector<8x128xf32>
    %cst_57 = arith.constant 1.000000e+00 : f32
    %150 = vector.broadcast %cst_57 : f32 to vector<8x128xf32>
    %151 = arith.addf %150, %149 : vector<8x128xf32>
    %152 = arith.divf %150, %151 : vector<8x128xf32>
    %153 = arith.mulf %144, %83 : vector<8x128xf32>
    %154 = arith.mulf %138, %146 : vector<8x128xf32>
    %155 = arith.addf %153, %154 : vector<8x128xf32>
    %156 = math.tanh %155 : vector<8x128xf32>
    %157 = arith.mulf %152, %156 : vector<8x128xf32>
    %c1_i32_58 = arith.constant 1 : i32
    %158 = arith.cmpi sge, %98, %c1_i32_58 : i32
    %c8_i32_59 = arith.constant 8 : i32
    %159 = arith.cmpi sle, %98, %c8_i32_59 : i32
    %160 = arith.andi %158, %159 : i1
    %161 = arith.select %160, %127, %89 : vector<8x128xf32>
    %162 = arith.select %160, %125, %90 : vector<8x128xf32>
    %163 = arith.addf %92, %127 : vector<8x128xf32>
    %164 = arith.select %160, %163, %92 : vector<8x128xf32>
    %165 = arith.maximumf %94, %127 : vector<8x128xf32>
    %166 = arith.select %160, %165, %94 : vector<8x128xf32>
    %167 = arith.minimumf %96, %127 : vector<8x128xf32>
    %168 = arith.select %160, %167, %96 : vector<8x128xf32>
    %c2_i32 = arith.constant 2 : i32
    %c8_i32_60 = arith.constant 8 : i32
    %169 = arith.muli %arg0, %c8_i32_60 : i32
    %170 = arith.addi %169, %c2_i32 : i32
    %cst_61 = arith.constant dense<0.000000e+00> : vector<8x512xf32>
    %171 = tpu.matmul %157, %13, %cst_61 {dimension_numbers = #tpu.dot_dimension_numbers<[1], [0], [0], [1], [0, 0, 1, 1], [], []>} : vector<8x128xf32>, vector<128x512xf32>, vector<8x512xf32> -> vector<8x512xf32>
    %cst_62 = arith.constant dense<0.000000e+00> : vector<8x512xf32>
    %172 = tpu.matmul %161, %14, %cst_62 {dimension_numbers = #tpu.dot_dimension_numbers<[1], [0], [0], [1], [0, 0, 1, 1], [], []>} : vector<8x128xf32>, vector<128x512xf32>, vector<8x512xf32> -> vector<8x512xf32>
    %173 = arith.addf %171, %172 : vector<8x512xf32>
    %174 = arith.addf %173, %17 : vector<8x512xf32>
    %175 = vector.extract_strided_slice %174 {offsets = [0, 0], sizes = [8, 128], strides = [1, 1]} : vector<8x512xf32> to vector<8x128xf32>
    %176 = arith.negf %175 : vector<8x128xf32>
    %177 = math.exp %176 : vector<8x128xf32>
    %cst_63 = arith.constant 1.000000e+00 : f32
    %178 = vector.broadcast %cst_63 : f32 to vector<8x128xf32>
    %179 = arith.addf %178, %177 : vector<8x128xf32>
    %180 = arith.divf %178, %179 : vector<8x128xf32>
    %181 = vector.extract_strided_slice %174 {offsets = [0, 128], sizes = [8, 128], strides = [1, 1]} : vector<8x512xf32> to vector<8x128xf32>
    %182 = arith.negf %181 : vector<8x128xf32>
    %183 = math.exp %182 : vector<8x128xf32>
    %cst_64 = arith.constant 1.000000e+00 : f32
    %184 = vector.broadcast %cst_64 : f32 to vector<8x128xf32>
    %185 = arith.addf %184, %183 : vector<8x128xf32>
    %186 = arith.divf %184, %185 : vector<8x128xf32>
    %187 = vector.extract_strided_slice %174 {offsets = [0, 256], sizes = [8, 128], strides = [1, 1]} : vector<8x512xf32> to vector<8x128xf32>
    %188 = math.tanh %187 : vector<8x128xf32>
    %189 = vector.extract_strided_slice %174 {offsets = [0, 384], sizes = [8, 128], strides = [1, 1]} : vector<8x512xf32> to vector<8x128xf32>
    %190 = arith.negf %189 : vector<8x128xf32>
    %191 = math.exp %190 : vector<8x128xf32>
    %cst_65 = arith.constant 1.000000e+00 : f32
    %192 = vector.broadcast %cst_65 : f32 to vector<8x128xf32>
    %193 = arith.addf %192, %191 : vector<8x128xf32>
    %194 = arith.divf %192, %193 : vector<8x128xf32>
    %195 = arith.mulf %186, %162 : vector<8x128xf32>
    %196 = arith.mulf %180, %188 : vector<8x128xf32>
    %197 = arith.addf %195, %196 : vector<8x128xf32>
    %198 = math.tanh %197 : vector<8x128xf32>
    %199 = arith.mulf %194, %198 : vector<8x128xf32>
    %200 = arith.index_cast %c2_i32 : i32 to index
    %c0_66 = arith.constant 0 : index
    %c0_67 = arith.constant 0 : index
    %201 = vector.load %arg21[%200, %c0_66, %c0_67] : memref<8x8x512xf32, #tpu.memory_space<vmem>>, vector<1x8x512xf32>
    %202 = vector.shape_cast %201 : vector<1x8x512xf32> to vector<8x512xf32>
    %cst_68 = arith.constant dense<0.000000e+00> : vector<8x512xf32>
    %203 = tpu.matmul %157, %12, %cst_68 {dimension_numbers = #tpu.dot_dimension_numbers<[1], [0], [0], [1], [0, 0, 1, 1], [], []>} : vector<8x128xf32>, vector<128x512xf32>, vector<8x512xf32> -> vector<8x512xf32>
    %204 = arith.addf %202, %203 : vector<8x512xf32>
    %205 = vector.extract_strided_slice %204 {offsets = [0, 0], sizes = [8, 128], strides = [1, 1]} : vector<8x512xf32> to vector<8x128xf32>
    %206 = arith.negf %205 : vector<8x128xf32>
    %207 = math.exp %206 : vector<8x128xf32>
    %cst_69 = arith.constant 1.000000e+00 : f32
    %208 = vector.broadcast %cst_69 : f32 to vector<8x128xf32>
    %209 = arith.addf %208, %207 : vector<8x128xf32>
    %210 = arith.divf %208, %209 : vector<8x128xf32>
    %211 = vector.extract_strided_slice %204 {offsets = [0, 128], sizes = [8, 128], strides = [1, 1]} : vector<8x512xf32> to vector<8x128xf32>
    %212 = arith.negf %211 : vector<8x128xf32>
    %213 = math.exp %212 : vector<8x128xf32>
    %cst_70 = arith.constant 1.000000e+00 : f32
    %214 = vector.broadcast %cst_70 : f32 to vector<8x128xf32>
    %215 = arith.addf %214, %213 : vector<8x128xf32>
    %216 = arith.divf %214, %215 : vector<8x128xf32>
    %217 = vector.extract_strided_slice %204 {offsets = [0, 256], sizes = [8, 128], strides = [1, 1]} : vector<8x512xf32> to vector<8x128xf32>
    %218 = math.tanh %217 : vector<8x128xf32>
    %219 = vector.extract_strided_slice %204 {offsets = [0, 384], sizes = [8, 128], strides = [1, 1]} : vector<8x512xf32> to vector<8x128xf32>
    %220 = arith.negf %219 : vector<8x128xf32>
    %221 = math.exp %220 : vector<8x128xf32>
    %cst_71 = arith.constant 1.000000e+00 : f32
    %222 = vector.broadcast %cst_71 : f32 to vector<8x128xf32>
    %223 = arith.addf %222, %221 : vector<8x128xf32>
    %224 = arith.divf %222, %223 : vector<8x128xf32>
    %225 = arith.mulf %216, %155 : vector<8x128xf32>
    %226 = arith.mulf %210, %218 : vector<8x128xf32>
    %227 = arith.addf %225, %226 : vector<8x128xf32>
    %228 = math.tanh %227 : vector<8x128xf32>
    %229 = arith.mulf %224, %228 : vector<8x128xf32>
    %c1_i32_72 = arith.constant 1 : i32
    %230 = arith.cmpi sge, %170, %c1_i32_72 : i32
    %c8_i32_73 = arith.constant 8 : i32
    %231 = arith.cmpi sle, %170, %c8_i32_73 : i32
    %232 = arith.andi %230, %231 : i1
    %233 = arith.select %232, %199, %161 : vector<8x128xf32>
    %234 = arith.select %232, %197, %162 : vector<8x128xf32>
    %235 = arith.addf %164, %199 : vector<8x128xf32>
    %236 = arith.select %232, %235, %164 : vector<8x128xf32>
    %237 = arith.maximumf %166, %199 : vector<8x128xf32>
    %238 = arith.select %232, %237, %166 : vector<8x128xf32>
    %239 = arith.minimumf %168, %199 : vector<8x128xf32>
    %240 = arith.select %232, %239, %168 : vector<8x128xf32>
    %c3_i32 = arith.constant 3 : i32
    %c8_i32_74 = arith.constant 8 : i32
    %241 = arith.muli %arg0, %c8_i32_74 : i32
    %242 = arith.addi %241, %c3_i32 : i32
    %cst_75 = arith.constant dense<0.000000e+00> : vector<8x512xf32>
    %243 = tpu.matmul %229, %13, %cst_75 {dimension_numbers = #tpu.dot_dimension_numbers<[1], [0], [0], [1], [0, 0, 1, 1], [], []>} : vector<8x128xf32>, vector<128x512xf32>, vector<8x512xf32> -> vector<8x512xf32>
    %cst_76 = arith.constant dense<0.000000e+00> : vector<8x512xf32>
    %244 = tpu.matmul %233, %14, %cst_76 {dimension_numbers = #tpu.dot_dimension_numbers<[1], [0], [0], [1], [0, 0, 1, 1], [], []>} : vector<8x128xf32>, vector<128x512xf32>, vector<8x512xf32> -> vector<8x512xf32>
    %245 = arith.addf %243, %244 : vector<8x512xf32>
    %246 = arith.addf %245, %17 : vector<8x512xf32>
    %247 = vector.extract_strided_slice %246 {offsets = [0, 0], sizes = [8, 128], strides = [1, 1]} : vector<8x512xf32> to vector<8x128xf32>
    %248 = arith.negf %247 : vector<8x128xf32>
    %249 = math.exp %248 : vector<8x128xf32>
    %cst_77 = arith.constant 1.000000e+00 : f32
    %250 = vector.broadcast %cst_77 : f32 to vector<8x128xf32>
    %251 = arith.addf %250, %249 : vector<8x128xf32>
    %252 = arith.divf %250, %251 : vector<8x128xf32>
    %253 = vector.extract_strided_slice %246 {offsets = [0, 128], sizes = [8, 128], strides = [1, 1]} : vector<8x512xf32> to vector<8x128xf32>
    %254 = arith.negf %253 : vector<8x128xf32>
    %255 = math.exp %254 : vector<8x128xf32>
    %cst_78 = arith.constant 1.000000e+00 : f32
    %256 = vector.broadcast %cst_78 : f32 to vector<8x128xf32>
    %257 = arith.addf %256, %255 : vector<8x128xf32>
    %258 = arith.divf %256, %257 : vector<8x128xf32>
    %259 = vector.extract_strided_slice %246 {offsets = [0, 256], sizes = [8, 128], strides = [1, 1]} : vector<8x512xf32> to vector<8x128xf32>
    %260 = math.tanh %259 : vector<8x128xf32>
    %261 = vector.extract_strided_slice %246 {offsets = [0, 384], sizes = [8, 128], strides = [1, 1]} : vector<8x512xf32> to vector<8x128xf32>
    %262 = arith.negf %261 : vector<8x128xf32>
    %263 = math.exp %262 : vector<8x128xf32>
    %cst_79 = arith.constant 1.000000e+00 : f32
    %264 = vector.broadcast %cst_79 : f32 to vector<8x128xf32>
    %265 = arith.addf %264, %263 : vector<8x128xf32>
    %266 = arith.divf %264, %265 : vector<8x128xf32>
    %267 = arith.mulf %258, %234 : vector<8x128xf32>
    %268 = arith.mulf %252, %260 : vector<8x128xf32>
    %269 = arith.addf %267, %268 : vector<8x128xf32>
    %270 = math.tanh %269 : vector<8x128xf32>
    %271 = arith.mulf %266, %270 : vector<8x128xf32>
    %272 = arith.index_cast %c3_i32 : i32 to index
    %c0_80 = arith.constant 0 : index
    %c0_81 = arith.constant 0 : index
    %273 = vector.load %arg21[%272, %c0_80, %c0_81] : memref<8x8x512xf32, #tpu.memory_space<vmem>>, vector<1x8x512xf32>
    %274 = vector.shape_cast %273 : vector<1x8x512xf32> to vector<8x512xf32>
    %cst_82 = arith.constant dense<0.000000e+00> : vector<8x512xf32>
    %275 = tpu.matmul %229, %12, %cst_82 {dimension_numbers = #tpu.dot_dimension_numbers<[1], [0], [0], [1], [0, 0, 1, 1], [], []>} : vector<8x128xf32>, vector<128x512xf32>, vector<8x512xf32> -> vector<8x512xf32>
    %276 = arith.addf %274, %275 : vector<8x512xf32>
    %277 = vector.extract_strided_slice %276 {offsets = [0, 0], sizes = [8, 128], strides = [1, 1]} : vector<8x512xf32> to vector<8x128xf32>
    %278 = arith.negf %277 : vector<8x128xf32>
    %279 = math.exp %278 : vector<8x128xf32>
    %cst_83 = arith.constant 1.000000e+00 : f32
    %280 = vector.broadcast %cst_83 : f32 to vector<8x128xf32>
    %281 = arith.addf %280, %279 : vector<8x128xf32>
    %282 = arith.divf %280, %281 : vector<8x128xf32>
    %283 = vector.extract_strided_slice %276 {offsets = [0, 128], sizes = [8, 128], strides = [1, 1]} : vector<8x512xf32> to vector<8x128xf32>
    %284 = arith.negf %283 : vector<8x128xf32>
    %285 = math.exp %284 : vector<8x128xf32>
    %cst_84 = arith.constant 1.000000e+00 : f32
    %286 = vector.broadcast %cst_84 : f32 to vector<8x128xf32>
    %287 = arith.addf %286, %285 : vector<8x128xf32>
    %288 = arith.divf %286, %287 : vector<8x128xf32>
    %289 = vector.extract_strided_slice %276 {offsets = [0, 256], sizes = [8, 128], strides = [1, 1]} : vector<8x512xf32> to vector<8x128xf32>
    %290 = math.tanh %289 : vector<8x128xf32>
    %291 = vector.extract_strided_slice %276 {offsets = [0, 384], sizes = [8, 128], strides = [1, 1]} : vector<8x512xf32> to vector<8x128xf32>
    %292 = arith.negf %291 : vector<8x128xf32>
    %293 = math.exp %292 : vector<8x128xf32>
    %cst_85 = arith.constant 1.000000e+00 : f32
    %294 = vector.broadcast %cst_85 : f32 to vector<8x128xf32>
    %295 = arith.addf %294, %293 : vector<8x128xf32>
    %296 = arith.divf %294, %295 : vector<8x128xf32>
    %297 = arith.mulf %288, %227 : vector<8x128xf32>
    %298 = arith.mulf %282, %290 : vector<8x128xf32>
    %299 = arith.addf %297, %298 : vector<8x128xf32>
    %300 = math.tanh %299 : vector<8x128xf32>
    %301 = arith.mulf %296, %300 : vector<8x128xf32>
    %c1_i32_86 = arith.constant 1 : i32
    %302 = arith.cmpi sge, %242, %c1_i32_86 : i32
    %c8_i32_87 = arith.constant 8 : i32
    %303 = arith.cmpi sle, %242, %c8_i32_87 : i32
    %304 = arith.andi %302, %303 : i1
    %305 = arith.select %304, %271, %233 : vector<8x128xf32>
    %306 = arith.select %304, %269, %234 : vector<8x128xf32>
    %307 = arith.addf %236, %271 : vector<8x128xf32>
    %308 = arith.select %304, %307, %236 : vector<8x128xf32>
    %309 = arith.maximumf %238, %271 : vector<8x128xf32>
    %310 = arith.select %304, %309, %238 : vector<8x128xf32>
    %311 = arith.minimumf %240, %271 : vector<8x128xf32>
    %312 = arith.select %304, %311, %240 : vector<8x128xf32>
    %c4_i32 = arith.constant 4 : i32
    %c8_i32_88 = arith.constant 8 : i32
    %313 = arith.muli %arg0, %c8_i32_88 : i32
    %314 = arith.addi %313, %c4_i32 : i32
    %cst_89 = arith.constant dense<0.000000e+00> : vector<8x512xf32>
    %315 = tpu.matmul %301, %13, %cst_89 {dimension_numbers = #tpu.dot_dimension_numbers<[1], [0], [0], [1], [0, 0, 1, 1], [], []>} : vector<8x128xf32>, vector<128x512xf32>, vector<8x512xf32> -> vector<8x512xf32>
    %cst_90 = arith.constant dense<0.000000e+00> : vector<8x512xf32>
    %316 = tpu.matmul %305, %14, %cst_90 {dimension_numbers = #tpu.dot_dimension_numbers<[1], [0], [0], [1], [0, 0, 1, 1], [], []>} : vector<8x128xf32>, vector<128x512xf32>, vector<8x512xf32> -> vector<8x512xf32>
    %317 = arith.addf %315, %316 : vector<8x512xf32>
    %318 = arith.addf %317, %17 : vector<8x512xf32>
    %319 = vector.extract_strided_slice %318 {offsets = [0, 0], sizes = [8, 128], strides = [1, 1]} : vector<8x512xf32> to vector<8x128xf32>
    %320 = arith.negf %319 : vector<8x128xf32>
    %321 = math.exp %320 : vector<8x128xf32>
    %cst_91 = arith.constant 1.000000e+00 : f32
    %322 = vector.broadcast %cst_91 : f32 to vector<8x128xf32>
    %323 = arith.addf %322, %321 : vector<8x128xf32>
    %324 = arith.divf %322, %323 : vector<8x128xf32>
    %325 = vector.extract_strided_slice %318 {offsets = [0, 128], sizes = [8, 128], strides = [1, 1]} : vector<8x512xf32> to vector<8x128xf32>
    %326 = arith.negf %325 : vector<8x128xf32>
    %327 = math.exp %326 : vector<8x128xf32>
    %cst_92 = arith.constant 1.000000e+00 : f32
    %328 = vector.broadcast %cst_92 : f32 to vector<8x128xf32>
    %329 = arith.addf %328, %327 : vector<8x128xf32>
    %330 = arith.divf %328, %329 : vector<8x128xf32>
    %331 = vector.extract_strided_slice %318 {offsets = [0, 256], sizes = [8, 128], strides = [1, 1]} : vector<8x512xf32> to vector<8x128xf32>
    %332 = math.tanh %331 : vector<8x128xf32>
    %333 = vector.extract_strided_slice %318 {offsets = [0, 384], sizes = [8, 128], strides = [1, 1]} : vector<8x512xf32> to vector<8x128xf32>
    %334 = arith.negf %333 : vector<8x128xf32>
    %335 = math.exp %334 : vector<8x128xf32>
    %cst_93 = arith.constant 1.000000e+00 : f32
    %336 = vector.broadcast %cst_93 : f32 to vector<8x128xf32>
    %337 = arith.addf %336, %335 : vector<8x128xf32>
    %338 = arith.divf %336, %337 : vector<8x128xf32>
    %339 = arith.mulf %330, %306 : vector<8x128xf32>
    %340 = arith.mulf %324, %332 : vector<8x128xf32>
    %341 = arith.addf %339, %340 : vector<8x128xf32>
    %342 = math.tanh %341 : vector<8x128xf32>
    %343 = arith.mulf %338, %342 : vector<8x128xf32>
    %344 = arith.index_cast %c4_i32 : i32 to index
    %c0_94 = arith.constant 0 : index
    %c0_95 = arith.constant 0 : index
    %345 = vector.load %arg21[%344, %c0_94, %c0_95] : memref<8x8x512xf32, #tpu.memory_space<vmem>>, vector<1x8x512xf32>
    %346 = vector.shape_cast %345 : vector<1x8x512xf32> to vector<8x512xf32>
    %cst_96 = arith.constant dense<0.000000e+00> : vector<8x512xf32>
    %347 = tpu.matmul %301, %12, %cst_96 {dimension_numbers = #tpu.dot_dimension_numbers<[1], [0], [0], [1], [0, 0, 1, 1], [], []>} : vector<8x128xf32>, vector<128x512xf32>, vector<8x512xf32> -> vector<8x512xf32>
    %348 = arith.addf %346, %347 : vector<8x512xf32>
    %349 = vector.extract_strided_slice %348 {offsets = [0, 0], sizes = [8, 128], strides = [1, 1]} : vector<8x512xf32> to vector<8x128xf32>
    %350 = arith.negf %349 : vector<8x128xf32>
    %351 = math.exp %350 : vector<8x128xf32>
    %cst_97 = arith.constant 1.000000e+00 : f32
    %352 = vector.broadcast %cst_97 : f32 to vector<8x128xf32>
    %353 = arith.addf %352, %351 : vector<8x128xf32>
    %354 = arith.divf %352, %353 : vector<8x128xf32>
    %355 = vector.extract_strided_slice %348 {offsets = [0, 128], sizes = [8, 128], strides = [1, 1]} : vector<8x512xf32> to vector<8x128xf32>
    %356 = arith.negf %355 : vector<8x128xf32>
    %357 = math.exp %356 : vector<8x128xf32>
    %cst_98 = arith.constant 1.000000e+00 : f32
    %358 = vector.broadcast %cst_98 : f32 to vector<8x128xf32>
    %359 = arith.addf %358, %357 : vector<8x128xf32>
    %360 = arith.divf %358, %359 : vector<8x128xf32>
    %361 = vector.extract_strided_slice %348 {offsets = [0, 256], sizes = [8, 128], strides = [1, 1]} : vector<8x512xf32> to vector<8x128xf32>
    %362 = math.tanh %361 : vector<8x128xf32>
    %363 = vector.extract_strided_slice %348 {offsets = [0, 384], sizes = [8, 128], strides = [1, 1]} : vector<8x512xf32> to vector<8x128xf32>
    %364 = arith.negf %363 : vector<8x128xf32>
    %365 = math.exp %364 : vector<8x128xf32>
    %cst_99 = arith.constant 1.000000e+00 : f32
    %366 = vector.broadcast %cst_99 : f32 to vector<8x128xf32>
    %367 = arith.addf %366, %365 : vector<8x128xf32>
    %368 = arith.divf %366, %367 : vector<8x128xf32>
    %369 = arith.mulf %360, %299 : vector<8x128xf32>
    %370 = arith.mulf %354, %362 : vector<8x128xf32>
    %371 = arith.addf %369, %370 : vector<8x128xf32>
    %372 = math.tanh %371 : vector<8x128xf32>
    %373 = arith.mulf %368, %372 : vector<8x128xf32>
    %c1_i32_100 = arith.constant 1 : i32
    %374 = arith.cmpi sge, %314, %c1_i32_100 : i32
    %c8_i32_101 = arith.constant 8 : i32
    %375 = arith.cmpi sle, %314, %c8_i32_101 : i32
    %376 = arith.andi %374, %375 : i1
    %377 = arith.select %376, %343, %305 : vector<8x128xf32>
    %378 = arith.select %376, %341, %306 : vector<8x128xf32>
    %379 = arith.addf %308, %343 : vector<8x128xf32>
    %380 = arith.select %376, %379, %308 : vector<8x128xf32>
    %381 = arith.maximumf %310, %343 : vector<8x128xf32>
    %382 = arith.select %376, %381, %310 : vector<8x128xf32>
    %383 = arith.minimumf %312, %343 : vector<8x128xf32>
    %384 = arith.select %376, %383, %312 : vector<8x128xf32>
    %c5_i32 = arith.constant 5 : i32
    %c8_i32_102 = arith.constant 8 : i32
    %385 = arith.muli %arg0, %c8_i32_102 : i32
    %386 = arith.addi %385, %c5_i32 : i32
    %cst_103 = arith.constant dense<0.000000e+00> : vector<8x512xf32>
    %387 = tpu.matmul %373, %13, %cst_103 {dimension_numbers = #tpu.dot_dimension_numbers<[1], [0], [0], [1], [0, 0, 1, 1], [], []>} : vector<8x128xf32>, vector<128x512xf32>, vector<8x512xf32> -> vector<8x512xf32>
    %cst_104 = arith.constant dense<0.000000e+00> : vector<8x512xf32>
    %388 = tpu.matmul %377, %14, %cst_104 {dimension_numbers = #tpu.dot_dimension_numbers<[1], [0], [0], [1], [0, 0, 1, 1], [], []>} : vector<8x128xf32>, vector<128x512xf32>, vector<8x512xf32> -> vector<8x512xf32>
    %389 = arith.addf %387, %388 : vector<8x512xf32>
    %390 = arith.addf %389, %17 : vector<8x512xf32>
    %391 = vector.extract_strided_slice %390 {offsets = [0, 0], sizes = [8, 128], strides = [1, 1]} : vector<8x512xf32> to vector<8x128xf32>
    %392 = arith.negf %391 : vector<8x128xf32>
    %393 = math.exp %392 : vector<8x128xf32>
    %cst_105 = arith.constant 1.000000e+00 : f32
    %394 = vector.broadcast %cst_105 : f32 to vector<8x128xf32>
    %395 = arith.addf %394, %393 : vector<8x128xf32>
    %396 = arith.divf %394, %395 : vector<8x128xf32>
    %397 = vector.extract_strided_slice %390 {offsets = [0, 128], sizes = [8, 128], strides = [1, 1]} : vector<8x512xf32> to vector<8x128xf32>
    %398 = arith.negf %397 : vector<8x128xf32>
    %399 = math.exp %398 : vector<8x128xf32>
    %cst_106 = arith.constant 1.000000e+00 : f32
    %400 = vector.broadcast %cst_106 : f32 to vector<8x128xf32>
    %401 = arith.addf %400, %399 : vector<8x128xf32>
    %402 = arith.divf %400, %401 : vector<8x128xf32>
    %403 = vector.extract_strided_slice %390 {offsets = [0, 256], sizes = [8, 128], strides = [1, 1]} : vector<8x512xf32> to vector<8x128xf32>
    %404 = math.tanh %403 : vector<8x128xf32>
    %405 = vector.extract_strided_slice %390 {offsets = [0, 384], sizes = [8, 128], strides = [1, 1]} : vector<8x512xf32> to vector<8x128xf32>
    %406 = arith.negf %405 : vector<8x128xf32>
    %407 = math.exp %406 : vector<8x128xf32>
    %cst_107 = arith.constant 1.000000e+00 : f32
    %408 = vector.broadcast %cst_107 : f32 to vector<8x128xf32>
    %409 = arith.addf %408, %407 : vector<8x128xf32>
    %410 = arith.divf %408, %409 : vector<8x128xf32>
    %411 = arith.mulf %402, %378 : vector<8x128xf32>
    %412 = arith.mulf %396, %404 : vector<8x128xf32>
    %413 = arith.addf %411, %412 : vector<8x128xf32>
    %414 = math.tanh %413 : vector<8x128xf32>
    %415 = arith.mulf %410, %414 : vector<8x128xf32>
    %416 = arith.index_cast %c5_i32 : i32 to index
    %c0_108 = arith.constant 0 : index
    %c0_109 = arith.constant 0 : index
    %417 = vector.load %arg21[%416, %c0_108, %c0_109] : memref<8x8x512xf32, #tpu.memory_space<vmem>>, vector<1x8x512xf32>
    %418 = vector.shape_cast %417 : vector<1x8x512xf32> to vector<8x512xf32>
    %cst_110 = arith.constant dense<0.000000e+00> : vector<8x512xf32>
    %419 = tpu.matmul %373, %12, %cst_110 {dimension_numbers = #tpu.dot_dimension_numbers<[1], [0], [0], [1], [0, 0, 1, 1], [], []>} : vector<8x128xf32>, vector<128x512xf32>, vector<8x512xf32> -> vector<8x512xf32>
    %420 = arith.addf %418, %419 : vector<8x512xf32>
    %421 = vector.extract_strided_slice %420 {offsets = [0, 0], sizes = [8, 128], strides = [1, 1]} : vector<8x512xf32> to vector<8x128xf32>
    %422 = arith.negf %421 : vector<8x128xf32>
    %423 = math.exp %422 : vector<8x128xf32>
    %cst_111 = arith.constant 1.000000e+00 : f32
    %424 = vector.broadcast %cst_111 : f32 to vector<8x128xf32>
    %425 = arith.addf %424, %423 : vector<8x128xf32>
    %426 = arith.divf %424, %425 : vector<8x128xf32>
    %427 = vector.extract_strided_slice %420 {offsets = [0, 128], sizes = [8, 128], strides = [1, 1]} : vector<8x512xf32> to vector<8x128xf32>
    %428 = arith.negf %427 : vector<8x128xf32>
    %429 = math.exp %428 : vector<8x128xf32>
    %cst_112 = arith.constant 1.000000e+00 : f32
    %430 = vector.broadcast %cst_112 : f32 to vector<8x128xf32>
    %431 = arith.addf %430, %429 : vector<8x128xf32>
    %432 = arith.divf %430, %431 : vector<8x128xf32>
    %433 = vector.extract_strided_slice %420 {offsets = [0, 256], sizes = [8, 128], strides = [1, 1]} : vector<8x512xf32> to vector<8x128xf32>
    %434 = math.tanh %433 : vector<8x128xf32>
    %435 = vector.extract_strided_slice %420 {offsets = [0, 384], sizes = [8, 128], strides = [1, 1]} : vector<8x512xf32> to vector<8x128xf32>
    %436 = arith.negf %435 : vector<8x128xf32>
    %437 = math.exp %436 : vector<8x128xf32>
    %cst_113 = arith.constant 1.000000e+00 : f32
    %438 = vector.broadcast %cst_113 : f32 to vector<8x128xf32>
    %439 = arith.addf %438, %437 : vector<8x128xf32>
    %440 = arith.divf %438, %439 : vector<8x128xf32>
    %441 = arith.mulf %432, %371 : vector<8x128xf32>
    %442 = arith.mulf %426, %434 : vector<8x128xf32>
    %443 = arith.addf %441, %442 : vector<8x128xf32>
    %444 = math.tanh %443 : vector<8x128xf32>
    %445 = arith.mulf %440, %444 : vector<8x128xf32>
    %c1_i32_114 = arith.constant 1 : i32
    %446 = arith.cmpi sge, %386, %c1_i32_114 : i32
    %c8_i32_115 = arith.constant 8 : i32
    %447 = arith.cmpi sle, %386, %c8_i32_115 : i32
    %448 = arith.andi %446, %447 : i1
    %449 = arith.select %448, %415, %377 : vector<8x128xf32>
    %450 = arith.select %448, %413, %378 : vector<8x128xf32>
    %451 = arith.addf %380, %415 : vector<8x128xf32>
    %452 = arith.select %448, %451, %380 : vector<8x128xf32>
    %453 = arith.maximumf %382, %415 : vector<8x128xf32>
    %454 = arith.select %448, %453, %382 : vector<8x128xf32>
    %455 = arith.minimumf %384, %415 : vector<8x128xf32>
    %456 = arith.select %448, %455, %384 : vector<8x128xf32>
    %c6_i32 = arith.constant 6 : i32
    %c8_i32_116 = arith.constant 8 : i32
    %457 = arith.muli %arg0, %c8_i32_116 : i32
    %458 = arith.addi %457, %c6_i32 : i32
    %cst_117 = arith.constant dense<0.000000e+00> : vector<8x512xf32>
    %459 = tpu.matmul %445, %13, %cst_117 {dimension_numbers = #tpu.dot_dimension_numbers<[1], [0], [0], [1], [0, 0, 1, 1], [], []>} : vector<8x128xf32>, vector<128x512xf32>, vector<8x512xf32> -> vector<8x512xf32>
    %cst_118 = arith.constant dense<0.000000e+00> : vector<8x512xf32>
    %460 = tpu.matmul %449, %14, %cst_118 {dimension_numbers = #tpu.dot_dimension_numbers<[1], [0], [0], [1], [0, 0, 1, 1], [], []>} : vector<8x128xf32>, vector<128x512xf32>, vector<8x512xf32> -> vector<8x512xf32>
    %461 = arith.addf %459, %460 : vector<8x512xf32>
    %462 = arith.addf %461, %17 : vector<8x512xf32>
    %463 = vector.extract_strided_slice %462 {offsets = [0, 0], sizes = [8, 128], strides = [1, 1]} : vector<8x512xf32> to vector<8x128xf32>
    %464 = arith.negf %463 : vector<8x128xf32>
    %465 = math.exp %464 : vector<8x128xf32>
    %cst_119 = arith.constant 1.000000e+00 : f32
    %466 = vector.broadcast %cst_119 : f32 to vector<8x128xf32>
    %467 = arith.addf %466, %465 : vector<8x128xf32>
    %468 = arith.divf %466, %467 : vector<8x128xf32>
    %469 = vector.extract_strided_slice %462 {offsets = [0, 128], sizes = [8, 128], strides = [1, 1]} : vector<8x512xf32> to vector<8x128xf32>
    %470 = arith.negf %469 : vector<8x128xf32>
    %471 = math.exp %470 : vector<8x128xf32>
    %cst_120 = arith.constant 1.000000e+00 : f32
    %472 = vector.broadcast %cst_120 : f32 to vector<8x128xf32>
    %473 = arith.addf %472, %471 : vector<8x128xf32>
    %474 = arith.divf %472, %473 : vector<8x128xf32>
    %475 = vector.extract_strided_slice %462 {offsets = [0, 256], sizes = [8, 128], strides = [1, 1]} : vector<8x512xf32> to vector<8x128xf32>
    %476 = math.tanh %475 : vector<8x128xf32>
    %477 = vector.extract_strided_slice %462 {offsets = [0, 384], sizes = [8, 128], strides = [1, 1]} : vector<8x512xf32> to vector<8x128xf32>
    %478 = arith.negf %477 : vector<8x128xf32>
    %479 = math.exp %478 : vector<8x128xf32>
    %cst_121 = arith.constant 1.000000e+00 : f32
    %480 = vector.broadcast %cst_121 : f32 to vector<8x128xf32>
    %481 = arith.addf %480, %479 : vector<8x128xf32>
    %482 = arith.divf %480, %481 : vector<8x128xf32>
    %483 = arith.mulf %474, %450 : vector<8x128xf32>
    %484 = arith.mulf %468, %476 : vector<8x128xf32>
    %485 = arith.addf %483, %484 : vector<8x128xf32>
    %486 = math.tanh %485 : vector<8x128xf32>
    %487 = arith.mulf %482, %486 : vector<8x128xf32>
    %488 = arith.index_cast %c6_i32 : i32 to index
    %c0_122 = arith.constant 0 : index
    %c0_123 = arith.constant 0 : index
    %489 = vector.load %arg21[%488, %c0_122, %c0_123] : memref<8x8x512xf32, #tpu.memory_space<vmem>>, vector<1x8x512xf32>
    %490 = vector.shape_cast %489 : vector<1x8x512xf32> to vector<8x512xf32>
    %cst_124 = arith.constant dense<0.000000e+00> : vector<8x512xf32>
    %491 = tpu.matmul %445, %12, %cst_124 {dimension_numbers = #tpu.dot_dimension_numbers<[1], [0], [0], [1], [0, 0, 1, 1], [], []>} : vector<8x128xf32>, vector<128x512xf32>, vector<8x512xf32> -> vector<8x512xf32>
    %492 = arith.addf %490, %491 : vector<8x512xf32>
    %493 = vector.extract_strided_slice %492 {offsets = [0, 0], sizes = [8, 128], strides = [1, 1]} : vector<8x512xf32> to vector<8x128xf32>
    %494 = arith.negf %493 : vector<8x128xf32>
    %495 = math.exp %494 : vector<8x128xf32>
    %cst_125 = arith.constant 1.000000e+00 : f32
    %496 = vector.broadcast %cst_125 : f32 to vector<8x128xf32>
    %497 = arith.addf %496, %495 : vector<8x128xf32>
    %498 = arith.divf %496, %497 : vector<8x128xf32>
    %499 = vector.extract_strided_slice %492 {offsets = [0, 128], sizes = [8, 128], strides = [1, 1]} : vector<8x512xf32> to vector<8x128xf32>
    %500 = arith.negf %499 : vector<8x128xf32>
    %501 = math.exp %500 : vector<8x128xf32>
    %cst_126 = arith.constant 1.000000e+00 : f32
    %502 = vector.broadcast %cst_126 : f32 to vector<8x128xf32>
    %503 = arith.addf %502, %501 : vector<8x128xf32>
    %504 = arith.divf %502, %503 : vector<8x128xf32>
    %505 = vector.extract_strided_slice %492 {offsets = [0, 256], sizes = [8, 128], strides = [1, 1]} : vector<8x512xf32> to vector<8x128xf32>
    %506 = math.tanh %505 : vector<8x128xf32>
    %507 = vector.extract_strided_slice %492 {offsets = [0, 384], sizes = [8, 128], strides = [1, 1]} : vector<8x512xf32> to vector<8x128xf32>
    %508 = arith.negf %507 : vector<8x128xf32>
    %509 = math.exp %508 : vector<8x128xf32>
    %cst_127 = arith.constant 1.000000e+00 : f32
    %510 = vector.broadcast %cst_127 : f32 to vector<8x128xf32>
    %511 = arith.addf %510, %509 : vector<8x128xf32>
    %512 = arith.divf %510, %511 : vector<8x128xf32>
    %513 = arith.mulf %504, %443 : vector<8x128xf32>
    %514 = arith.mulf %498, %506 : vector<8x128xf32>
    %515 = arith.addf %513, %514 : vector<8x128xf32>
    %516 = math.tanh %515 : vector<8x128xf32>
    %517 = arith.mulf %512, %516 : vector<8x128xf32>
    %c1_i32_128 = arith.constant 1 : i32
    %518 = arith.cmpi sge, %458, %c1_i32_128 : i32
    %c8_i32_129 = arith.constant 8 : i32
    %519 = arith.cmpi sle, %458, %c8_i32_129 : i32
    %520 = arith.andi %518, %519 : i1
    %521 = arith.select %520, %487, %449 : vector<8x128xf32>
    %522 = arith.select %520, %485, %450 : vector<8x128xf32>
    %523 = arith.addf %452, %487 : vector<8x128xf32>
    %524 = arith.select %520, %523, %452 : vector<8x128xf32>
    %525 = arith.maximumf %454, %487 : vector<8x128xf32>
    %526 = arith.select %520, %525, %454 : vector<8x128xf32>
    %527 = arith.minimumf %456, %487 : vector<8x128xf32>
    %528 = arith.select %520, %527, %456 : vector<8x128xf32>
    %c7_i32 = arith.constant 7 : i32
    %c8_i32_130 = arith.constant 8 : i32
    %529 = arith.muli %arg0, %c8_i32_130 : i32
    %530 = arith.addi %529, %c7_i32 : i32
    %cst_131 = arith.constant dense<0.000000e+00> : vector<8x512xf32>
    %531 = tpu.matmul %517, %13, %cst_131 {dimension_numbers = #tpu.dot_dimension_numbers<[1], [0], [0], [1], [0, 0, 1, 1], [], []>} : vector<8x128xf32>, vector<128x512xf32>, vector<8x512xf32> -> vector<8x512xf32>
    %cst_132 = arith.constant dense<0.000000e+00> : vector<8x512xf32>
    %532 = tpu.matmul %521, %14, %cst_132 {dimension_numbers = #tpu.dot_dimension_numbers<[1], [0], [0], [1], [0, 0, 1, 1], [], []>} : vector<8x128xf32>, vector<128x512xf32>, vector<8x512xf32> -> vector<8x512xf32>
    %533 = arith.addf %531, %532 : vector<8x512xf32>
    %534 = arith.addf %533, %17 : vector<8x512xf32>
    %535 = vector.extract_strided_slice %534 {offsets = [0, 0], sizes = [8, 128], strides = [1, 1]} : vector<8x512xf32> to vector<8x128xf32>
    %536 = arith.negf %535 : vector<8x128xf32>
    %537 = math.exp %536 : vector<8x128xf32>
    %cst_133 = arith.constant 1.000000e+00 : f32
    %538 = vector.broadcast %cst_133 : f32 to vector<8x128xf32>
    %539 = arith.addf %538, %537 : vector<8x128xf32>
    %540 = arith.divf %538, %539 : vector<8x128xf32>
    %541 = vector.extract_strided_slice %534 {offsets = [0, 128], sizes = [8, 128], strides = [1, 1]} : vector<8x512xf32> to vector<8x128xf32>
    %542 = arith.negf %541 : vector<8x128xf32>
    %543 = math.exp %542 : vector<8x128xf32>
    %cst_134 = arith.constant 1.000000e+00 : f32
    %544 = vector.broadcast %cst_134 : f32 to vector<8x128xf32>
    %545 = arith.addf %544, %543 : vector<8x128xf32>
    %546 = arith.divf %544, %545 : vector<8x128xf32>
    %547 = vector.extract_strided_slice %534 {offsets = [0, 256], sizes = [8, 128], strides = [1, 1]} : vector<8x512xf32> to vector<8x128xf32>
    %548 = math.tanh %547 : vector<8x128xf32>
    %549 = vector.extract_strided_slice %534 {offsets = [0, 384], sizes = [8, 128], strides = [1, 1]} : vector<8x512xf32> to vector<8x128xf32>
    %550 = arith.negf %549 : vector<8x128xf32>
    %551 = math.exp %550 : vector<8x128xf32>
    %cst_135 = arith.constant 1.000000e+00 : f32
    %552 = vector.broadcast %cst_135 : f32 to vector<8x128xf32>
    %553 = arith.addf %552, %551 : vector<8x128xf32>
    %554 = arith.divf %552, %553 : vector<8x128xf32>
    %555 = arith.mulf %546, %522 : vector<8x128xf32>
    %556 = arith.mulf %540, %548 : vector<8x128xf32>
    %557 = arith.addf %555, %556 : vector<8x128xf32>
    %558 = math.tanh %557 : vector<8x128xf32>
    %559 = arith.mulf %554, %558 : vector<8x128xf32>
    %560 = arith.index_cast %c7_i32 : i32 to index
    %c0_136 = arith.constant 0 : index
    %c0_137 = arith.constant 0 : index
    %561 = vector.load %arg21[%560, %c0_136, %c0_137] : memref<8x8x512xf32, #tpu.memory_space<vmem>>, vector<1x8x512xf32>
    %562 = vector.shape_cast %561 : vector<1x8x512xf32> to vector<8x512xf32>
    %cst_138 = arith.constant dense<0.000000e+00> : vector<8x512xf32>
    %563 = tpu.matmul %517, %12, %cst_138 {dimension_numbers = #tpu.dot_dimension_numbers<[1], [0], [0], [1], [0, 0, 1, 1], [], []>} : vector<8x128xf32>, vector<128x512xf32>, vector<8x512xf32> -> vector<8x512xf32>
    %564 = arith.addf %562, %563 : vector<8x512xf32>
    %565 = vector.extract_strided_slice %564 {offsets = [0, 0], sizes = [8, 128], strides = [1, 1]} : vector<8x512xf32> to vector<8x128xf32>
    %566 = arith.negf %565 : vector<8x128xf32>
    %567 = math.exp %566 : vector<8x128xf32>
    %cst_139 = arith.constant 1.000000e+00 : f32
    %568 = vector.broadcast %cst_139 : f32 to vector<8x128xf32>
    %569 = arith.addf %568, %567 : vector<8x128xf32>
    %570 = arith.divf %568, %569 : vector<8x128xf32>
    %571 = vector.extract_strided_slice %564 {offsets = [0, 128], sizes = [8, 128], strides = [1, 1]} : vector<8x512xf32> to vector<8x128xf32>
    %572 = arith.negf %571 : vector<8x128xf32>
    %573 = math.exp %572 : vector<8x128xf32>
    %cst_140 = arith.constant 1.000000e+00 : f32
    %574 = vector.broadcast %cst_140 : f32 to vector<8x128xf32>
    %575 = arith.addf %574, %573 : vector<8x128xf32>
    %576 = arith.divf %574, %575 : vector<8x128xf32>
    %577 = vector.extract_strided_slice %564 {offsets = [0, 256], sizes = [8, 128], strides = [1, 1]} : vector<8x512xf32> to vector<8x128xf32>
    %578 = math.tanh %577 : vector<8x128xf32>
    %579 = vector.extract_strided_slice %564 {offsets = [0, 384], sizes = [8, 128], strides = [1, 1]} : vector<8x512xf32> to vector<8x128xf32>
    %580 = arith.negf %579 : vector<8x128xf32>
    %581 = math.exp %580 : vector<8x128xf32>
    %cst_141 = arith.constant 1.000000e+00 : f32
    %582 = vector.broadcast %cst_141 : f32 to vector<8x128xf32>
    %583 = arith.addf %582, %581 : vector<8x128xf32>
    %584 = arith.divf %582, %583 : vector<8x128xf32>
    %585 = arith.mulf %576, %515 : vector<8x128xf32>
    %586 = arith.mulf %570, %578 : vector<8x128xf32>
    %587 = arith.addf %585, %586 : vector<8x128xf32>
    %588 = math.tanh %587 : vector<8x128xf32>
    %589 = arith.mulf %584, %588 : vector<8x128xf32>
    %c1_i32_142 = arith.constant 1 : i32
    %590 = arith.cmpi sge, %530, %c1_i32_142 : i32
    %c8_i32_143 = arith.constant 8 : i32
    %591 = arith.cmpi sle, %530, %c8_i32_143 : i32
    %592 = arith.andi %590, %591 : i1
    %593 = arith.select %592, %559, %521 : vector<8x128xf32>
    %594 = arith.select %592, %557, %522 : vector<8x128xf32>
    %595 = arith.addf %524, %559 : vector<8x128xf32>
    %596 = arith.select %592, %595, %524 : vector<8x128xf32>
    %597 = arith.maximumf %526, %559 : vector<8x128xf32>
    %598 = arith.select %592, %597, %526 : vector<8x128xf32>
    %599 = arith.minimumf %528, %559 : vector<8x128xf32>
    %600 = arith.select %592, %599, %528 : vector<8x128xf32>
    %c8_i32_144 = arith.constant 8 : i32
    %c0_145 = arith.constant 0 : index
    %c0_146 = arith.constant 0 : index
    %601 = vector.load %arg14[%c0_145, %c0_146] : memref<8x128xf32, #tpu.memory_space<vmem>>, vector<8x128xf32>
    tpu.vector_store %arg14[%c0_145, %c0_146], %589 {strides = array<i32>} : memref<8x128xf32, #tpu.memory_space<vmem>>, vector<8x128xf32>,
    %c0_147 = arith.constant 0 : index
    %c0_148 = arith.constant 0 : index
    %602 = vector.load %arg15[%c0_147, %c0_148] : memref<8x128xf32, #tpu.memory_space<vmem>>, vector<8x128xf32>
    tpu.vector_store %arg15[%c0_147, %c0_148], %587 {strides = array<i32>} : memref<8x128xf32, #tpu.memory_space<vmem>>, vector<8x128xf32>,
    %c0_149 = arith.constant 0 : index
    %c0_150 = arith.constant 0 : index
    %603 = vector.load %arg16[%c0_149, %c0_150] : memref<8x128xf32, #tpu.memory_space<vmem>>, vector<8x128xf32>
    tpu.vector_store %arg16[%c0_149, %c0_150], %593 {strides = array<i32>} : memref<8x128xf32, #tpu.memory_space<vmem>>, vector<8x128xf32>,
    %c0_151 = arith.constant 0 : index
    %c0_152 = arith.constant 0 : index
    %604 = vector.load %arg17[%c0_151, %c0_152] : memref<8x128xf32, #tpu.memory_space<vmem>>, vector<8x128xf32>
    tpu.vector_store %arg17[%c0_151, %c0_152], %594 {strides = array<i32>} : memref<8x128xf32, #tpu.memory_space<vmem>>, vector<8x128xf32>,
    %c0_153 = arith.constant 0 : index
    %c0_154 = arith.constant 0 : index
    %605 = vector.load %arg18[%c0_153, %c0_154] : memref<8x128xf32, #tpu.memory_space<vmem>>, vector<8x128xf32>
    tpu.vector_store %arg18[%c0_153, %c0_154], %596 {strides = array<i32>} : memref<8x128xf32, #tpu.memory_space<vmem>>, vector<8x128xf32>,
    %c0_155 = arith.constant 0 : index
    %c0_156 = arith.constant 0 : index
    %606 = vector.load %arg19[%c0_155, %c0_156] : memref<8x128xf32, #tpu.memory_space<vmem>>, vector<8x128xf32>
    tpu.vector_store %arg19[%c0_155, %c0_156], %598 {strides = array<i32>} : memref<8x128xf32, #tpu.memory_space<vmem>>, vector<8x128xf32>,
    %c0_157 = arith.constant 0 : index
    %c0_158 = arith.constant 0 : index
    %607 = vector.load %arg20[%c0_157, %c0_158] : memref<8x128xf32, #tpu.memory_space<vmem>>, vector<8x128xf32>
    tpu.vector_store %arg20[%c0_157, %c0_158], %600 {strides = array<i32>} : memref<8x128xf32, #tpu.memory_space<vmem>>, vector<8x128xf32>,
    %c0_i32_159 = arith.constant 0 : i32
    %608 = arith.cmpi eq, %arg0, %c0_i32_159 : i32
    %609 = arith.extui %608 : i1 to i32
    %c0_i32_160 = arith.constant 0 : i32
    %610 = arith.cmpi ne, %609, %c0_i32_160 : i32
    scf.if %610 {
      %cst_161 = arith.constant dense<0.000000e+00> : vector<8x512xf32>
      %611 = tpu.matmul %589, %13, %cst_161 {dimension_numbers = #tpu.dot_dimension_numbers<[1], [0], [0], [1], [0, 0, 1, 1], [], []>} : vector<8x128xf32>, vector<128x512xf32>, vector<8x512xf32> -> vector<8x512xf32>
      %cst_162 = arith.constant dense<0.000000e+00> : vector<8x512xf32>
      %612 = tpu.matmul %593, %14, %cst_162 {dimension_numbers = #tpu.dot_dimension_numbers<[1], [0], [0], [1], [0, 0, 1, 1], [], []>} : vector<8x128xf32>, vector<128x512xf32>, vector<8x512xf32> -> vector<8x512xf32>
      %613 = arith.addf %611, %612 : vector<8x512xf32>
      %614 = arith.addf %613, %17 : vector<8x512xf32>
      %615 = vector.extract_strided_slice %614 {offsets = [0, 0], sizes = [8, 128], strides = [1, 1]} : vector<8x512xf32> to vector<8x128xf32>
      %616 = arith.negf %615 : vector<8x128xf32>
      %617 = math.exp %616 : vector<8x128xf32>
      %cst_163 = arith.constant 1.000000e+00 : f32
      %618 = vector.broadcast %cst_163 : f32 to vector<8x128xf32>
      %619 = arith.addf %618, %617 : vector<8x128xf32>
      %620 = arith.divf %618, %619 : vector<8x128xf32>
      %621 = vector.extract_strided_slice %614 {offsets = [0, 128], sizes = [8, 128], strides = [1, 1]} : vector<8x512xf32> to vector<8x128xf32>
      %622 = arith.negf %621 : vector<8x128xf32>
      %623 = math.exp %622 : vector<8x128xf32>
      %cst_164 = arith.constant 1.000000e+00 : f32
      %624 = vector.broadcast %cst_164 : f32 to vector<8x128xf32>
      %625 = arith.addf %624, %623 : vector<8x128xf32>
      %626 = arith.divf %624, %625 : vector<8x128xf32>
      %627 = vector.extract_strided_slice %614 {offsets = [0, 256], sizes = [8, 128], strides = [1, 1]} : vector<8x512xf32> to vector<8x128xf32>
      %628 = math.tanh %627 : vector<8x128xf32>
      %629 = vector.extract_strided_slice %614 {offsets = [0, 384], sizes = [8, 128], strides = [1, 1]} : vector<8x512xf32> to vector<8x128xf32>
      %630 = arith.negf %629 : vector<8x128xf32>
      %631 = math.exp %630 : vector<8x128xf32>
      %cst_165 = arith.constant 1.000000e+00 : f32
      %632 = vector.broadcast %cst_165 : f32 to vector<8x128xf32>
      %633 = arith.addf %632, %631 : vector<8x128xf32>
      %634 = arith.divf %632, %633 : vector<8x128xf32>
      %635 = arith.mulf %626, %594 : vector<8x128xf32>
      %636 = arith.mulf %620, %628 : vector<8x128xf32>
      %637 = arith.addf %635, %636 : vector<8x128xf32>
      %638 = math.tanh %637 : vector<8x128xf32>
      %639 = arith.mulf %634, %638 : vector<8x128xf32>
      %640 = arith.addf %596, %639 : vector<8x128xf32>
      %641 = arith.maximumf %598, %639 : vector<8x128xf32>
      %642 = arith.minimumf %600, %639 : vector<8x128xf32>
      %cst_166 = arith.constant 1.250000e-01 : f32
      %643 = vector.broadcast %cst_166 : f32 to vector<8x128xf32>
      %644 = arith.mulf %640, %643 : vector<8x128xf32>
      %c0_167 = arith.constant 0 : index
      %c0_168 = arith.constant 0 : index
      %645 = vector.load %arg8[%c0_167, %c0_168] : memref<128x5xf32, #tpu.memory_space<vmem>>, vector<128x5xf32>
      %cst_169 = arith.constant dense<0.000000e+00> : vector<8x5xf32>
      %646 = tpu.matmul %639, %645, %cst_169 {dimension_numbers = #tpu.dot_dimension_numbers<[1], [0], [0], [1], [0, 0, 1, 1], [], []>} : vector<8x128xf32>, vector<128x5xf32>, vector<8x5xf32> -> vector<8x5xf32>
      %c0_170 = arith.constant 0 : index
      %c0_171 = arith.constant 0 : index
      %647 = vector.load %arg9[%c0_170, %c0_171] : memref<128x5xf32, #tpu.memory_space<vmem>>, vector<128x5xf32>
      %cst_172 = arith.constant dense<0.000000e+00> : vector<8x5xf32>
      %648 = tpu.matmul %644, %647, %cst_172 {dimension_numbers = #tpu.dot_dimension_numbers<[1], [0], [0], [1], [0, 0, 1, 1], [], []>} : vector<8x128xf32>, vector<128x5xf32>, vector<8x5xf32> -> vector<8x5xf32>
      %649 = arith.addf %646, %648 : vector<8x5xf32>
      %c0_173 = arith.constant 0 : index
      %c0_174 = arith.constant 0 : index
      %650 = vector.load %arg10[%c0_173, %c0_174] : memref<128x5xf32, #tpu.memory_space<vmem>>, vector<128x5xf32>
      %cst_175 = arith.constant dense<0.000000e+00> : vector<8x5xf32>
      %651 = tpu.matmul %641, %650, %cst_175 {dimension_numbers = #tpu.dot_dimension_numbers<[1], [0], [0], [1], [0, 0, 1, 1], [], []>} : vector<8x128xf32>, vector<128x5xf32>, vector<8x5xf32> -> vector<8x5xf32>
      %652 = arith.addf %649, %651 : vector<8x5xf32>
      %c0_176 = arith.constant 0 : index
      %c0_177 = arith.constant 0 : index
      %653 = vector.load %arg11[%c0_176, %c0_177] : memref<128x5xf32, #tpu.memory_space<vmem>>, vector<128x5xf32>
      %cst_178 = arith.constant dense<0.000000e+00> : vector<8x5xf32>
      %654 = tpu.matmul %642, %653, %cst_178 {dimension_numbers = #tpu.dot_dimension_numbers<[1], [0], [0], [1], [0, 0, 1, 1], [], []>} : vector<8x128xf32>, vector<128x5xf32>, vector<8x5xf32> -> vector<8x5xf32>
      %655 = arith.addf %652, %654 : vector<8x5xf32>
      %c0_179 = arith.constant 0 : index
      %c0_180 = arith.constant 0 : index
      %656 = vector.load %arg12[%c0_179, %c0_180] : memref<1x5xf32, #tpu.memory_space<vmem>>, vector<1x5xf32>
      %657 = vector.broadcast %656 : vector<1x5xf32> to vector<8x5xf32>
      %658 = arith.addf %655, %657 : vector<8x5xf32>
      %c0_181 = arith.constant 0 : index
      %c0_182 = arith.constant 0 : index
      %659 = vector.load %arg13[%c0_181, %c0_182] : memref<8x5xf32, #tpu.memory_space<vmem>>, vector<8x5xf32>
      tpu.vector_store %arg13[%c0_181, %c0_182], %658 {strides = array<i32>} : memref<8x5xf32, #tpu.memory_space<vmem>>, vector<8x5xf32>,
    } else {
    }
    return
  }
  func.func @transform_0(%arg0: i32) -> (i32, i32, i32) {
    %c0_i32 = arith.constant 0 : i32
    %c0_i32_0 = arith.constant 0 : i32
    %c0_i32_1 = arith.constant 0 : i32
    return %arg0, %c0_i32, %c0_i32_0 : i32, i32, i32
  }
  func.func @transform_1(%arg0: i32) -> (i32, i32) {
    %c0_i32 = arith.constant 0 : i32
    %c0_i32_0 = arith.constant 0 : i32
    %c0_i32_1 = arith.constant 0 : i32
    return %c0_i32, %c0_i32_0 : i32, i32
  }
  func.func @transform_2(%arg0: i32) -> (i32, i32) {
    %c0_i32 = arith.constant 0 : i32
    %c0_i32_0 = arith.constant 0 : i32
    %c0_i32_1 = arith.constant 0 : i32
    return %c0_i32, %c0_i32_0 : i32, i32
  }
  func.func @transform_3(%arg0: i32) -> (i32, i32) {
    %c0_i32 = arith.constant 0 : i32
    %c0_i32_0 = arith.constant 0 : i32
    %c0_i32_1 = arith.constant 0 : i32
    return %c0_i32, %c0_i32_0 : i32, i32
  }
  func.func @transform_4(%arg0: i32) -> (i32, i32) {
    %c0_i32 = arith.constant 0 : i32
    %c0_i32_0 = arith.constant 0 : i32
    %c0_i32_1 = arith.constant 0 : i32
    return %c0_i32, %c0_i32_0 : i32, i32
  }
  func.func @transform_5(%arg0: i32) -> (i32, i32) {
    %c0_i32 = arith.constant 0 : i32
    %c0_i32_0 = arith.constant 0 : i32
    %c0_i32_1 = arith.constant 0 : i32
    return %c0_i32, %c0_i32_0 : i32, i32
  }
  func.func @transform_6(%arg0: i32) -> (i32, i32) {
    %c0_i32 = arith.constant 0 : i32
    %c0_i32_0 = arith.constant 0 : i32
    %c0_i32_1 = arith.constant 0 : i32
    return %c0_i32, %c0_i32_0 : i32, i32
  }
  func.func @transform_7(%arg0: i32) -> (i32, i32) {
    %c0_i32 = arith.constant 0 : i32
    %c0_i32_0 = arith.constant 0 : i32
    %c0_i32_1 = arith.constant 0 : i32
    return %c0_i32, %c0_i32_0 : i32, i32
  }
  func.func @transform_8(%arg0: i32) -> (i32, i32) {
    %c0_i32 = arith.constant 0 : i32
    %c0_i32_0 = arith.constant 0 : i32
    %c0_i32_1 = arith.constant 0 : i32
    return %c0_i32, %c0_i32_0 : i32, i32
  }
  func.func @transform_9(%arg0: i32) -> (i32, i32) {
    %c0_i32 = arith.constant 0 : i32
    %c0_i32_0 = arith.constant 0 : i32
    %c0_i32_1 = arith.constant 0 : i32
    return %c0_i32, %c0_i32_0 : i32, i32
  }
  func.func @transform_10(%arg0: i32) -> (i32, i32) {
    %c0_i32 = arith.constant 0 : i32
    %c0_i32_0 = arith.constant 0 : i32
    %c0_i32_1 = arith.constant 0 : i32
    return %c0_i32, %c0_i32_0 : i32, i32
  }
  func.func @transform_11(%arg0: i32) -> (i32, i32) {
    %c0_i32 = arith.constant 0 : i32
    %c0_i32_0 = arith.constant 0 : i32
    %c0_i32_1 = arith.constant 0 : i32
    return %c0_i32, %c0_i32_0 : i32, i32
  }
  func.func @transform_12(%arg0: i32) -> (i32, i32) {
    %c0_i32 = arith.constant 0 : i32
    %c0_i32_0 = arith.constant 0 : i32
    %c0_i32_1 = arith.constant 0 : i32
    return %c0_i32, %c0_i32_0 : i32, i32
  }
}

</mosaic_0001>

<bundles_post_ra>
// kernel: tpu_custom_call.1
= control target key start
LH: loop header
LB: loop body
LE: loop exit
PB: predicated region body
PF: predicated region fallthrough
CT: control target
= control target key end

     0   :  { %17 = vsyncpa [#allocation11], 0  ;;  %s9859_s0 = inlined_call_operand.hbm [shape: f32[8,8,32], index: 0, kind: input, shape index: {}]   ;;  %s9860_s1 = inlined_call_operand.hbm [shape: f32[32,512], index: 1, kind: input, shape index: {}]   ;;  %s9861_s2 = inlined_call_operand.vmem [shape: f32[1,512], index: 2, kind: input, shape index: {}]   ;;  %s9862_s3 = inlined_call_operand.vmem [shape: f32[128,512], index: 3, kind: input, shape index: {}]   ;;  %s9863_s4 = inlined_call_operand.hbm [shape: f32[128,512], index: 4, kind: input, shape index: {}]   ;;  %s9864_s5 = inlined_call_operand.hbm [shape: f32[128,512], index: 5, kind: input, shape index: {}]   ;;  %s9865_s6 = inlined_call_operand.vmem [shape: f32[1,512], index: 6, kind: input, shape index: {}]   ;;  %s9866_s7 = inlined_call_operand.vmem [shape: f32[128,5], index: 7, kind: input, shape index: {}]   ;;  %s9867_s8 = inlined_call_operand.vmem [shape: f32[128,5], index: 8, kind: input, shape index: {}]   ;;  %s9868_s9 = inlined_call_operand.vmem [shape: f32[128,5], index: 9, kind: input, shape index: {}]   ;;  %s9869_s10 = inlined_call_operand.vmem [shape: f32[128,5], index: 10, kind: input, shape index: {}]   ;;  %s9870_s11 = inlined_call_operand.vmem [shape: f32[1,5], index: 11, kind: input, shape index: {}]   ;;  %s9871_s12 = inlined_call_operand.hbm [shape: f32[8,5], index: 12, kind: output, shape index: {}]  }
   0x1   :  { %18 = vsyncpa [#allocation14], 0 }
   0x2   :  { %19 = vsyncpa [#allocation17], 0 }
   0x3   :  { %20 = vsyncpa [#allocation12], 0  ;;  %s7914_s21 = smov [#allocation13]   ;;  %s7796_s25 = scalar_lea.hbm %s9860_s1, 2048 }
   0x4   :  { %s38_s22 = sshll.u32 %s7914_s21, 4  ;;  %p7797_p0 = scmp.ne.s32.totalorder %s9860_s1, %s7796_s25  ;;  %s39_s22 = int_to_ptr.vmem [resolvable:$true] %s38_s22 }
   0x5   :  { %p7800_p1 = scmp.lt.u32.totalorder %s7796_s25, %s9860_s1 }
   0x7   :  { %p7802_p2 = pnand %p7800_p1, %p7797_p0 }
   0x9   :  { %7805 = shalt.err (!%p7802_p2)
}
   0xa   :  { %s7806_s30 = scalar_lea.vmem %s39_s22, 2048  ;;  %p7811_p4 = scmp.lt.s32.totalorder %s39_s22, %s39_s22 }
   0xb   :  { %p7807_p3 = scmp.ne.s32.totalorder %s39_s22, %s7806_s30  ;;  %p7812_p5 = scmp.lt.s32.totalorder %s7806_s30, %s7806_s30 }
   0xd   :  { %p7813_p6 = por %p7812_p5, %p7811_p4 }
   0xf   :  { %p7814_p7 = pnand %p7813_p6, %p7807_p3 }
  0x11   :  { %7817 = shalt.err (!%p7814_p7)
}
  0x12   :  { %s7915_s13 = smov 512   ;;  %s7916_s14 = smov 32  }
  0x13   :  { %44 = dma.hbm_to_vmem [thread:$0]  %s9860_s1, 2048, %s39_s22, [#allocation14], %s7915_s13, %s7915_s13, %s7916_s14  }
  0x14   :  { %s7917_s17 = smov [#allocation10]   ;;  %s7818_s21 = scalar_lea.hbm %s9859_s0, 1024 }
  0x15   :  { %s26_s18 = sshll.u32 %s7917_s17, 4  ;;  %p7819_p8 = scmp.ne.s32.totalorder %s9859_s0, %s7818_s21  ;;  %s27_s18 = int_to_ptr.vmem [resolvable:$true] %s26_s18 }
  0x16   :  { %p7822_p9 = scmp.lt.u32.totalorder %s7818_s21, %s9859_s0 }
  0x18   :  { %p7824_p10 = pnand %p7822_p9, %p7819_p8 }
  0x1a   :  { %7827 = shalt.err (!%p7824_p10)
}
  0x1b   :  { %s7828_s27 = scalar_lea.vmem %s27_s18, 1024  ;;  %p7833_p12 = scmp.lt.s32.totalorder %s27_s18, %s27_s18 }
  0x1c   :  { %p7829_p11 = scmp.ne.s32.totalorder %s27_s18, %s7828_s27  ;;  %p7834_p13 = scmp.lt.s32.totalorder %s7828_s27, %s7828_s27 }
  0x1e   :  { %p7835_p0 = por %p7834_p13, %p7833_p12 }
  0x20   :  { %p7836_p1 = pnand %p7835_p0, %p7829_p11 }
  0x22   :  { %7839 = shalt.err (!%p7836_p1)
}
  0x23   :  { %s7918_s1 = smov 128   ;;  %s7919_s22 = smov 8  }
  0x24   :  { %32 = dma.hbm_to_vmem [thread:$0]  %s9859_s0, 1024, %s27_s18, [#allocation11], %s7918_s1, %s7918_s1, %s7919_s22  }
  0x25   :  { %s7920_s30 = smov [#allocation15]   ;;  %s7921_s16 = smov [#allocation16]  }
  0x26   :  { %s54_s15 = sshll.u32 %s7920_s30, 4  ;;  %s66_s17 = sshll.u32 %s7921_s16, 4  ;;  %s55_s15 = int_to_ptr.vmem [resolvable:$true] %s54_s15  ;;  %s8018_s17 = int_to_ptr.vmem [resolvable:$true] %s66_s17 }
  0x27   :  { %s7840_s21 = scalar_lea.hbm %s9863_s4, 8192 }
  0x28   :  { %p7841_p2 = scmp.ne.s32.totalorder %s9863_s4, %s7840_s21  ;;  %p7844_p3 = scmp.lt.u32.totalorder %s7840_s21, %s9863_s4 }
  0x2a   :  { %p7846_p4 = pnand %p7844_p3, %p7841_p2 }
  0x2c   :  { %7849 = shalt.err (!%p7846_p4)
}
  0x2d   :  { %s7850_s0 = scalar_lea.vmem %s55_s15, 8192  ;;  %p7855_p6 = scmp.lt.s32.totalorder %s55_s15, %s55_s15 }
  0x2e   :  { %p7851_p5 = scmp.ne.s32.totalorder %s55_s15, %s7850_s0  ;;  %p7856_p7 = scmp.lt.s32.totalorder %s7850_s0, %s7850_s0 }
  0x30   :  { %p7857_p8 = por %p7856_p7, %p7855_p6 }
  0x32   :  { %p7858_p9 = pnand %p7857_p8, %p7851_p5 }
  0x34   :  { %7861 = shalt.err (!%p7858_p9)
}
  0x35   :  { %60 = dma.hbm_to_vmem [thread:$0]  %s9863_s4, 8192, %s55_s15, [#allocation14], %s7915_s13, %s7915_s13, %s7916_s14  }
  0x36   :  { %s7862_s28 = scalar_lea.hbm %s9864_s5, 8192 }
  0x37   :  { %p7863_p10 = scmp.ne.s32.totalorder %s9864_s5, %s7862_s28  ;;  %p7866_p11 = scmp.lt.u32.totalorder %s7862_s28, %s9864_s5 }
  0x39   :  { %p7868_p12 = pnand %p7866_p11, %p7863_p10 }
  0x3b   :  { %7871 = shalt.err (!%p7868_p12)
}
  0x3c   :  { %s7872_s20 = scalar_lea.vmem %s8018_s17, 8192  ;;  %p7877_p0 = scmp.lt.s32.totalorder %s8018_s17, %s8018_s17 }
  0x3d   :  { %p7873_p13 = scmp.ne.s32.totalorder %s8018_s17, %s7872_s20  ;;  %p7878_p1 = scmp.lt.s32.totalorder %s7872_s20, %s7872_s20 }
  0x3f   :  { %p7879_p2 = por %p7878_p1, %p7877_p0 }
  0x41   :  { %p7880_p3 = pnand %p7879_p2, %p7873_p13 }
  0x43   :  { %7883 = shalt.err (!%p7880_p3)
}
  0x44   :  { %72 = dma.hbm_to_vmem [thread:$0]  %s9864_s5, 8192, %s8018_s17, [#allocation17], %s7915_s13, %s7915_s13, %s7916_s14  }
  0x45   :  { %7906 = dma.done.wait [#allocation11], 1024  }
  0x46   :  { %7907 = vsyncadd [#allocation11], 4294966272 }
  0x47   :  { %7908 = dma.done.wait [#allocation14], 10240  }
  0x48   :  { %7909 = vsyncadd [#allocation14], 4294957056 }
  0x49   :  { %7910 = dma.done.wait [#allocation17], 8192  }
  0x4a   :  { %7911 = vsyncadd [#allocation17], 4294959104  ;;  %v9872_v0 = vmov 0.0   ;;  %v117_v1 = vld [vmem:[#allocation13 + $0x8] sm:$0xff]  ;;  %v119_v3 = vld [vmem:[#allocation13 + $0x18] sm:$0xff]  ;;  %vm154_vm0 = vcmask 261120  }
  0x4b   :  { %243 = vmatprep.mubr.f32.mxu0 %v9872_v0  ;;  %356 = vmatprep.mubr.f32.mxu1 %v9872_v0  ;;  %v121_v2 = vld [vmem:[#allocation13 + $0x28] sm:$0xff]  ;;  %v123_v5 = vld [vmem:[#allocation13 + $0x38] sm:$0xff]  ;;  %v116_v6 = vld [vmem:[#allocation13] sm:$0xff]  ;;  %vm7924_vm1 = vmmov 0   ;;  %s7925_s19 = smov [#allocation18]   ;;  %vm5361_vm2 = vcmask 39936  }
  0x4c   :  { %v5656_v4 = vpack.c.bf16 %v121_v2, %v117_v1  ;;  %v120_v7 = vld [vmem:[#allocation13 + $0x20] sm:$0xff]  ;;  %v5664_v8 = vpack.c.bf16 %v123_v5, %v119_v3  ;;  %v118_v10 = vld [vmem:[#allocation13 + $0x10] sm:$0xff]  ;;  %v125_v12 = vld [vmem:[#allocation13 + $0x48] sm:$0xff] }
  0x4d   :  { %v5658_v9 = vpack.c.bf16 %v120_v7, %v116_v6  ;;  %v122_v11 = vld [vmem:[#allocation13 + $0x30] sm:$0xff]  ;;  %v129_v14 = vld [vmem:[#allocation13 + $0x68] sm:$0xff]  ;;  %v127_v15 = vld [vmem:[#allocation13 + $0x58] sm:$0xff] }
  0x4e   :  { %5657 = vmatprep.subr.bf16.mxu0 %v5656_v4  ;;  %v5666_v13 = vpack.c.bf16 %v122_v11, %v118_v10  ;;  %v131_v16 = vld [vmem:[#allocation13 + $0x78] sm:$0xff]  ;;  %5665 = vmatprep.subr.bf16.mxu1 %v5664_v8  ;;  %v5660_v17 = vpack.c.bf16 %v129_v14, %v125_v12  ;;  %v124_v19 = vld [vmem:[#allocation13 + $0x40] sm:$0xff]  ;;  %v126_v21 = vld [vmem:[#allocation13 + $0x50] sm:$0xff] }
  0x4f   :  { %5659 = vmatpush1.bf16.msra.mxu0 %v5658_v9  ;;  %v5668_v18 = vpack.c.bf16 %v131_v16, %v127_v15  ;;  %v128_v20 = vld [vmem:[#allocation13 + $0x60] sm:$0xff]  ;;  %v130_v23 = vld [vmem:[#allocation13 + $0x70] sm:$0xff]  ;;  %v566_v24 = vld [vmem:[#allocation16 + $0x8] sm:$0xff] }
  0x50   :  { %5667 = vmatpush1.bf16.msra.mxu1 %v5666_v13  ;;  %v5662_v22 = vpack.c.bf16 %v128_v20, %v124_v19  ;;  %5661 = vmatprep.subr.bf16.mxu0 %v5660_v17  ;;  %v5670_v25 = vpack.c.bf16 %v130_v23, %v126_v21  ;;  %v570_v26 = vld [vmem:[#allocation16 + $0x28] sm:$0xff]  ;;  %v568_v27 = vld [vmem:[#allocation16 + $0x18] sm:$0xff]  ;;  %v565_v31 = vld [vmem:[#allocation16] sm:$0xff] }
  0x51   :  { %5669 = vmatprep.subr.bf16.mxu1 %v5668_v18  ;;  %v572_v28 = vld [vmem:[#allocation16 + $0x38] sm:$0xff]  ;;  %v8057_v29 = vpack.c.bf16 %v570_v26, %v566_v24  ;;  %v569_v32 = vld [vmem:[#allocation16 + $0x20] sm:$0xff]  ;;  %v567_v33 = vld [vmem:[#allocation16 + $0x10] sm:$0xff] }
  0x52   :  { %v8059_v30 = vpack.c.bf16 %v572_v28, %v568_v27  ;;  %v108_v34 = vld [vmem:[#allocation10] sm:$0xff]  ;;  %v8061_v35 = vpack.c.bf16 %v569_v32, %v565_v31  ;;  %v571_v36 = vld [vmem:[#allocation16 + $0x30] sm:$0xff]  ;;  %v574_v37 = vld [vmem:[#allocation16 + $0x48] sm:$0xff] }
  0x53   :  { %10102 = vst [vmem:[#allocation23_spill] sm:$0xff] %v8057_v29  ;;  %5663 = vmatpush1.bf16.msra.mxu0 %v5662_v22  ;;  %v8064_v38 = vpack.c.bf16 %v571_v36, %v567_v33  ;;  %v578_v39 = vld [vmem:[#allocation16 + $0x68] sm:$0xff]  ;;  %v576_v40 = vld [vmem:[#allocation16 + $0x58] sm:$0xff]  ;;  %v573_v43 = vld [vmem:[#allocation16 + $0x40] sm:$0xff] }
  0x54   :  { %10103 = vst [vmem:[#allocation24_spill] sm:$0xff] %v8059_v30  ;;  %10104 = vst [vmem:[#allocation25_spill] sm:$0xff] %v8061_v35  ;;  %5671 = vmatpush1.bf16.msra.mxu1 %v5670_v25  ;;  %5673 = vmatprep.subr.bf16.mxu0 %v8057_v29  ;;  %v580_v41 = vld [vmem:[#allocation16 + $0x78] sm:$0xff]  ;;  %v8067_v42 = vpack.c.bf16 %v578_v39, %v574_v37  ;;  %v577_v44 = vld [vmem:[#allocation16 + $0x60] sm:$0xff] }
  0x55   :  { %10105 = vst [vmem:[#allocation26_spill] sm:$0xff] %v8064_v38  ;;  %5705 = vmatprep.subr.bf16.mxu1 %v8059_v30  ;;  %v575_v45 = vld [vmem:[#allocation16 + $0x50] sm:$0xff]  ;;  %v109_v46 = vld [vmem:[#allocation10 + $0x8] sm:$0xff]  ;;  %v8070_v47 = vpack.c.bf16 %v580_v41, %v576_v40  ;;  %v8074_v50 = vpack.c.bf16 %v577_v44, %v573_v43  ;;  %v584_v52 = vld [vmem:[#allocation16 + $0x98] sm:$0xff] }
  0x56   :  { %10106 = vst [vmem:[#allocation27_spill] sm:$0xff] %v8067_v42  ;;  %5380 = vmatmul.mubr.msk.f32.vlgmr.msra.gmra.mrb[0].mxu0 %vm154_vm0, %v108_v34  ;;  %v579_v48 = vld [vmem:[#allocation16 + $0x70] sm:$0xff]  ;;  %v582_v49 = vld [vmem:[#allocation16 + $0x88] sm:$0xff]  ;;  %v588_v53 = vld [vmem:[#allocation16 + $0xb8] sm:$0xff] }
  0x57   :  { %10107 = vst [vmem:[#allocation28_spill] sm:$0xff] %v8070_v47  ;;  %5388 = vmatmul.mubr.msk.f32.vlgmr.msra.gmra.mrb[0].mxu1 %vm154_vm0, %v108_v34  ;;  %5675 = vmatpush1.bf16.msra.mxu0 %v8061_v35  ;;  %10108 = vst [vmem:[#allocation29_spill] sm:$0xff] %v8074_v50  ;;  %v586_v51 = vld [vmem:[#allocation16 + $0xa8] sm:$0xff]  ;;  %v8078_v54 = vpack.c.bf16 %v579_v48, %v575_v45  ;;  %v581_v55 = vld [vmem:[#allocation16 + $0x80] sm:$0xff]  ;;  %v8086_v60 = vpack.c.bf16 %v588_v53, %v584_v52 }
  0x58   :  { %5707 = vmatpush1.bf16.msra.mxu1 %v8064_v38  ;;  %249 = vmatprep.mubr.f32.mxu0 %v9872_v0  ;;  %v585_v56 = vld [vmem:[#allocation16 + $0xa0] sm:$0xff]  ;;  %v8082_v57 = vpack.c.bf16 %v586_v51, %v582_v49  ;;  %v583_v58 = vld [vmem:[#allocation16 + $0x90] sm:$0xff]  ;;  %v590_v61 = vld [vmem:[#allocation16 + $0xc8] sm:$0xff] }
  0x59   :  { %10109 = vst [vmem:[#allocation30_spill] sm:$0xff] %v8078_v54  ;;  %362 = vmatprep.mubr.f32.mxu1 %v9872_v0  ;;  %5677 = vmatprep.subr.bf16.mxu0 %v8067_v42  ;;  %v587_v59 = vld [vmem:[#allocation16 + $0xb0] sm:$0xff]  ;;  %10111 = vst [vmem:[#allocation32_spill] sm:$0xff] %v8086_v60  ;;  %v594_v62 = vld [vmem:[#allocation16 + $0xe8] sm:$0xff]  ;;  %v8090_v1 = vpack.c.bf16 %v585_v56, %v581_v55 }
  0x5a   :  { %10110 = vst [vmem:[#allocation31_spill] sm:$0xff] %v8082_v57  ;;  %5381 = vmatmul.mubr.msk.f32.gmra.mrb[2].mxu0 %vm154_vm0, %v109_v46  ;;  %5709 = vmatprep.subr.bf16.mxu1 %v8070_v47  ;;  %v110_v63 = vld [vmem:[#allocation10 + $0x10] sm:$0xff]  ;;  %v592_v2 = vld [vmem:[#allocation16 + $0xd8] sm:$0xff]  ;;  %v8094_v4 = vpack.c.bf16 %v587_v59, %v583_v58  ;;  %v589_v5 = vld [vmem:[#allocation16 + $0xc0] sm:$0xff]  ;;  %v8098_v7 = vpack.c.bf16 %v594_v62, %v590_v61 }
  0x5b   :  { %5389 = vmatmul.mubr.msk.f32.gmra.mrb[2].mxu1 %vm154_vm0, %v109_v46  ;;  %5679 = vmatpush1.bf16.msra.mxu0 %v8074_v50  ;;  %10112 = vst [vmem:[#allocation33_spill] sm:$0xff] %v8090_v1  ;;  %v596_v3 = vld [vmem:[#allocation16 + $0xf8] sm:$0xff]  ;;  %v593_v6 = vld [vmem:[#allocation16 + $0xe0] sm:$0xff]  ;;  %v591_v8 = vld [vmem:[#allocation16 + $0xd0] sm:$0xff] }
  0x5c   :  { %5711 = vmatpush1.bf16.msra.mxu1 %v8078_v54  ;;  %255 = vmatprep.mubr.f32.mxu0 %v9872_v0  ;;  %10113 = vst [vmem:[#allocation34_spill] sm:$0xff] %v8094_v4  ;;  %10114 = vst [vmem:[#allocation35_spill] sm:$0xff] %v8098_v7  ;;  %v595_v9 = vld [vmem:[#allocation16 + $0xf0] sm:$0xff]  ;;  %v8102_v10 = vpack.c.bf16 %v596_v3, %v592_v2  ;;  %v598_v11 = vld [vmem:[#allocation16 + $0x108] sm:$0xff]  ;;  %v8106_v14 = vpack.c.bf16 %v593_v6, %v589_v5 }
  0x5d   :  { %368 = vmatprep.mubr.f32.mxu1 %v9872_v0  ;;  %5681 = vmatprep.subr.bf16.mxu0 %v8082_v57  ;;  %v602_v12 = vld [vmem:[#allocation16 + $0x128] sm:$0xff]  ;;  %v111_v13 = vld [vmem:[#allocation10 + $0x18] sm:$0xff]  ;;  %v8110_v17 = vpack.c.bf16 %v595_v9, %v591_v8  ;;  %v597_v18 = vld [vmem:[#allocation16 + $0x100] sm:$0xff] }
  0x5e   :  { %5382 = vmatmul.mubr.msk.f32.gmra.mrb[4].mxu0 %vm154_vm0, %v110_v63  ;;  %5713 = vmatprep.subr.bf16.mxu1 %v8086_v60  ;;  %10115 = vst [vmem:[#allocation36_spill] sm:$0xff] %v8102_v10  ;;  %10116 = vst [vmem:[#allocation37_spill] sm:$0xff] %v8106_v14  ;;  %v600_v15 = vld [vmem:[#allocation16 + $0x118] sm:$0xff]  ;;  %v601_v19 = vld [vmem:[#allocation16 + $0x120] sm:$0xff]  ;;  %v8114_v20 = vpack.c.bf16 %v602_v12, %v598_v11 }
  0x5f   :  { %5390 = vmatmul.mubr.msk.f32.gmra.mrb[4].mxu1 %vm154_vm0, %v110_v63  ;;  %5683 = vmatpush1.bf16.msra.mxu0 %v8090_v1  ;;  %v604_v16 = vld [vmem:[#allocation16 + $0x138] sm:$0xff]  ;;  %10117 = vst [vmem:[#allocation38_spill] sm:$0xff] %v8110_v17  ;;  %v599_v21 = vld [vmem:[#allocation16 + $0x110] sm:$0xff]  ;;  %v606_v24 = vld [vmem:[#allocation16 + $0x148] sm:$0xff]  ;;  %v8122_v27 = vpack.c.bf16 %v601_v19, %v597_v18 }
  0x60   :  { %5715 = vmatpush1.bf16.msra.mxu1 %v8094_v4  ;;  %261 = vmatprep.mubr.f32.mxu0 %v9872_v0  ;;  %10118 = vst [vmem:[#allocation39_spill] sm:$0xff] %v8114_v20  ;;  %v603_v22 = vld [vmem:[#allocation16 + $0x130] sm:$0xff]  ;;  %v8118_v23 = vpack.c.bf16 %v604_v16, %v600_v15  ;;  %v610_v25 = vld [vmem:[#allocation16 + $0x168] sm:$0xff]  ;;  %v112_v26 = vld [vmem:[#allocation10 + $0x20] sm:$0xff] }
  0x61   :  { %374 = vmatprep.mubr.f32.mxu1 %v9872_v0  ;;  %5685 = vmatprep.subr.bf16.mxu0 %v8098_v7  ;;  %10120 = vst [vmem:[#allocation41_spill] sm:$0xff] %v8122_v27  ;;  %v608_v28 = vld [vmem:[#allocation16 + $0x158] sm:$0xff]  ;;  %v8126_v32 = vpack.c.bf16 %v603_v22, %v599_v21  ;;  %v605_v33 = vld [vmem:[#allocation16 + $0x140] sm:$0xff]  ;;  %v8130_v36 = vpack.c.bf16 %v610_v25, %v606_v24  ;;  %v607_v37 = vld [vmem:[#allocation16 + $0x150] sm:$0xff] }
  0x62   :  { %5383 = vmatmul.mubr.msk.f32.gmra.mrb[6].mxu0 %vm154_vm0, %v111_v13  ;;  %5717 = vmatprep.subr.bf16.mxu1 %v8102_v10  ;;  %10119 = vst [vmem:[#allocation40_spill] sm:$0xff] %v8118_v23  ;;  %v612_v31 = vld [vmem:[#allocation16 + $0x178] sm:$0xff]  ;;  %v609_v34 = vld [vmem:[#allocation16 + $0x160] sm:$0xff]  ;;  %v611_v39 = vld [vmem:[#allocation16 + $0x170] sm:$0xff] }
  0x63   :  { %5391 = vmatmul.mubr.msk.f32.gmra.mrb[6].mxu1 %vm154_vm0, %v111_v13  ;;  %5687 = vmatpush1.bf16.msra.mxu0 %v8106_v14  ;;  %10121 = vst [vmem:[#allocation42_spill] sm:$0xff] %v8126_v32  ;;  %10122 = vst [vmem:[#allocation43_spill] sm:$0xff] %v8130_v36  ;;  %v8134_v40 = vpack.c.bf16 %v612_v31, %v608_v28  ;;  %v614_v41 = vld [vmem:[#allocation16 + $0x188] sm:$0xff]  ;;  %v8138_v45 = vpack.c.bf16 %v609_v34, %v605_v33  ;;  %v616_v46 = vld [vmem:[#allocation16 + $0x198] sm:$0xff] }
  0x64   :  { %5719 = vmatpush1.bf16.msra.mxu1 %v8110_v17  ;;  %267 = vmatprep.mubr.f32.mxu0 %v9872_v0  ;;  %v618_v43 = vld [vmem:[#allocation16 + $0x1a8] sm:$0xff]  ;;  %v620_v48 = vld [vmem:[#allocation16 + $0x1b8] sm:$0xff]  ;;  %v8142_v49 = vpack.c.bf16 %v611_v39, %v607_v37  ;;  %v613_v51 = vld [vmem:[#allocation16 + $0x180] sm:$0xff] }
  0x65   :  { %380 = vmatprep.mubr.f32.mxu1 %v9872_v0  ;;  %5689 = vmatprep.subr.bf16.mxu0 %v8114_v20  ;;  %10123 = vst [vmem:[#allocation44_spill] sm:$0xff] %v8134_v40  ;;  %v113_v44 = vld [vmem:[#allocation10 + $0x28] sm:$0xff]  ;;  %10124 = vst [vmem:[#allocation45_spill] sm:$0xff] %v8138_v45  ;;  %v617_v52 = vld [vmem:[#allocation16 + $0x1a0] sm:$0xff]  ;;  %v8146_v53 = vpack.c.bf16 %v618_v43, %v614_v41  ;;  %v8150_v58 = vpack.c.bf16 %v620_v48, %v616_v46 }
  0x66   :  { %5384 = vmatmul.mubr.msk.f32.gmra.mrb[8].mxu0 %vm154_vm0, %v112_v26  ;;  %5721 = vmatprep.subr.bf16.mxu1 %v8118_v23  ;;  %10125 = vst [vmem:[#allocation46_spill] sm:$0xff] %v8142_v49  ;;  %v615_v55 = vld [vmem:[#allocation16 + $0x190] sm:$0xff]  ;;  %v622_v59 = vld [vmem:[#allocation16 + $0x1c8] sm:$0xff]  ;;  %v8154_v63 = vpack.c.bf16 %v617_v52, %v613_v51  ;;  %v624_v2 = vld [vmem:[#allocation16 + $0x1d8] sm:$0xff] }
  0x67   :  { %5392 = vmatmul.mubr.msk.f32.gmra.mrb[8].mxu1 %vm154_vm0, %v112_v26  ;;  %5691 = vmatpush1.bf16.msra.mxu0 %v8122_v27  ;;  %10126 = vst [vmem:[#allocation47_spill] sm:$0xff] %v8146_v53  ;;  %v619_v56 = vld [vmem:[#allocation16 + $0x1b0] sm:$0xff]  ;;  %10127 = vst [vmem:[#allocation48_spill] sm:$0xff] %v8150_v58  ;;  %v626_v61 = vld [vmem:[#allocation16 + $0x1e8] sm:$0xff] }
  0x68   :  { %5723 = vmatpush1.bf16.msra.mxu1 %v8126_v32  ;;  %273 = vmatprep.mubr.f32.mxu0 %v9872_v0  ;;  %v114_v62 = vld [vmem:[#allocation10 + $0x30] sm:$0xff]  ;;  %10128 = vst [vmem:[#allocation49_spill] sm:$0xff] %v8154_v63  ;;  %v628_v3 = vld [vmem:[#allocation16 + $0x1f8] sm:$0xff]  ;;  %v8158_v5 = vpack.c.bf16 %v619_v56, %v615_v55  ;;  %v621_v6 = vld [vmem:[#allocation16 + $0x1c0] sm:$0xff]  ;;  %v8162_v9 = vpack.c.bf16 %v626_v61, %v622_v59 }
  0x69   :  { %386 = vmatprep.mubr.f32.mxu1 %v9872_v0  ;;  %5693 = vmatprep.subr.bf16.mxu0 %v8130_v36  ;;  %v625_v8 = vld [vmem:[#allocation16 + $0x1e0] sm:$0xff]  ;;  %v623_v11 = vld [vmem:[#allocation16 + $0x1d0] sm:$0xff]  ;;  %v8166_v13 = vpack.c.bf16 %v628_v3, %v624_v2  ;;  %v502_v15 = vld [vmem:[#allocation15 + $0x8] sm:$0xff] }
  0x6a   :  { %5385 = vmatmul.mubr.msk.f32.gmra.mrb[10].mxu0 %vm154_vm0, %v113_v44  ;;  %5725 = vmatprep.subr.bf16.mxu1 %v8134_v40  ;;  %10129 = vst [vmem:[#allocation50_spill] sm:$0xff] %v8158_v5  ;;  %10130 = vst [vmem:[#allocation51_spill] sm:$0xff] %v8162_v9  ;;  %v627_v12 = vld [vmem:[#allocation16 + $0x1f0] sm:$0xff]  ;;  %v506_v16 = vld [vmem:[#allocation15 + $0x28] sm:$0xff]  ;;  %v8170_v19 = vpack.c.bf16 %v625_v8, %v621_v6 }
  0x6b   :  { %5393 = vmatmul.mubr.msk.f32.gmra.mrb[10].mxu1 %vm154_vm0, %v113_v44  ;;  %5695 = vmatpush1.bf16.msra.mxu0 %v8138_v45  ;;  %10131 = vst [vmem:[#allocation52_spill] sm:$0xff] %v8166_v13  ;;  %v115_v18 = vld [vmem:[#allocation10 + $0x38] sm:$0xff]  ;;  %v8174_v24 = vpack.c.bf16 %v627_v12, %v623_v11  ;;  %v501_v25 = vld [vmem:[#allocation15] sm:$0xff]  ;;  %v503_v28 = vld [vmem:[#allocation15 + $0x10] sm:$0xff]  ;;  %v8178_v31 = vpack.c.bf16 %v506_v16, %v502_v15 }
  0x6c   :  { %5727 = vmatpush1.bf16.msra.mxu1 %v8142_v49  ;;  %279 = vmatprep.mubr.f32.mxu0 %v9872_v0  ;;  %10132 = vst [vmem:[#allocation53_spill] sm:$0xff] %v8170_v19  ;;  %v504_v21 = vld [vmem:[#allocation15 + $0x18] sm:$0xff]  ;;  %v505_v26 = vld [vmem:[#allocation15 + $0x20] sm:$0xff]  ;;  %v507_v33 = vld [vmem:[#allocation15 + $0x30] sm:$0xff] }
  0x6d   :  { %392 = vmatprep.mubr.f32.mxu1 %v9872_v0  ;;  %5697 = vmatprep.subr.bf16.mxu0 %v8146_v53  ;;  %v508_v22 = vld [vmem:[#allocation15 + $0x38] sm:$0xff]  ;;  %10133 = vst [vmem:[#allocation54_spill] sm:$0xff] %v8174_v24  ;;  %10134 = vst [vmem:[#allocation55_spill] sm:$0xff] %v8178_v31  ;;  %v510_v34 = vld [vmem:[#allocation15 + $0x48] sm:$0xff]  ;;  %v8186_v44 = vpack.c.bf16 %v505_v26, %v501_v25  ;;  %v8190_v46 = vpack.c.bf16 %v507_v33, %v503_v28 }
  0x6e   :  { %5386 = vmatmul.mubr.msk.f32.gmra.mrb[12].mxu0 %vm154_vm0, %v114_v62  ;;  %5729 = vmatprep.subr.bf16.mxu1 %v8150_v58  ;;  %v514_v37 = vld [vmem:[#allocation15 + $0x68] sm:$0xff]  ;;  %v8182_v39 = vpack.c.bf16 %v508_v22, %v504_v21  ;;  %v512_v41 = vld [vmem:[#allocation15 + $0x58] sm:$0xff]  ;;  %v509_v51 = vld [vmem:[#allocation15 + $0x40] sm:$0xff] }
  0x6f   :  { %5394 = vmatmul.mubr.msk.f32.gmra.mrb[12].mxu1 %vm154_vm0, %v114_v62  ;;  %5699 = vmatpush1.bf16.msra.mxu0 %v8154_v63  ;;  %v516_v43 = vld [vmem:[#allocation15 + $0x78] sm:$0xff]  ;;  %10136 = vst [vmem:[#allocation57_spill] sm:$0xff] %v8186_v44  ;;  %10137 = vst [vmem:[#allocation58_spill] sm:$0xff] %v8190_v46  ;;  %v8192_v48 = vpack.c.bf16 %v514_v37, %v510_v34  ;;  %v513_v52 = vld [vmem:[#allocation15 + $0x60] sm:$0xff] }
  0x70   :  { %5731 = vmatpush1.bf16.msra.mxu1 %v8158_v5  ;;  %285 = vmatprep.mubr.f32.mxu0 %v9872_v0  ;;  %10135 = vst [vmem:[#allocation56_spill] sm:$0xff] %v8182_v39  ;;  %v511_v55 = vld [vmem:[#allocation15 + $0x50] sm:$0xff]  ;;  %v8196_v56 = vpack.c.bf16 %v516_v43, %v512_v41  ;;  %v518_v61 = vld [vmem:[#allocation15 + $0x88] sm:$0xff]  ;;  %v520_v2 = vld [vmem:[#allocation15 + $0x98] sm:$0xff]  ;;  %v8202_v6 = vpack.c.bf16 %v513_v52, %v509_v51 }
  0x71   :  { %398 = vmatprep.mubr.f32.mxu1 %v9872_v0  ;;  %5701 = vmatprep.subr.bf16.mxu0 %v8162_v9  ;;  %10138 = vst [vmem:[#allocation59_spill] sm:$0xff] %v8192_v48  ;;  %v515_v59 = vld [vmem:[#allocation15 + $0x70] sm:$0xff]  ;;  %v522_v62 = vld [vmem:[#allocation15 + $0xa8] sm:$0xff]  ;;  %v524_v3 = vld [vmem:[#allocation15 + $0xb8] sm:$0xff] }
  0x72   :  { %5387 = vmatmul.mubr.msk.f32.gmra.mrb[14].mxu0 %vm154_vm0, %v115_v18  ;;  %5733 = vmatprep.subr.bf16.mxu1 %v8166_v13  ;;  %10139 = vst [vmem:[#allocation60_spill] sm:$0xff] %v8196_v56  ;;  %10140 = vst [vmem:[#allocation61_spill] sm:$0xff] %v8202_v6  ;;  %v8206_v8 = vpack.c.bf16 %v515_v59, %v511_v55  ;;  %v8208_v11 = vpack.c.bf16 %v522_v62, %v518_v61  ;;  %v517_v12 = vld [vmem:[#allocation15 + $0x80] sm:$0xff]  ;;  %v519_v16 = vld [vmem:[#allocation15 + $0x90] sm:$0xff] }
  0x73   :  { %5395 = vmatmul.mubr.msk.f32.gmra.mrb[14].mxu1 %vm154_vm0, %v115_v18  ;;  %5703 = vmatpush1.bf16.msra.mxu0 %v8170_v19  ;;  %v521_v15 = vld [vmem:[#allocation15 + $0xa0] sm:$0xff]  ;;  %v8211_v18 = vpack.c.bf16 %v524_v3, %v520_v2  ;;  %v523_v21 = vld [vmem:[#allocation15 + $0xb0] sm:$0xff]  ;;  %v526_v22 = vld [vmem:[#allocation15 + $0xc8] sm:$0xff] }
  0x74   :  { %5735 = vmatpush1.bf16.msra.mxu1 %v8174_v24  ;;  %723 = vmatprep.mubr.f32.mxu0 %v9872_v0  ;;  %10141 = vst [vmem:[#allocation62_spill] sm:$0xff] %v8206_v8  ;;  %10142 = vst [vmem:[#allocation63_spill] sm:$0xff] %v8208_v11  ;;  %v530_v25 = vld [vmem:[#allocation15 + $0xe8] sm:$0xff]  ;;  %v528_v26 = vld [vmem:[#allocation15 + $0xd8] sm:$0xff]  ;;  %v8216_v33 = vpack.c.bf16 %v521_v15, %v517_v12  ;;  %v8220_v34 = vpack.c.bf16 %v523_v21, %v519_v16 }
  0x75   :  { %794 = vmatprep.mubr.f32.mxu1 %v9872_v0  ;;  %5737 = vmatprep.subr.bf16.mxu0 %v8178_v31  ;;  %10143 = vst [vmem:[#allocation64_spill] sm:$0xff] %v8211_v18  ;;  %v532_v28 = vld [vmem:[#allocation15 + $0xf8] sm:$0xff]  ;;  %v8222_v37 = vpack.c.bf16 %v530_v25, %v526_v22  ;;  %v525_v41 = vld [vmem:[#allocation15 + $0xc0] sm:$0xff]  ;;  %v527_v51 = vld [vmem:[#allocation15 + $0xd0] sm:$0xff] }
  0x76   :  { %724 = vmatmul.mubr.f32.vlgmr.msra.gmra.mrb[16].mxu0 %v9872_v0  ;;  %5769 = vmatprep.subr.bf16.mxu1 %v8182_v39  ;;  %10144 = vst [vmem:[#allocation65_spill] sm:$0xff] %v8216_v33  ;;  %10145 = vst [vmem:[#allocation66_spill] sm:$0xff] %v8220_v34  ;;  %v529_v43 = vld [vmem:[#allocation15 + $0xe0] sm:$0xff]  ;;  %v8225_v52 = vpack.c.bf16 %v532_v28, %v528_v26  ;;  %v531_v55 = vld [vmem:[#allocation15 + $0xf0] sm:$0xff] }
  0x77   :  { %795 = vmatmul.mubr.f32.vlgmr.msra.gmra.mrb[16].mxu1 %v9872_v0  ;;  %5739 = vmatpush1.bf16.msra.mxu0 %v8186_v44  ;;  %10146 = vst [vmem:[#allocation67_spill] sm:$0xff] %v8222_v37  ;;  %v534_v59 = vld [vmem:[#allocation15 + $0x108] sm:$0xff]  ;;  %v536_v62 = vld [vmem:[#allocation15 + $0x118] sm:$0xff]  ;;  %v8228_v3 = vpack.c.bf16 %v529_v43, %v525_v41  ;;  %v8232_v12 = vpack.c.bf16 %v531_v55, %v527_v51  ;;  %v533_v16 = vld [vmem:[#allocation15 + $0x100] sm:$0xff] }
  0x78   :  { %5771 = vmatpush1.bf16.msra.mxu1 %v8190_v46  ;;  %5741 = vmatprep.subr.bf16.mxu0 %v8192_v48  ;;  %10147 = vst [vmem:[#allocation68_spill] sm:$0xff] %v8225_v52  ;;  %v538_v61 = vld [vmem:[#allocation15 + $0x128] sm:$0xff]  ;;  %v540_v2 = vld [vmem:[#allocation15 + $0x138] sm:$0xff]  ;;  %v537_v21 = vld [vmem:[#allocation15 + $0x120] sm:$0xff] }
  0x79   :  { %5773 = vmatprep.subr.bf16.mxu1 %v8196_v56  ;;  %865 = vmatprep.mubr.f32.mxu0 %v9872_v0  ;;  %10148 = vst [vmem:[#allocation69_spill] sm:$0xff] %v8228_v3  ;;  %10149 = vst [vmem:[#allocation70_spill] sm:$0xff] %v8232_v12  ;;  %v8234_v15 = vpack.c.bf16 %v538_v61, %v534_v59  ;;  %v535_v22 = vld [vmem:[#allocation15 + $0x110] sm:$0xff]  ;;  %v8237_v25 = vpack.c.bf16 %v540_v2, %v536_v62  ;;  %v542_v28 = vld [vmem:[#allocation15 + $0x148] sm:$0xff] }
  0x7a   :  { %936 = vmatprep.mubr.f32.mxu1 %v9872_v0  ;;  %v539_v26 = vld [vmem:[#allocation15 + $0x130] sm:$0xff]  ;;  %v546_v0 = vld [vmem:[#allocation15 + $0x168] sm:$0xff]  ;;  %v544_v41 = vld [vmem:[#allocation15 + $0x158] sm:$0xff] }
  0x7b   :  { %5743 = vmatpush1.bf16.msra.mxu0 %v8202_v6  ;;  %10150 = vst [vmem:[#allocation71_spill] sm:$0xff] %v8234_v15  ;;  %10151 = vst [vmem:[#allocation72_spill] sm:$0xff] %v8237_v25  ;;  %v548_v43 = vld [vmem:[#allocation15 + $0x178] sm:$0xff]  ;;  %v8244_v51 = vpack.c.bf16 %v539_v26, %v535_v22  ;;  %v8246_v55 = vpack.c.bf16 %v546_v0, %v542_v28  ;;  %v541_v59 = vld [vmem:[#allocation15 + $0x140] sm:$0xff] }
  0x7c   :  { %5775 = vmatpush1.bf16.msra.mxu1 %v8206_v8  ;;  %5745 = vmatprep.subr.bf16.mxu0 %v8208_v11  ;;  %v545_v61 = vld [vmem:[#allocation15 + $0x160] sm:$0xff]  ;;  %v543_v62 = vld [vmem:[#allocation15 + $0x150] sm:$0xff]  ;;  %v8249_v2 = vpack.c.bf16 %v548_v43, %v544_v41 }
  0x7d   :  { %5777 = vmatprep.subr.bf16.mxu1 %v8211_v18  ;;  %10153 = vst [vmem:[#allocation74_spill] sm:$0xff] %v8244_v51  ;;  %10154 = vst [vmem:[#allocation75_spill] sm:$0xff] %v8246_v55  ;;  %v549_v26 = vld [vmem:[#allocation15 + $0x180] sm:$0xff]  ;;  %v551_v41 = vld [vmem:[#allocation15 + $0x190] sm:$0xff] }
  0x7e   :  { %10155 = vst [vmem:[#allocation76_spill] sm:$0xff] %v8249_v2  ;;  %v553_v28 = vld [vmem:[#allocation15 + $0x1a0] sm:$0xff] }
  0x7f   :  { %5747 = vmatpush1.bf16.msra.mxu0 %v8216_v33 }
  0x80   :  { %5779 = vmatpush1.bf16.msra.mxu1 %v8220_v34  ;;  %5749 = vmatprep.subr.bf16.mxu0 %v8222_v37  ;;  %v8240_v34 = vpack.c.bf16 %v537_v21, %v533_v16  ;;  %v550_v37 = vld [vmem:[#allocation15 + $0x188] sm:$0xff]  ;;  %v552_v16 = vld [vmem:[#allocation15 + $0x198] sm:$0xff] }
  0x81   :  { %5781 = vmatprep.subr.bf16.mxu1 %v8225_v52  ;;  %v547_v52 = vld [vmem:[#allocation15 + $0x170] sm:$0xff]  ;;  %v556_v21 = vld [vmem:[#allocation15 + $0x1b8] sm:$0xff] }
  0x82   :  { %10152 = vst [vmem:[#allocation73_spill] sm:$0xff] %v8240_v34  ;;  %v8256_v0 = vpack.c.bf16 %v547_v52, %v543_v62  ;;  %v8261_v43 = vpack.c.bf16 %v556_v21, %v552_v16  ;;  %v561_v62 = vld [vmem:[#allocation15 + $0x1e0] sm:$0xff]  ;;  %v559_v16 = vld [vmem:[#allocation15 + $0x1d0] sm:$0xff] }
  0x83   :  { %5751 = vmatpush1.bf16.msra.mxu0 %v8228_v3  ;;  %v554_v3 = vld [vmem:[#allocation15 + $0x1a8] sm:$0xff] }
  0x84   :  { %5783 = vmatpush1.bf16.msra.mxu1 %v8232_v12  ;;  %5753 = vmatprep.subr.bf16.mxu0 %v8234_v15  ;;  %v8252_v12 = vpack.c.bf16 %v545_v61, %v541_v59  ;;  %10157 = vst [vmem:[#allocation78_spill] sm:$0xff] %v8256_v0  ;;  %v8258_v22 = vpack.c.bf16 %v554_v3, %v550_v37  ;;  %10159 = vst [vmem:[#allocation80_spill] sm:$0xff] %v8261_v43  ;;  %v558_v15 = vld [vmem:[#allocation15 + $0x1c8] sm:$0xff]  ;;  %v560_v59 = vld [vmem:[#allocation15 + $0x1d8] sm:$0xff] }
  0x85   :  { %5785 = vmatprep.subr.bf16.mxu1 %v8237_v25  ;;  %v555_v25 = vld [vmem:[#allocation15 + $0x1b0] sm:$0xff]  ;;  %v564_v61 = vld [vmem:[#allocation15 + $0x1f8] sm:$0xff]  ;;  %v557_v3 = vld [vmem:[#allocation15 + $0x1c0] sm:$0xff] }
  0x86   :  { %10156 = vst [vmem:[#allocation77_spill] sm:$0xff] %v8252_v12  ;;  %10158 = vst [vmem:[#allocation79_spill] sm:$0xff] %v8258_v22  ;;  %v8268_v37 = vpack.c.bf16 %v555_v25, %v551_v41  ;;  %v8273_v21 = vpack.c.bf16 %v564_v61, %v560_v59  ;;  %v8288_v25 = vpack.c.bf16 %v561_v62, %v557_v3  ;;  %v437_v61 = vld [vmem:[%s9862_s3] sm:$0xff]  ;;  %v439_v3 = vld [vmem:[%s9862_s3 + $0x10] sm:$0xff] }
  0x87   :  { %5755 = vmatpush1.bf16.msra.mxu0 %v8240_v34  ;;  %v562_v34 = vld [vmem:[#allocation15 + $0x1e8] sm:$0xff] }
  0x88   :  { %5787 = vmatpush1.bf16.msra.mxu1 %v8244_v51  ;;  %5757 = vmatprep.subr.bf16.mxu0 %v8246_v55  ;;  %v8264_v51 = vpack.c.bf16 %v553_v28, %v549_v26  ;;  %10161 = vst [vmem:[#allocation82_spill] sm:$0xff] %v8268_v37  ;;  %v8270_v52 = vpack.c.bf16 %v562_v34, %v558_v15  ;;  %10163 = vst [vmem:[#allocation84_spill] sm:$0xff] %v8273_v21  ;;  %v438_v26 = vld [vmem:[%s9862_s3 + $0x8] sm:$0xff]  ;;  %v440_v34 = vld [vmem:[%s9862_s3 + $0x18] sm:$0xff] }
  0x89   :  { %5789 = vmatprep.subr.bf16.mxu1 %v8249_v2  ;;  %v563_v2 = vld [vmem:[#allocation15 + $0x1f0] sm:$0xff]  ;;  %v442_v28 = vld [vmem:[%s9862_s3 + $0x28] sm:$0xff]  ;;  %v444_v15 = vld [vmem:[%s9862_s3 + $0x38] sm:$0xff]  ;;  %10164 = vst [vmem:[#allocation85_spill] sm:$0xff] %v8288_v25 }
  0x8a   :  { %10160 = vst [vmem:[#allocation81_spill] sm:$0xff] %v8264_v51  ;;  %10162 = vst [vmem:[#allocation83_spill] sm:$0xff] %v8270_v52  ;;  %v8292_v41 = vpack.c.bf16 %v563_v2, %v559_v16  ;;  %v8294_v59 = vpack.c.bf16 %v442_v28, %v438_v26  ;;  %v8306_v62 = vpack.c.bf16 %v444_v15, %v440_v34  ;;  %v443_v2 = vld [vmem:[%s9862_s3 + $0x30] sm:$0xff]  ;;  %v446_v16 = vld [vmem:[%s9862_s3 + $0x48] sm:$0xff] }
  0x8b   :  { %5759 = vmatpush1.bf16.msra.mxu0 %v8252_v12  ;;  %v450_v26 = vld [vmem:[%s9862_s3 + $0x68] sm:$0xff]  ;;  %v448_v28 = vld [vmem:[%s9862_s3 + $0x58] sm:$0xff] }
  0x8c   :  { %5791 = vmatpush1.bf16.msra.mxu1 %v8256_v0  ;;  %5761 = vmatprep.subr.bf16.mxu0 %v8258_v22  ;;  %10165 = vst [vmem:[#allocation86_spill] sm:$0xff] %v8292_v41  ;;  %10166 = vst [vmem:[#allocation87_spill] sm:$0xff] %v8294_v59  ;;  %v452_v34 = vld [vmem:[%s9862_s3 + $0x78] sm:$0xff]  ;;  %v457_v22 = vld [vmem:[%s9862_s3 + $0xa0] sm:$0xff] }
  0x8d   :  { %5793 = vmatprep.subr.bf16.mxu1 %v8261_v43  ;;  %v441_v43 = vld [vmem:[%s9862_s3 + $0x20] sm:$0xff]  ;;  %10167 = vst [vmem:[#allocation88_spill] sm:$0xff] %v8306_v62 }
  0x8e   :  { %v8324_v15 = vpack.c.bf16 %v441_v43, %v437_v61  ;;  %v447_v43 = vld [vmem:[%s9862_s3 + $0x50] sm:$0xff]  ;;  %v8342_v61 = vpack.c.bf16 %v452_v34, %v448_v28  ;;  %v460_v28 = vld [vmem:[%s9862_s3 + $0xb8] sm:$0xff] }
  0x8f   :  { %5763 = vmatpush1.bf16.msra.mxu0 %v8264_v51  ;;  %v449_v51 = vld [vmem:[%s9862_s3 + $0x60] sm:$0xff] }
  0x90   :  { %5795 = vmatpush1.bf16.msra.mxu1 %v8268_v37  ;;  %5765 = vmatprep.subr.bf16.mxu0 %v8270_v52  ;;  %10168 = vst [vmem:[#allocation89_spill] sm:$0xff] %v8324_v15  ;;  %v8330_v52 = vpack.c.bf16 %v450_v26, %v446_v16  ;;  %v445_v37 = vld [vmem:[%s9862_s3 + $0x40] sm:$0xff]  ;;  %10171 = vst [vmem:[#allocation92_spill] sm:$0xff] %v8342_v61  ;;  %v458_v16 = vld [vmem:[%s9862_s3 + $0xa8] sm:$0xff]  ;;  %v10172_v26 = vmov 0.0  }
  0x91   :  { %5797 = vmatprep.subr.bf16.mxu1 %v8273_v21  ;;  %v8328_v21 = vpack.c.bf16 %v443_v2, %v439_v3  ;;  %v451_v3 = vld [vmem:[%s9862_s3 + $0x70] sm:$0xff]  ;;  %v454_v2 = vld [vmem:[%s9862_s3 + $0x88] sm:$0xff]  ;;  %v8362_v34 = vpack.c.bf16 %v449_v51, %v445_v37 }
  0x92   :  { %10170 = vst [vmem:[#allocation91_spill] sm:$0xff] %v8330_v52  ;;  %v455_v51 = vld [vmem:[%s9862_s3 + $0x90] sm:$0xff] }
  0x93   :  { %5767 = vmatpush1.bf16.msra.mxu0 %v8288_v25  ;;  %10169 = vst [vmem:[#allocation90_spill] sm:$0xff] %v8328_v21  ;;  %10173 = vst [vmem:[#allocation93_spill] sm:$0xff] %v8362_v34  ;;  %v453_v25 = vld [vmem:[%s9862_s3 + $0x80] sm:$0xff] }
  0x94   :  { %5799 = vmatpush1.bf16.msra.mxu1 %v8292_v41  ;;  %5801 = vmatprep.subr.bf16.mxu0 %v8294_v59  ;;  %v8366_v59 = vpack.c.bf16 %v451_v3, %v447_v43  ;;  %v8368_v41 = vpack.c.bf16 %v458_v16, %v454_v2  ;;  %v459_v43 = vld [vmem:[%s9862_s3 + $0xb0] sm:$0xff]  ;;  %v462_v3 = vld [vmem:[%s9862_s3 + $0xc8] sm:$0xff]  ;;  %v464_v16 = vld [vmem:[%s9862_s3 + $0xd8] sm:$0xff] }
  0x95   :  { %5833 = vmatprep.subr.bf16.mxu1 %v8306_v62  ;;  %v456_v62 = vld [vmem:[%s9862_s3 + $0x98] sm:$0xff]  ;;  %v466_v2 = vld [vmem:[%s9862_s3 + $0xe8] sm:$0xff] }
  0x96   :  { %866 = vmatmul.mubr.f32.vlgmr.msra.gmra.mrb[18].mxu0 %v10172_v26  ;;  %10174 = vst [vmem:[#allocation94_spill] sm:$0xff] %v8366_v59  ;;  %10175 = vst [vmem:[#allocation95_spill] sm:$0xff] %v8368_v41  ;;  %v8380_v37 = vpack.c.bf16 %v460_v28, %v456_v62  ;;  %v468_v62 = vld [vmem:[%s9862_s3 + $0xf8] sm:$0xff]  ;;  %v8400_v28 = vpack.c.bf16 %v457_v22, %v453_v25  ;;  %v463_v22 = vld [vmem:[%s9862_s3 + $0xd0] sm:$0xff] }
  0x97   :  { %937 = vmatmul.mubr.f32.vlgmr.msra.gmra.mrb[18].mxu1 %v10172_v26  ;;  %5803 = vmatpush1.bf16.msra.mxu0 %v8324_v15  ;;  %v465_v15 = vld [vmem:[%s9862_s3 + $0xe0] sm:$0xff]  ;;  %v8418_v25 = vpack.c.bf16 %v468_v62, %v464_v16  ;;  %v476_v16 = vld [vmem:[%s9862_s3 + $0x138] sm:$0xff] }
  0x98   :  { %5835 = vmatpush1.bf16.msra.mxu1 %v8328_v21  ;;  %5805 = vmatprep.subr.bf16.mxu0 %v8330_v52  ;;  %10176 = vst [vmem:[#allocation96_spill] sm:$0xff] %v8380_v37  ;;  %10177 = vst [vmem:[#allocation97_spill] sm:$0xff] %v8400_v28  ;;  %v8406_v52 = vpack.c.bf16 %v466_v2, %v462_v3  ;;  %v461_v21 = vld [vmem:[%s9862_s3 + $0xc0] sm:$0xff]  ;;  %v474_v3 = vld [vmem:[%s9862_s3 + $0x128] sm:$0xff] }
  0x99   :  { %5837 = vmatprep.subr.bf16.mxu1 %v8342_v61  ;;  %1039 = vmatprep.mubr.f32.mxu0 %v10172_v26  ;;  %v8404_v61 = vpack.c.bf16 %v459_v43, %v455_v51  ;;  %10180 = vst [vmem:[#allocation100_spill] sm:$0xff] %v8418_v25  ;;  %v467_v51 = vld [vmem:[%s9862_s3 + $0xf0] sm:$0xff]  ;;  %v470_v43 = vld [vmem:[%s9862_s3 + $0x108] sm:$0xff]  ;;  %v472_v2 = vld [vmem:[%s9862_s3 + $0x118] sm:$0xff]  ;;  %v8436_v62 = vpack.c.bf16 %v465_v15, %v461_v21 }
  0x9a   :  { %1110 = vmatprep.mubr.f32.mxu1 %v10172_v26  ;;  %10179 = vst [vmem:[#allocation99_spill] sm:$0xff] %v8406_v52  ;;  %v471_v21 = vld [vmem:[%s9862_s3 + $0x110] sm:$0xff]  ;;  %v8454_v15 = vpack.c.bf16 %v476_v16, %v472_v2  ;;  %v484_v2 = vld [vmem:[%s9862_s3 + $0x178] sm:$0xff] }
  0x9b   :  { %5807 = vmatpush1.bf16.msra.mxu0 %v8362_v34  ;;  %10178 = vst [vmem:[#allocation98_spill] sm:$0xff] %v8404_v61  ;;  %10181 = vst [vmem:[#allocation101_spill] sm:$0xff] %v8436_v62  ;;  %v473_v34 = vld [vmem:[%s9862_s3 + $0x120] sm:$0xff] }
  0x9c   :  { %5839 = vmatpush1.bf16.msra.mxu1 %v8366_v59  ;;  %5809 = vmatprep.subr.bf16.mxu0 %v8368_v41  ;;  %v8442_v41 = vpack.c.bf16 %v474_v3, %v470_v43  ;;  %v469_v59 = vld [vmem:[%s9862_s3 + $0x100] sm:$0xff]  ;;  %10184 = vst [vmem:[#allocation104_spill] sm:$0xff] %v8454_v15  ;;  %v482_v43 = vld [vmem:[%s9862_s3 + $0x168] sm:$0xff]  ;;  %v480_v3 = vld [vmem:[%s9862_s3 + $0x158] sm:$0xff] }
  0x9d   :  { %5841 = vmatprep.subr.bf16.mxu1 %v8380_v37  ;;  %v8440_v37 = vpack.c.bf16 %v467_v51, %v463_v22  ;;  %v475_v22 = vld [vmem:[%s9862_s3 + $0x130] sm:$0xff]  ;;  %v478_v51 = vld [vmem:[%s9862_s3 + $0x148] sm:$0xff]  ;;  %v8472_v16 = vpack.c.bf16 %v473_v34, %v469_v59  ;;  %v8490_v34 = vpack.c.bf16 %v484_v2, %v480_v3  ;;  %v492_v3 = vld [vmem:[%s9862_s3 + $0x1b8] sm:$0xff] }
  0x9e   :  { %10183 = vst [vmem:[#allocation103_spill] sm:$0xff] %v8442_v41  ;;  %v479_v59 = vld [vmem:[%s9862_s3 + $0x150] sm:$0xff] }
  0x9f   :  { %5811 = vmatpush1.bf16.msra.mxu0 %v8400_v28  ;;  %10182 = vst [vmem:[#allocation102_spill] sm:$0xff] %v8440_v37  ;;  %10185 = vst [vmem:[#allocation105_spill] sm:$0xff] %v8472_v16  ;;  %v481_v28 = vld [vmem:[%s9862_s3 + $0x160] sm:$0xff] }
  0xa0   :  { %5843 = vmatpush1.bf16.msra.mxu1 %v8404_v61  ;;  %5813 = vmatprep.subr.bf16.mxu0 %v8406_v52  ;;  %v8478_v52 = vpack.c.bf16 %v482_v43, %v478_v51  ;;  %v477_v61 = vld [vmem:[%s9862_s3 + $0x140] sm:$0xff]  ;;  %10188 = vst [vmem:[#allocation108_spill] sm:$0xff] %v8490_v34  ;;  %v490_v51 = vld [vmem:[%s9862_s3 + $0x1a8] sm:$0xff]  ;;  %v488_v43 = vld [vmem:[%s9862_s3 + $0x198] sm:$0xff] }
  0xa1   :  { %5845 = vmatprep.subr.bf16.mxu1 %v8418_v25  ;;  %v8476_v25 = vpack.c.bf16 %v475_v22, %v471_v21  ;;  %v483_v21 = vld [vmem:[%s9862_s3 + $0x170] sm:$0xff]  ;;  %v486_v22 = vld [vmem:[%s9862_s3 + $0x188] sm:$0xff]  ;;  %v8508_v2 = vpack.c.bf16 %v481_v28, %v477_v61  ;;  %v8526_v28 = vpack.c.bf16 %v492_v3, %v488_v43  ;;  %v500_v43 = vld [vmem:[%s9862_s3 + $0x1f8] sm:$0xff] }
  0xa2   :  { %10187 = vst [vmem:[#allocation107_spill] sm:$0xff] %v8478_v52  ;;  %v487_v61 = vld [vmem:[%s9862_s3 + $0x190] sm:$0xff] }
  0xa3   :  { %5815 = vmatpush1.bf16.msra.mxu0 %v8436_v62  ;;  %10186 = vst [vmem:[#allocation106_spill] sm:$0xff] %v8476_v25  ;;  %10189 = vst [vmem:[#allocation109_spill] sm:$0xff] %v8508_v2  ;;  %v489_v62 = vld [vmem:[%s9862_s3 + $0x1a0] sm:$0xff] }
  0xa4   :  { %5847 = vmatpush1.bf16.msra.mxu1 %v8440_v37  ;;  %5817 = vmatprep.subr.bf16.mxu0 %v8442_v41  ;;  %v8514_v41 = vpack.c.bf16 %v490_v51, %v486_v22  ;;  %v485_v37 = vld [vmem:[%s9862_s3 + $0x180] sm:$0xff]  ;;  %10192 = vst [vmem:[#allocation112_spill] sm:$0xff] %v8526_v28  ;;  %v498_v22 = vld [vmem:[%s9862_s3 + $0x1e8] sm:$0xff]  ;;  %v496_v51 = vld [vmem:[%s9862_s3 + $0x1d8] sm:$0xff] }
  0xa5   :  { %5849 = vmatprep.subr.bf16.mxu1 %v8454_v15  ;;  %v8512_v15 = vpack.c.bf16 %v483_v21, %v479_v59  ;;  %v491_v59 = vld [vmem:[%s9862_s3 + $0x1b0] sm:$0xff]  ;;  %v494_v21 = vld [vmem:[%s9862_s3 + $0x1c8] sm:$0xff]  ;;  %v8544_v3 = vpack.c.bf16 %v489_v62, %v485_v37  ;;  %v8559_v37 = vpack.c.bf16 %v500_v43, %v496_v51  ;;  %v10202_v51 = vld [vmem:[#allocation69_spill] sm:$0xff] }
  0xa6   :  { %10191 = vst [vmem:[#allocation111_spill] sm:$0xff] %v8514_v41  ;;  %v495_v62 = vld [vmem:[%s9862_s3 + $0x1d0] sm:$0xff]  ;;  %v10203_v43 = vld [vmem:[#allocation70_spill] sm:$0xff] }
  0xa7   :  { %5819 = vmatpush1.bf16.msra.mxu0 %v8472_v16  ;;  %10190 = vst [vmem:[#allocation110_spill] sm:$0xff] %v8512_v15  ;;  %10193 = vst [vmem:[#allocation113_spill] sm:$0xff] %v8544_v3  ;;  %v497_v16 = vld [vmem:[%s9862_s3 + $0x1e0] sm:$0xff] }
  0xa8   :  { %5851 = vmatpush1.bf16.msra.mxu1 %v8476_v25  ;;  %5821 = vmatprep.subr.bf16.mxu0 %v8478_v52  ;;  %v8550_v52 = vpack.c.bf16 %v498_v22, %v494_v21  ;;  %v493_v25 = vld [vmem:[%s9862_s3 + $0x1c0] sm:$0xff]  ;;  %10196 = vst [vmem:[#allocation116_spill] sm:$0xff] %v8559_v37  ;;  %v10201_v22 = vld [vmem:[#allocation68_spill] sm:$0xff] }
  0xa9   :  { %5853 = vmatprep.subr.bf16.mxu1 %v8490_v34  ;;  %v8548_v34 = vpack.c.bf16 %v491_v59, %v487_v61  ;;  %v499_v61 = vld [vmem:[%s9862_s3 + $0x1f0] sm:$0xff]  ;;  %v8568_v59 = vpack.c.bf16 %v497_v16, %v493_v25  ;;  %v10199_v25 = vld [vmem:[#allocation66_spill] sm:$0xff]  ;;  %v10200_v16 = vld [vmem:[#allocation67_spill] sm:$0xff] }
  0xaa   :  { %10195 = vst [vmem:[#allocation115_spill] sm:$0xff] %v8550_v52  ;;  %v8572_v21 = vpack.c.bf16 %v499_v61, %v495_v62  ;;  %v10204_v62 = vld [vmem:[#allocation71_spill] sm:$0xff]  ;;  %v10205_v61 = vld [vmem:[#allocation72_spill] sm:$0xff] }
  0xab   :  { %5823 = vmatpush1.bf16.msra.mxu0 %v8508_v2  ;;  %10194 = vst [vmem:[#allocation114_spill] sm:$0xff] %v8548_v34  ;;  %10197 = vst [vmem:[#allocation117_spill] sm:$0xff] %v8568_v59 }
  0xac   :  { %5855 = vmatpush1.bf16.msra.mxu1 %v8512_v15  ;;  %5825 = vmatprep.subr.bf16.mxu0 %v8514_v41  ;;  %10198 = vst [vmem:[#allocation118_spill] sm:$0xff] %v8572_v21 }
  0xad   :  { %5857 = vmatprep.subr.bf16.mxu1 %v8526_v28 }
  0xaf   :  { %5827 = vmatpush1.bf16.msra.mxu0 %v8544_v3 }
  0xb0   :  { %5859 = vmatpush1.bf16.msra.mxu1 %v8548_v34  ;;  %5829 = vmatprep.subr.bf16.mxu0 %v8550_v52 }
  0xb1   :  { %5861 = vmatprep.subr.bf16.mxu1 %v8559_v37 }
  0xb3   :  { %5831 = vmatpush1.bf16.msra.mxu0 %v8568_v59 }
  0xb4   :  { %5863 = vmatpush1.bf16.msra.mxu1 %v8572_v21  ;;  %5865 = vmatprep.subr.bf16.mxu0 %v8057_v29 }
  0xb5   :  { %5897 = vmatprep.subr.bf16.mxu1 %v8059_v30 }
  0xb6   :  { %1040 = vmatmul.mubr.f32.vlgmr.msra.gmra.mrb[0].mxu0 %v10172_v26 }
  0xb7   :  { %1111 = vmatmul.mubr.f32.vlgmr.msra.gmra.mrb[0].mxu1 %v10172_v26  ;;  %5867 = vmatpush1.bf16.msra.mxu0 %v8061_v35 }
  0xb8   :  { %5899 = vmatpush1.bf16.msra.mxu1 %v8064_v38  ;;  %5869 = vmatprep.subr.bf16.mxu0 %v8067_v42 }
  0xb9   :  { %5901 = vmatprep.subr.bf16.mxu1 %v8070_v47  ;;  %1225 = vmatprep.mubr.f32.mxu0 %v10172_v26 }
  0xba   :  { %1296 = vmatprep.mubr.f32.mxu1 %v10172_v26 }
  0xbb   :  { %5871 = vmatpush1.bf16.msra.mxu0 %v8074_v50 }
  0xbc   :  { %5903 = vmatpush1.bf16.msra.mxu1 %v8078_v54  ;;  %5873 = vmatprep.subr.bf16.mxu0 %v8082_v57 }
  0xbd   :  { %5905 = vmatprep.subr.bf16.mxu1 %v8086_v60 }
  0xbf   :  { %5875 = vmatpush1.bf16.msra.mxu0 %v8090_v1 }
  0xc0   :  { %5907 = vmatpush1.bf16.msra.mxu1 %v8094_v4  ;;  %5877 = vmatprep.subr.bf16.mxu0 %v8098_v7 }
  0xc1   :  { %5909 = vmatprep.subr.bf16.mxu1 %v8102_v10 }
  0xc3   :  { %5879 = vmatpush1.bf16.msra.mxu0 %v8106_v14 }
  0xc4   :  { %5911 = vmatpush1.bf16.msra.mxu1 %v8110_v17  ;;  %5881 = vmatprep.subr.bf16.mxu0 %v8114_v20 }
  0xc5   :  { %5913 = vmatprep.subr.bf16.mxu1 %v8118_v23 }
  0xc7   :  { %5883 = vmatpush1.bf16.msra.mxu0 %v8122_v27 }
  0xc8   :  { %5915 = vmatpush1.bf16.msra.mxu1 %v8126_v32  ;;  %5885 = vmatprep.subr.bf16.mxu0 %v8130_v36 }
  0xc9   :  { %5917 = vmatprep.subr.bf16.mxu1 %v8134_v40 }
  0xcb   :  { %5887 = vmatpush1.bf16.msra.mxu0 %v8138_v45 }
  0xcc   :  { %5919 = vmatpush1.bf16.msra.mxu1 %v8142_v49  ;;  %5889 = vmatprep.subr.bf16.mxu0 %v8146_v53 }
  0xcd   :  { %5921 = vmatprep.subr.bf16.mxu1 %v8150_v58 }
  0xcf   :  { %5891 = vmatpush1.bf16.msra.mxu0 %v8154_v63 }
  0xd0   :  { %5923 = vmatpush1.bf16.msra.mxu1 %v8158_v5  ;;  %5893 = vmatprep.subr.bf16.mxu0 %v8162_v9 }
  0xd1   :  { %5925 = vmatprep.subr.bf16.mxu1 %v8166_v13 }
  0xd3   :  { %5895 = vmatpush1.bf16.msra.mxu0 %v8170_v19 }
  0xd4   :  { %5927 = vmatpush1.bf16.msra.mxu1 %v8174_v24  ;;  %5929 = vmatprep.subr.bf16.mxu0 %v8178_v31 }
  0xd5   :  { %5961 = vmatprep.subr.bf16.mxu1 %v8182_v39 }
  0xd6   :  { %1226 = vmatmul.mubr.f32.vlgmr.msra.gmra.mrb[20].mxu0 %v10172_v26 }
  0xd7   :  { %1297 = vmatmul.mubr.f32.vlgmr.msra.gmra.mrb[20].mxu1 %v10172_v26  ;;  %5931 = vmatpush1.bf16.msra.mxu0 %v8186_v44 }
  0xd8   :  { %5963 = vmatpush1.bf16.msra.mxu1 %v8190_v46  ;;  %5933 = vmatprep.subr.bf16.mxu0 %v8192_v48 }
  0xd9   :  { %5965 = vmatprep.subr.bf16.mxu1 %v8196_v56  ;;  %1367 = vmatprep.mubr.f32.mxu0 %v10172_v26 }
  0xda   :  { %1438 = vmatprep.mubr.f32.mxu1 %v10172_v26 }
  0xdb   :  { %5935 = vmatpush1.bf16.msra.mxu0 %v8202_v6  ;;  %v134_v6 = vlaneseq }
  0xdc   :  { %5967 = vmatpush1.bf16.msra.mxu1 %v8206_v8  ;;  %5937 = vmatprep.subr.bf16.mxu0 %v8208_v11  ;;  %v10206_v8 = vld [vmem:[#allocation73_spill] sm:$0xff]  ;;  %v10207_v11 = vld [vmem:[#allocation74_spill] sm:$0xff] }
  0xdd   :  { %5969 = vmatprep.subr.bf16.mxu1 %v8211_v18 }
  0xdf   :  { %5939 = vmatpush1.bf16.msra.mxu0 %v8216_v33  ;;  %v10208_v33 = vld [vmem:[#allocation76_spill] sm:$0xff] }
  0xe0   :  { %5971 = vmatpush1.bf16.msra.mxu1 %v10199_v25  ;;  %5941 = vmatprep.subr.bf16.mxu0 %v10200_v16 }
  0xe1   :  { %5973 = vmatprep.subr.bf16.mxu1 %v10201_v22  ;;  %v10209_v22 = vld [vmem:[#allocation79_spill] sm:$0xff] }
  0xe3   :  { %5943 = vmatpush1.bf16.msra.mxu0 %v10202_v51  ;;  %v10210_v51 = vld [vmem:[#allocation80_spill] sm:$0xff] }
  0xe4   :  { %5975 = vmatpush1.bf16.msra.mxu1 %v10203_v43  ;;  %5945 = vmatprep.subr.bf16.mxu0 %v10204_v62  ;;  %v10211_v43 = vld [vmem:[#allocation81_spill] sm:$0xff]  ;;  %v10212_v62 = vld [vmem:[#allocation82_spill] sm:$0xff] }
  0xe5   :  { %5977 = vmatprep.subr.bf16.mxu1 %v10205_v61  ;;  %v10213_v61 = vld [vmem:[#allocation83_spill] sm:$0xff] }
  0xe7   :  { %5947 = vmatpush1.bf16.msra.mxu0 %v10206_v8  ;;  %v10214_v8 = vld [vmem:[#allocation84_spill] sm:$0xff] }
  0xe8   :  { %5979 = vmatpush1.bf16.msra.mxu1 %v10207_v11  ;;  %5949 = vmatprep.subr.bf16.mxu0 %v8246_v55  ;;  %v10215_v11 = vld [vmem:[#allocation85_spill] sm:$0xff]  ;;  %v10216_v55 = vld [vmem:[#allocation86_spill] sm:$0xff] }
  0xe9   :  { %5981 = vmatprep.subr.bf16.mxu1 %v10208_v33  ;;  %v10217_v33 = vld [vmem:[#allocation87_spill] sm:$0xff] }
  0xeb   :  { %5951 = vmatpush1.bf16.msra.mxu0 %v8252_v12  ;;  %v10218_v12 = vld [vmem:[#allocation88_spill] sm:$0xff] }
  0xec   :  { %5983 = vmatpush1.bf16.msra.mxu1 %v8256_v0  ;;  %5953 = vmatprep.subr.bf16.mxu0 %v10209_v22 }
  0xed   :  { %5985 = vmatprep.subr.bf16.mxu1 %v10210_v51 }
  0xef   :  { %5955 = vmatpush1.bf16.msra.mxu0 %v10211_v43 }
  0xf0   :  { %5987 = vmatpush1.bf16.msra.mxu1 %v10212_v62  ;;  %5957 = vmatprep.subr.bf16.mxu0 %v10213_v61  ;;  %v8651_v61 = vshrl.u32 %v134_v6, 7 }
  0xf1   :  { %5989 = vmatprep.subr.bf16.mxu1 %v10214_v8 }
  0xf2   :  { %v9970_v8 = vsub.s32 0, %v8651_v61  ;;  %v9978_v6 = vsub.s32 3, %v8651_v61 }
  0xf3   :  { %5959 = vmatpush1.bf16.msra.mxu0 %v10215_v11 }
  0xf4   :  { %5991 = vmatpush1.bf16.msra.mxu1 %v10216_v55  ;;  %5993 = vmatprep.subr.bf16.mxu0 %v10217_v33  ;;  %v132_v55 = vld [vmem:[%s9861_s2] sm:$0xf]  ;;  %v9971_v33 = vsub.s32 1, %v8651_v61  ;;  %s5369_s2 = sshll.u32 %s7925_s19, 4  ;;  %s5370_s2 = int_to_ptr.vmem [resolvable:$true] %s5369_s2 }
  0xf5   :  { %6025 = vmatprep.subr.bf16.mxu1 %v10218_v12  ;;  %s7884_s20 = scalar_lea.vmem %s5370_s2, 128  ;;  %p7889_p5 = scmp.lt.s32.totalorder %s5370_s2, %s5370_s2 }
  0xf6   :  { %p7885_p4 = scmp.ne.s32.totalorder %s5370_s2, %s7884_s20  ;;  %p7890_p6 = scmp.lt.s32.totalorder %s7884_s20, %s7884_s20 }
  0xf8   :  { %p7891_p7 = por %p7890_p6, %p7889_p5 }
  0xfa   :  { %p7892_p8 = pnand %p7891_p7, %p7885_p4 }
 0x149   :  { %v725_v0 = vpop.f32.mrb[16].mxu0 }
 0x14a   :  { %v727_v22 = vpop.f32.mrb[17].mxu0  ;;  %v796_v16 = vpop.f32.mrb[16].mxu1  ;;  %v8660_v0 = vrot.slane %v132_v55, %v9970_v8  ;;  %v8671_v8 = vrot.slane %v132_v55, %v9978_v6 }
 0x14b   :  { %v798_v51 = vpop.f32.mrb[17].mxu1 }
 0x14c   :  { %10219 = vst [vmem:[#allocation119_spill] sm:$0xff] %v8660_v0  ;;  %10221 = vst [vmem:[#allocation121_spill] sm:$0xff] %v8671_v8 }
 0x169   :  { %v867_v25 = vpop.f32.mrb[18].mxu0 }
 0x16a   :  { %v869_v43 = vpop.f32.mrb[19].mxu0  ;;  %v938_v18 = vpop.f32.mrb[18].mxu1  ;;  %v8664_v25 = vrot.slane %v132_v55, %v9971_v33  ;;  %v9987_v33 = vsub.s32 2, %v8651_v61 }
 0x16b   :  { %v940_v62 = vpop.f32.mrb[19].mxu1 }
 0x16c   :  { %10220 = vst [vmem:[#allocation120_spill] sm:$0xff] %v8664_v25 }
 0x189   :  { %v1041_v18 = vpop.f32.mrb[0].mxu0 }
 0x18a   :  { %v7432_v16 = vadd.f32 %v1041_v18, %v8660_v0  ;;  %v1112_v22 = vpop.f32.mrb[0].mxu1  ;;  %v1043_v51 = vpop.f32.mrb[1].mxu0  ;;  %v8677_v18 = vrot.slane %v132_v55, %v9987_v33  ;;  %v10236_v33 = vld [vmem:[#allocation103_spill] sm:$0xff] }
 0x18b   :  { %v7433_v43 = vadd.f32 %v1043_v51, %v8664_v25  ;;  %v1114_v62 = vpop.f32.mrb[1].mxu1 }
 0x18c   :  { %v5399_v12 = vmul.f32 -1.442695, %v7432_v16  ;;  %v7449_v56 = vadd.f32 %v1114_v62, %v8671_v8  ;;  %v7448_v51 = vadd.f32 %v1112_v22, %v8677_v18 }
 0x18d   :  { %v5400_v11 = vmul.f32 -1.442695, %v7433_v43 }
 0x18e   :  { %7540 = vpow2.f32 %v5399_v12  ;;  %v5401_v48 = vmul.f32 -1.442695, %v7449_v56 }
 0x18f   :  { %7542 = vpow2.f32 %v5400_v11 }
 0x190   :  { %7544 = vpow2.f32 %v5401_v48  ;;  %v10222_v48 = vld [vmem:[#allocation89_spill] sm:$0xff] }
 0x191   :  { %7546 = vtanh.f32 %v7448_v51  ;;  %v10224_v51 = vld [vmem:[#allocation91_spill] sm:$0xff] }
 0x198   :  { %v7541_v46 = vpop.eup %7540 }
 0x199   :  { %v7543_v16 = vpop.eup %7542  ;;  %v1124_v43 = vadd.f32 1.0, %v7541_v46 }
 0x19a   :  { %v1130_v6 = vadd.f32 1.0, %v7543_v16  ;;  %v7545_v12 = vpop.eup %7544  ;;  %v10225_v16 = vld [vmem:[#allocation92_spill] sm:$0xff] }
 0x19b   :  { %7548 = vrcp.f32 %v1124_v43  ;;  %v7547_v44 = vpop.eup %7546  ;;  %v1137_v8 = vadd.f32 1.0, %v7545_v12  ;;  %v10230_v43 = vld [vmem:[#allocation97_spill] sm:$0xff]  ;;  %v10231_v12 = vld [vmem:[#allocation98_spill] sm:$0xff] }
 0x19c   :  { %7550 = vrcp.f32 %v1130_v6  ;;  %v10223_v6 = vld [vmem:[#allocation90_spill] sm:$0xff] }
 0x19d   :  { %7552 = vrcp.f32 %v1137_v8  ;;  %v10227_v8 = vld [vmem:[#allocation94_spill] sm:$0xff] }
 0x1a5   :  { %v7549_v11 = vpop.eup %7548 }
 0x1a6   :  { %v7551_v25 = vpop.eup %7550  ;;  %v1141_v62 = vmul.f32 %v7549_v11, %v7547_v44  ;;  %v10226_v44 = vld [vmem:[#allocation93_spill] sm:$0xff]  ;;  %v10232_v11 = vld [vmem:[#allocation99_spill] sm:$0xff] }
 0x1a7   :  { %v1140_v0 = vmul.f32 0.0, %v7551_v25  ;;  %v7553_v56 = vpop.eup %7552  ;;  %v10229_v25 = vld [vmem:[#allocation96_spill] sm:$0xff] }
 0x1a9   :  { %v8680_v55 = vadd.f32 %v1141_v62, %v1140_v0  ;;  %v10228_v0 = vld [vmem:[#allocation95_spill] sm:$0xff]  ;;  %v10233_v62 = vld [vmem:[#allocation100_spill] sm:$0xff] }
 0x1ab   :  { %7554 = vtanh.f32 %v8680_v55 }
 0x1b5   :  { %v7555_v22 = vpop.eup %7554 }
 0x1b6   :  { %v1144_v46 = vmul.f32 %v7555_v22, %v7553_v56  ;;  %v10234_v56 = vld [vmem:[#allocation101_spill] sm:$0xff]  ;;  %v10235_v22 = vld [vmem:[#allocation102_spill] sm:$0xff] }
 0x1b8   :  { %1368 = vmatmul.mubr.f32.vlgmr.msra.gmra.mrb[20].mxu0 %v1144_v46  ;;  %1439 = vmatmul.mubr.f32.vlgmr.msra.gmra.mrb[20].mxu1 %v1144_v46 }
 0x1b9   :  { %5995 = vmatpush1.bf16.msra.mxu0 %v10222_v48  ;;  %6027 = vmatpush1.bf16.msra.mxu1 %v10223_v6 }
 0x1ba   :  { %5997 = vmatprep.subr.bf16.mxu0 %v10224_v51  ;;  %6029 = vmatprep.subr.bf16.mxu1 %v10225_v16 }
 0x1bb   :  { %1542 = vmatprep.mubr.f32.mxu0 %v10172_v26  ;;  %1613 = vmatprep.mubr.f32.mxu1 %v10172_v26 }
 0x1bd   :  { %5999 = vmatpush1.bf16.msra.mxu0 %v10226_v44  ;;  %6031 = vmatpush1.bf16.msra.mxu1 %v10227_v8  ;;  %v10237_v44 = vld [vmem:[#allocation104_spill] sm:$0xff]  ;;  %v10238_v8 = vld [vmem:[#allocation105_spill] sm:$0xff] }
 0x1be   :  { %6001 = vmatprep.subr.bf16.mxu0 %v10228_v0  ;;  %6033 = vmatprep.subr.bf16.mxu1 %v10229_v25  ;;  %v10239_v0 = vld [vmem:[#allocation106_spill] sm:$0xff]  ;;  %v10240_v25 = vld [vmem:[#allocation107_spill] sm:$0xff] }
 0x1c1   :  { %6003 = vmatpush1.bf16.msra.mxu0 %v10230_v43  ;;  %6035 = vmatpush1.bf16.msra.mxu1 %v10231_v12  ;;  %v10241_v43 = vld [vmem:[#allocation108_spill] sm:$0xff] }
 0x1c2   :  { %6005 = vmatprep.subr.bf16.mxu0 %v10232_v11  ;;  %6037 = vmatprep.subr.bf16.mxu1 %v10233_v62 }
 0x1c5   :  { %6007 = vmatpush1.bf16.msra.mxu0 %v10234_v56  ;;  %6039 = vmatpush1.bf16.msra.mxu1 %v10235_v22 }
 0x1c6   :  { %6009 = vmatprep.subr.bf16.mxu0 %v10236_v33  ;;  %6041 = vmatprep.subr.bf16.mxu1 %v10237_v44 }
 0x1c9   :  { %6011 = vmatpush1.bf16.msra.mxu0 %v10238_v8  ;;  %6043 = vmatpush1.bf16.msra.mxu1 %v10239_v0 }
 0x1ca   :  { %6013 = vmatprep.subr.bf16.mxu0 %v10240_v25  ;;  %6045 = vmatprep.subr.bf16.mxu1 %v10241_v43 }
 0x1cd   :  { %6015 = vmatpush1.bf16.msra.mxu0 %v8508_v2  ;;  %6047 = vmatpush1.bf16.msra.mxu1 %v8512_v15 }
 0x1ce   :  { %6017 = vmatprep.subr.bf16.mxu0 %v8514_v41  ;;  %6049 = vmatprep.subr.bf16.mxu1 %v8526_v28 }
 0x1d1   :  { %6019 = vmatpush1.bf16.msra.mxu0 %v8544_v3  ;;  %6051 = vmatpush1.bf16.msra.mxu1 %v8548_v34 }
 0x1d2   :  { %6021 = vmatprep.subr.bf16.mxu0 %v8550_v52  ;;  %6053 = vmatprep.subr.bf16.mxu1 %v8559_v37 }
 0x1d5   :  { %6023 = vmatpush1.bf16.msra.mxu0 %v8568_v59  ;;  %6055 = vmatpush1.bf16.msra.mxu1 %v8572_v21 }
 0x1d6   :  { %6057 = vmatprep.subr.bf16.mxu0 %v8057_v29  ;;  %6089 = vmatprep.subr.bf16.mxu1 %v8059_v30 }
 0x1d8   :  { %1543 = vmatmul.mubr.f32.vlgmr.msra.gmra.mrb[2].mxu0 %v1144_v46  ;;  %1614 = vmatmul.mubr.f32.vlgmr.msra.gmra.mrb[2].mxu1 %v1144_v46  ;;  %v629_v46 = vld [vmem:[%s9865_s6] sm:$0xf] }
 0x1d9   :  { %6059 = vmatpush1.bf16.msra.mxu0 %v8061_v35  ;;  %6091 = vmatpush1.bf16.msra.mxu1 %v8064_v38 }
 0x1da   :  { %6061 = vmatprep.subr.bf16.mxu0 %v8067_v42  ;;  %6093 = vmatprep.subr.bf16.mxu1 %v8070_v47 }
 0x1db   :  { %1728 = vmatprep.mubr.f32.mxu0 %v10172_v26  ;;  %1799 = vmatprep.mubr.f32.mxu1 %v10172_v26 }
 0x1dd   :  { %6063 = vmatpush1.bf16.msra.mxu0 %v8074_v50  ;;  %6095 = vmatpush1.bf16.msra.mxu1 %v8078_v54 }
 0x1de   :  { %6065 = vmatprep.subr.bf16.mxu0 %v8082_v57  ;;  %6097 = vmatprep.subr.bf16.mxu1 %v8086_v60 }
 0x1e1   :  { %6067 = vmatpush1.bf16.msra.mxu0 %v8090_v1  ;;  %6099 = vmatpush1.bf16.msra.mxu1 %v8094_v4 }
 0x1e2   :  { %6069 = vmatprep.subr.bf16.mxu0 %v8098_v7  ;;  %6101 = vmatprep.subr.bf16.mxu1 %v8102_v10 }
 0x1e5   :  { %6071 = vmatpush1.bf16.msra.mxu0 %v8106_v14  ;;  %6103 = vmatpush1.bf16.msra.mxu1 %v8110_v17 }
 0x1e6   :  { %6073 = vmatprep.subr.bf16.mxu0 %v8114_v20  ;;  %6105 = vmatprep.subr.bf16.mxu1 %v8118_v23 }
 0x1e9   :  { %6075 = vmatpush1.bf16.msra.mxu0 %v8122_v27  ;;  %6107 = vmatpush1.bf16.msra.mxu1 %v8126_v32 }
 0x1ea   :  { %6077 = vmatprep.subr.bf16.mxu0 %v8130_v36  ;;  %6109 = vmatprep.subr.bf16.mxu1 %v8134_v40  ;;  %v10245_v40 = vsub.s32 3, %v8651_v61 }
 0x1ec   :  { %v8766_v36 = vrot.slane %v629_v46, %v10245_v40 }
 0x1ed   :  { %6079 = vmatpush1.bf16.msra.mxu0 %v8138_v45  ;;  %6111 = vmatpush1.bf16.msra.mxu1 %v8142_v49 }
 0x1ee   :  { %6081 = vmatprep.subr.bf16.mxu0 %v8146_v53  ;;  %6113 = vmatprep.subr.bf16.mxu1 %v8150_v58  ;;  %10246 = vst [vmem:[#allocation90_spill] sm:$0xff] %v8766_v36 }
 0x1f1   :  { %6083 = vmatpush1.bf16.msra.mxu0 %v8154_v63  ;;  %6115 = vmatpush1.bf16.msra.mxu1 %v8158_v5  ;;  %v10242_v63 = vsub.s32 0, %v8651_v61 }
 0x1f2   :  { %6085 = vmatprep.subr.bf16.mxu0 %v8162_v9  ;;  %6117 = vmatprep.subr.bf16.mxu1 %v8166_v13  ;;  %v10244_v9 = vsub.s32 1, %v8651_v61 }
 0x1f3   :  { %v8756_v58 = vrot.slane %v629_v46, %v10242_v63 }
 0x1f4   :  { %v8760_v5 = vrot.slane %v629_v46, %v10244_v9  ;;  %v10247_v9 = vsub.s32 2, %v8651_v61 }
 0x1f5   :  { %6087 = vmatpush1.bf16.msra.mxu0 %v8170_v19  ;;  %6119 = vmatpush1.bf16.msra.mxu1 %v8174_v24  ;;  %10243 = vst [vmem:[#allocation89_spill] sm:$0xff] %v8756_v58 }
 0x1f6   :  { %6121 = vmatprep.subr.bf16.mxu0 %v8178_v31  ;;  %6153 = vmatprep.subr.bf16.mxu1 %v8182_v39  ;;  %v8771_v32 = vrot.slane %v629_v46, %v10247_v9 }
 0x1f8   :  { %10248 = vst [vmem:[#allocation122_spill] sm:$0xff] %v8771_v32 }
 0x28b   :  { %v1369_v13 = vpop.f32.mrb[20].mxu0  ;;  %v1440_v19 = vpop.f32.mrb[20].mxu1 }
 0x28c   :  { %v1445_v24 = vadd.f32 %v1369_v13, %v8756_v58  ;;  %v1371_v53 = vpop.f32.mrb[21].mxu0  ;;  %v1442_v31 = vpop.f32.mrb[21].mxu1  ;;  %v1447_v13 = vadd.f32 %v1440_v19, %v8771_v32  ;;  %v10249_v19 = vld [vmem:[#allocation119_spill] sm:$0xff] }
 0x28d   :  { %v1446_v39 = vadd.f32 %v1371_v53, %v8760_v5  ;;  %v1448_v63 = vadd.f32 %v1442_v31, %v8766_v36 }
 0x28e   :  { %v5402_v49 = vmul.f32 -1.442695, %v1445_v24 }
 0x28f   :  { %v5403_v45 = vmul.f32 -1.442695, %v1446_v39  ;;  %v5404_v27 = vmul.f32 -1.442695, %v1448_v63 }
 0x290   :  { %7556 = vpow2.f32 %v5402_v49 }
 0x291   :  { %7558 = vpow2.f32 %v5403_v45 }
 0x292   :  { %7560 = vpow2.f32 %v5404_v27 }
 0x293   :  { %7562 = vtanh.f32 %v1447_v13 }
 0x29a   :  { %v7557_v58 = vpop.eup %7556 }
 0x29b   :  { %v7559_v23 = vpop.eup %7558  ;;  %v1452_v53 = vadd.f32 1.0, %v7557_v58 }
 0x29c   :  { %v1458_v24 = vadd.f32 1.0, %v7559_v23  ;;  %v7561_v40 = vpop.eup %7560  ;;  %v10250_v23 = vld [vmem:[#allocation120_spill] sm:$0xff] }
 0x29d   :  { %7564 = vrcp.f32 %v1452_v53  ;;  %v7563_v49 = vpop.eup %7562  ;;  %v1465_v36 = vadd.f32 1.0, %v7561_v40 }
 0x29e   :  { %7566 = vrcp.f32 %v1458_v24 }
 0x29f   :  { %7568 = vrcp.f32 %v1465_v36 }
 0x2a7   :  { %v7565_v45 = vpop.eup %7564 }
 0x2a8   :  { %v7567_v39 = vpop.eup %7566  ;;  %v1469_v31 = vmul.f32 %v7565_v45, %v7563_v49  ;;  %v10251_v49 = vld [vmem:[#allocation121_spill] sm:$0xff] }
 0x2a9   :  { %v1468_v61 = vmul.f32 0.0, %v7567_v39  ;;  %v7569_v45 = vpop.eup %7568 }
 0x2ab   :  { %v8774_v46 = vadd.f32 %v1469_v31, %v1468_v61  ;;  %v1544_v63 = vpop.f32.mrb[2].mxu0  ;;  %v1615_v9 = vpop.f32.mrb[2].mxu1 }
 0x2ac   :  { %v7434_v32 = vadd.f32 %v1544_v63, %v10249_v19  ;;  %v1546_v58 = vpop.f32.mrb[3].mxu0  ;;  %v1617_v27 = vpop.f32.mrb[3].mxu1  ;;  %v7450_v61 = vadd.f32 %v1615_v9, %v8677_v18  ;;  %v10257_v9 = vld [vmem:[#allocation61_spill] sm:$0xff] }
 0x2ad   :  { %7570 = vtanh.f32 %v8774_v46  ;;  %v7435_v13 = vadd.f32 %v1546_v58, %v10250_v23  ;;  %v7451_v40 = vadd.f32 %v1617_v27, %v10251_v49 }
 0x2ae   :  { %v5405_v53 = vmul.f32 -1.442695, %v7434_v32  ;;  %v10253_v32 = vld [vmem:[#allocation57_spill] sm:$0xff] }
 0x2af   :  { %v5406_v24 = vmul.f32 -1.442695, %v7435_v13  ;;  %v5407_v31 = vmul.f32 -1.442695, %v7451_v40  ;;  %v10254_v13 = vld [vmem:[#allocation58_spill] sm:$0xff] }
 0x2b0   :  { %7572 = vpow2.f32 %v5405_v53  ;;  %v10255_v53 = vld [vmem:[#allocation59_spill] sm:$0xff]  ;;  %v10258_v40 = vld [vmem:[#allocation62_spill] sm:$0xff] }
 0x2b1   :  { %7574 = vpow2.f32 %v5406_v24  ;;  %v10256_v24 = vld [vmem:[#allocation60_spill] sm:$0xff] }
 0x2b2   :  { %7576 = vpow2.f32 %v5407_v31  ;;  %v10261_v31 = vld [vmem:[#allocation65_spill] sm:$0xff] }
 0x2b3   :  { %7578 = vtanh.f32 %v7450_v61  ;;  %v10263_v61 = vld [vmem:[#allocation67_spill] sm:$0xff] }
 0x2b7   :  { %v7571_v39 = vpop.eup %7570 }
 0x2b8   :  { %v8781_v36 = vmul.f32 %v7571_v39, %v7569_v45  ;;  %v10259_v45 = vld [vmem:[#allocation63_spill] sm:$0xff]  ;;  %v10260_v39 = vld [vmem:[#allocation64_spill] sm:$0xff] }
 0x2ba   :  { %10252 = vst [vmem:[#allocation120_spill] sm:$0xff] %v8781_v36  ;;  %v7573_v63 = vpop.eup %7572  ;;  %1729 = vmatmul.mubr.f32.vlgmr.msra.gmra.mrb[22].mxu0 %v8781_v36  ;;  %1800 = vmatmul.mubr.f32.vlgmr.msra.gmra.mrb[22].mxu1 %v8781_v36 }
 0x2bb   :  { %v7575_v19 = vpop.eup %7574  ;;  %v1627_v58 = vadd.f32 1.0, %v7573_v63  ;;  %6123 = vmatpush1.bf16.msra.mxu0 %v10253_v32  ;;  %6155 = vmatpush1.bf16.msra.mxu1 %v10254_v13  ;;  %v10264_v63 = vld [vmem:[#allocation68_spill] sm:$0xff]  ;;  %v10267_v13 = vld [vmem:[#allocation71_spill] sm:$0xff] }
 0x2bc   :  { %v1633_v27 = vadd.f32 1.0, %v7575_v19  ;;  %6125 = vmatprep.subr.bf16.mxu0 %v10255_v53  ;;  %6157 = vmatprep.subr.bf16.mxu1 %v10256_v24  ;;  %v10262_v19 = vld [vmem:[#allocation66_spill] sm:$0xff]  ;;  %v10271_v32 = vld [vmem:[#allocation75_spill] sm:$0xff] }
 0x2bd   :  { %7580 = vrcp.f32 %v1627_v58  ;;  %1870 = vmatprep.mubr.f32.mxu0 %v10172_v26  ;;  %1941 = vmatprep.mubr.f32.mxu1 %v10172_v26  ;;  %v7577_v58 = vpop.eup %7576 }
 0x2be   :  { %7582 = vrcp.f32 %v1633_v27  ;;  %v7579_v36 = vpop.eup %7578  ;;  %v10265_v27 = vld [vmem:[#allocation69_spill] sm:$0xff] }
 0x2bf   :  { %6127 = vmatpush1.bf16.msra.mxu0 %v10257_v9  ;;  %6159 = vmatpush1.bf16.msra.mxu1 %v10258_v40  ;;  %v10266_v9 = vld [vmem:[#allocation70_spill] sm:$0xff] }
 0x2c0   :  { %6129 = vmatprep.subr.bf16.mxu0 %v10259_v45  ;;  %6161 = vmatprep.subr.bf16.mxu1 %v10260_v39  ;;  %v1640_v45 = vadd.f32 1.0, %v7577_v58  ;;  %v10268_v39 = vld [vmem:[#allocation72_spill] sm:$0xff]  ;;  %v10275_v58 = vld [vmem:[#allocation79_spill] sm:$0xff] }
 0x2c2   :  { %7584 = vrcp.f32 %v1640_v45  ;;  %v10280_v45 = vld [vmem:[#allocation84_spill] sm:$0xff] }
 0x2c3   :  { %6131 = vmatpush1.bf16.msra.mxu0 %v10261_v31  ;;  %6163 = vmatpush1.bf16.msra.mxu1 %v10262_v19 }
 0x2c4   :  { %6133 = vmatprep.subr.bf16.mxu0 %v10263_v61  ;;  %6165 = vmatprep.subr.bf16.mxu1 %v10264_v63  ;;  %v10269_v61 = vld [vmem:[#allocation73_spill] sm:$0xff]  ;;  %v10270_v63 = vld [vmem:[#allocation74_spill] sm:$0xff] }
 0x2c7   :  { %v7581_v24 = vpop.eup %7580  ;;  %6135 = vmatpush1.bf16.msra.mxu0 %v10265_v27  ;;  %6167 = vmatpush1.bf16.msra.mxu1 %v10266_v9  ;;  %v10272_v27 = vld [vmem:[#allocation76_spill] sm:$0xff] }
 0x2c8   :  { %v7583_v40 = vpop.eup %7582  ;;  %v1644_v53 = vmul.f32 %v7581_v24, %v7579_v36  ;;  %6137 = vmatprep.subr.bf16.mxu0 %v10267_v13  ;;  %6169 = vmatprep.subr.bf16.mxu1 %v10268_v39  ;;  %v10273_v36 = vld [vmem:[#allocation77_spill] sm:$0xff]  ;;  %v10274_v24 = vld [vmem:[#allocation78_spill] sm:$0xff] }
 0x2c9   :  { %v1643_v19 = vmul.f32 %v7583_v40, %v8680_v55  ;;  %v10276_v55 = vld [vmem:[#allocation80_spill] sm:$0xff]  ;;  %v10278_v40 = vld [vmem:[#allocation82_spill] sm:$0xff] }
 0x2cb   :  { %v8804_v31 = vadd.f32 %v1644_v53, %v1643_v19  ;;  %6139 = vmatpush1.bf16.msra.mxu0 %v10269_v61  ;;  %6171 = vmatpush1.bf16.msra.mxu1 %v10270_v63  ;;  %v10277_v53 = vld [vmem:[#allocation81_spill] sm:$0xff]  ;;  %v10279_v19 = vld [vmem:[#allocation83_spill] sm:$0xff]  ;;  %v10282_v61 = vld [vmem:[#allocation86_spill] sm:$0xff] }
 0x2cc   :  { %6141 = vmatprep.subr.bf16.mxu0 %v10271_v32  ;;  %6173 = vmatprep.subr.bf16.mxu1 %v10272_v27  ;;  %v7585_v32 = vpop.eup %7584  ;;  %v10281_v63 = vld [vmem:[#allocation85_spill] sm:$0xff] }
 0x2cd   :  { %7586 = vtanh.f32 %v8804_v31 }
 0x2cf   :  { %6143 = vmatpush1.bf16.msra.mxu0 %v10273_v36  ;;  %6175 = vmatpush1.bf16.msra.mxu1 %v10274_v24  ;;  %v10283_v24 = vld [vmem:[#allocation87_spill] sm:$0xff] }
 0x2d0   :  { %6145 = vmatprep.subr.bf16.mxu0 %v10275_v58  ;;  %6177 = vmatprep.subr.bf16.mxu1 %v10276_v55  ;;  %v10284_v58 = vld [vmem:[#allocation88_spill] sm:$0xff] }
 0x2d3   :  { %6147 = vmatpush1.bf16.msra.mxu0 %v10277_v53  ;;  %6179 = vmatpush1.bf16.msra.mxu1 %v10278_v40 }
 0x2d4   :  { %6149 = vmatprep.subr.bf16.mxu0 %v10279_v19  ;;  %6181 = vmatprep.subr.bf16.mxu1 %v10280_v45 }
 0x2d7   :  { %v7587_v27 = vpop.eup %7586  ;;  %6151 = vmatpush1.bf16.msra.mxu0 %v10281_v63  ;;  %6183 = vmatpush1.bf16.msra.mxu1 %v10282_v61  ;;  %v10285_v61 = vld [vmem:[#allocation93_spill] sm:$0xff] }
 0x2d8   :  { %v1647_v36 = vmul.f32 %v7587_v27, %v7585_v32  ;;  %6185 = vmatprep.subr.bf16.mxu0 %v10283_v24  ;;  %6217 = vmatprep.subr.bf16.mxu1 %v10284_v58  ;;  %v10286_v32 = vld [vmem:[#allocation94_spill] sm:$0xff]  ;;  %v10287_v27 = vld [vmem:[#allocation95_spill] sm:$0xff]  ;;  %v10288_v58 = vld [vmem:[#allocation96_spill] sm:$0xff] }
 0x2d9   :  { %v10289_v24 = vld [vmem:[#allocation97_spill] sm:$0xff] }
 0x2da   :  { %1871 = vmatmul.mubr.f32.vlgmr.msra.gmra.mrb[22].mxu0 %v1647_v36  ;;  %1942 = vmatmul.mubr.f32.vlgmr.msra.gmra.mrb[22].mxu1 %v1647_v36 }
 0x2db   :  { %6187 = vmatpush1.bf16.msra.mxu0 %v10222_v48  ;;  %6219 = vmatpush1.bf16.msra.mxu1 %v10223_v6 }
 0x2dc   :  { %6189 = vmatprep.subr.bf16.mxu0 %v10224_v51  ;;  %6221 = vmatprep.subr.bf16.mxu1 %v10225_v16 }
 0x2dd   :  { %2045 = vmatprep.mubr.f32.mxu0 %v10172_v26  ;;  %2116 = vmatprep.mubr.f32.mxu1 %v10172_v26 }
 0x2df   :  { %6191 = vmatpush1.bf16.msra.mxu0 %v10285_v61  ;;  %6223 = vmatpush1.bf16.msra.mxu1 %v10286_v32 }
 0x2e0   :  { %6193 = vmatprep.subr.bf16.mxu0 %v10287_v27  ;;  %6225 = vmatprep.subr.bf16.mxu1 %v10288_v58 }
 0x2e3   :  { %6195 = vmatpush1.bf16.msra.mxu0 %v10289_v24  ;;  %6227 = vmatpush1.bf16.msra.mxu1 %v10231_v12 }
 0x2e4   :  { %6197 = vmatprep.subr.bf16.mxu0 %v10232_v11  ;;  %6229 = vmatprep.subr.bf16.mxu1 %v10233_v62 }
 0x2e7   :  { %6199 = vmatpush1.bf16.msra.mxu0 %v10234_v56  ;;  %6231 = vmatpush1.bf16.msra.mxu1 %v10235_v22 }
 0x2e8   :  { %6201 = vmatprep.subr.bf16.mxu0 %v10236_v33  ;;  %6233 = vmatprep.subr.bf16.mxu1 %v10237_v44 }
 0x2eb   :  { %6203 = vmatpush1.bf16.msra.mxu0 %v10238_v8  ;;  %6235 = vmatpush1.bf16.msra.mxu1 %v10239_v0 }
 0x2ec   :  { %6205 = vmatprep.subr.bf16.mxu0 %v10240_v25  ;;  %6237 = vmatprep.subr.bf16.mxu1 %v10241_v43 }
 0x2ef   :  { %6207 = vmatpush1.bf16.msra.mxu0 %v8508_v2  ;;  %6239 = vmatpush1.bf16.msra.mxu1 %v8512_v15 }
 0x2f0   :  { %6209 = vmatprep.subr.bf16.mxu0 %v8514_v41  ;;  %6241 = vmatprep.subr.bf16.mxu1 %v8526_v28 }
 0x2f3   :  { %6211 = vmatpush1.bf16.msra.mxu0 %v8544_v3  ;;  %6243 = vmatpush1.bf16.msra.mxu1 %v8548_v34 }
 0x2f4   :  { %6213 = vmatprep.subr.bf16.mxu0 %v8550_v52  ;;  %6245 = vmatprep.subr.bf16.mxu1 %v8559_v37 }
 0x2f7   :  { %6215 = vmatpush1.bf16.msra.mxu0 %v8568_v59  ;;  %6247 = vmatpush1.bf16.msra.mxu1 %v8572_v21 }
 0x2f8   :  { %6249 = vmatprep.subr.bf16.mxu0 %v8057_v29  ;;  %6281 = vmatprep.subr.bf16.mxu1 %v8059_v30 }
 0x2fa   :  { %2046 = vmatmul.mubr.f32.vlgmr.msra.gmra.mrb[4].mxu0 %v1647_v36  ;;  %2117 = vmatmul.mubr.f32.vlgmr.msra.gmra.mrb[4].mxu1 %v1647_v36  ;;  %v10290_v36 = vld [vmem:[#allocation40_spill] sm:$0xff] }
 0x2fb   :  { %6251 = vmatpush1.bf16.msra.mxu0 %v8061_v35  ;;  %6283 = vmatpush1.bf16.msra.mxu1 %v8064_v38 }
 0x2fc   :  { %6253 = vmatprep.subr.bf16.mxu0 %v8067_v42  ;;  %6285 = vmatprep.subr.bf16.mxu1 %v8070_v47 }
 0x2fd   :  { %2231 = vmatprep.mubr.f32.mxu0 %v10172_v26  ;;  %2302 = vmatprep.mubr.f32.mxu1 %v10172_v26 }
 0x2ff   :  { %6255 = vmatpush1.bf16.msra.mxu0 %v8074_v50  ;;  %6287 = vmatpush1.bf16.msra.mxu1 %v8078_v54  ;;  %v10291_v54 = vld [vmem:[#allocation41_spill] sm:$0xff] }
 0x300   :  { %6257 = vmatprep.subr.bf16.mxu0 %v8082_v57  ;;  %6289 = vmatprep.subr.bf16.mxu1 %v8086_v60  ;;  %v10292_v57 = vld [vmem:[#allocation42_spill] sm:$0xff]  ;;  %v10293_v60 = vld [vmem:[#allocation43_spill] sm:$0xff]  ;;  %v10307_v50 = vld [vmem:[#allocation89_spill] sm:$0xff] }
 0x303   :  { %6259 = vmatpush1.bf16.msra.mxu0 %v8090_v1  ;;  %6291 = vmatpush1.bf16.msra.mxu1 %v8094_v4  ;;  %v10294_v1 = vld [vmem:[#allocation44_spill] sm:$0xff]  ;;  %v10295_v4 = vld [vmem:[#allocation45_spill] sm:$0xff] }
 0x304   :  { %6261 = vmatprep.subr.bf16.mxu0 %v8098_v7  ;;  %6293 = vmatprep.subr.bf16.mxu1 %v8102_v10  ;;  %v10296_v7 = vld [vmem:[#allocation46_spill] sm:$0xff]  ;;  %v10297_v10 = vld [vmem:[#allocation47_spill] sm:$0xff] }
 0x307   :  { %6263 = vmatpush1.bf16.msra.mxu0 %v8106_v14  ;;  %6295 = vmatpush1.bf16.msra.mxu1 %v8110_v17  ;;  %v10298_v14 = vld [vmem:[#allocation48_spill] sm:$0xff]  ;;  %v10299_v17 = vld [vmem:[#allocation49_spill] sm:$0xff] }
 0x308   :  { %6265 = vmatprep.subr.bf16.mxu0 %v8114_v20  ;;  %6297 = vmatprep.subr.bf16.mxu1 %v10290_v36  ;;  %v10300_v20 = vld [vmem:[#allocation50_spill] sm:$0xff]  ;;  %v10301_v36 = vld [vmem:[#allocation51_spill] sm:$0xff] }
 0x30b   :  { %6267 = vmatpush1.bf16.msra.mxu0 %v10291_v54  ;;  %6299 = vmatpush1.bf16.msra.mxu1 %v10292_v57  ;;  %v10302_v54 = vld [vmem:[#allocation52_spill] sm:$0xff]  ;;  %v10303_v57 = vld [vmem:[#allocation53_spill] sm:$0xff] }
 0x30c   :  { %6269 = vmatprep.subr.bf16.mxu0 %v10293_v60  ;;  %6301 = vmatprep.subr.bf16.mxu1 %v10294_v1  ;;  %v10304_v60 = vld [vmem:[#allocation54_spill] sm:$0xff]  ;;  %v10305_v1 = vld [vmem:[#allocation55_spill] sm:$0xff] }
 0x30f   :  { %6271 = vmatpush1.bf16.msra.mxu0 %v10295_v4  ;;  %6303 = vmatpush1.bf16.msra.mxu1 %v10296_v7  ;;  %v10306_v4 = vld [vmem:[#allocation56_spill] sm:$0xff] }
 0x310   :  { %6273 = vmatprep.subr.bf16.mxu0 %v10297_v10  ;;  %6305 = vmatprep.subr.bf16.mxu1 %v10298_v14 }
 0x313   :  { %6275 = vmatpush1.bf16.msra.mxu0 %v10299_v17  ;;  %6307 = vmatpush1.bf16.msra.mxu1 %v10300_v20 }
 0x314   :  { %6277 = vmatprep.subr.bf16.mxu0 %v10301_v36  ;;  %6309 = vmatprep.subr.bf16.mxu1 %v10302_v54  ;;  %v10308_v54 = vld [vmem:[#allocation90_spill] sm:$0xff] }
 0x317   :  { %6279 = vmatpush1.bf16.msra.mxu0 %v10303_v57  ;;  %6311 = vmatpush1.bf16.msra.mxu1 %v10304_v60  ;;  %v10309_v60 = vld [vmem:[#allocation122_spill] sm:$0xff] }
 0x318   :  { %6313 = vmatprep.subr.bf16.mxu0 %v10305_v1  ;;  %6345 = vmatprep.subr.bf16.mxu1 %v10306_v4 }
 0x3ad   :  { %v1872_v7 = vpop.f32.mrb[22].mxu0  ;;  %v1943_v10 = vpop.f32.mrb[22].mxu1 }
 0x3ae   :  { %v1948_v14 = vadd.f32 %v1872_v7, %v10307_v50  ;;  %v1874_v47 = vpop.f32.mrb[23].mxu0  ;;  %v1945_v17 = vpop.f32.mrb[23].mxu1  ;;  %v1950_v35 = vadd.f32 %v1943_v10, %v10309_v60  ;;  %v10310_v60 = vld [vmem:[#allocation119_spill] sm:$0xff] }
 0x3af   :  { %v1949_v20 = vadd.f32 %v1874_v47, %v8760_v5  ;;  %v1951_v57 = vadd.f32 %v1945_v17, %v10308_v54 }
 0x3b0   :  { %v5408_v42 = vmul.f32 -1.442695, %v1948_v14 }
 0x3b1   :  { %v5409_v36 = vmul.f32 -1.442695, %v1949_v20  ;;  %v5410_v38 = vmul.f32 -1.442695, %v1951_v57 }
 0x3b2   :  { %7588 = vpow2.f32 %v5408_v42 }
 0x3b3   :  { %7590 = vpow2.f32 %v5409_v36 }
 0x3b4   :  { %7592 = vpow2.f32 %v5410_v38 }
 0x3b5   :  { %7594 = vtanh.f32 %v1950_v35 }
 0x3bc   :  { %v7589_v1 = vpop.eup %7588 }
 0x3bd   :  { %v7591_v30 = vpop.eup %7590  ;;  %v1955_v4 = vadd.f32 1.0, %v7589_v1 }
 0x3be   :  { %v1961_v29 = vadd.f32 1.0, %v7591_v30  ;;  %v7593_v7 = vpop.eup %7592 }
 0x3bf   :  { %7596 = vrcp.f32 %v1955_v4  ;;  %v7595_v50 = vpop.eup %7594  ;;  %v1968_v42 = vadd.f32 1.0, %v7593_v7 }
 0x3c0   :  { %7598 = vrcp.f32 %v1961_v29 }
 0x3c1   :  { %7600 = vrcp.f32 %v1968_v42 }
 0x3c9   :  { %v7597_v47 = vpop.eup %7596 }
 0x3ca   :  { %v7599_v14 = vpop.eup %7598  ;;  %v1972_v20 = vmul.f32 %v7597_v47, %v7595_v50 }
 0x3cb   :  { %v1971_v36 = vmul.f32 %v7599_v14, %v8774_v46  ;;  %v7601_v46 = vpop.eup %7600 }
 0x3cd   :  { %v8896_v17 = vadd.f32 %v1972_v20, %v1971_v36  ;;  %v2047_v57 = vpop.f32.mrb[4].mxu0  ;;  %v2118_v10 = vpop.f32.mrb[4].mxu1 }
 0x3ce   :  { %v7436_v1 = vadd.f32 %v2047_v57, %v10310_v60  ;;  %v2049_v38 = vpop.f32.mrb[5].mxu0  ;;  %v2120_v35 = vpop.f32.mrb[5].mxu1  ;;  %v7452_v14 = vadd.f32 %v2118_v10, %v8677_v18  ;;  %v10315_v10 = vld [vmem:[#allocation61_spill] sm:$0xff] }
 0x3cf   :  { %7602 = vtanh.f32 %v8896_v17  ;;  %v7437_v29 = vadd.f32 %v2049_v38, %v10250_v23  ;;  %v7453_v50 = vadd.f32 %v2120_v35, %v10251_v49  ;;  %v10312_v38 = vld [vmem:[#allocation58_spill] sm:$0xff] }
 0x3d0   :  { %v5411_v30 = vmul.f32 -1.442695, %v7436_v1  ;;  %v10311_v1 = vld [vmem:[#allocation57_spill] sm:$0xff] }
 0x3d1   :  { %v5412_v4 = vmul.f32 -1.442695, %v7437_v29  ;;  %v5413_v47 = vmul.f32 -1.442695, %v7453_v50  ;;  %v10313_v29 = vld [vmem:[#allocation59_spill] sm:$0xff] }
 0x3d2   :  { %7604 = vpow2.f32 %v5411_v30  ;;  %v10314_v30 = vld [vmem:[#allocation60_spill] sm:$0xff]  ;;  %v10317_v50 = vld [vmem:[#allocation63_spill] sm:$0xff] }
 0x3d3   :  { %7606 = vpow2.f32 %v5412_v4  ;;  %v10316_v4 = vld [vmem:[#allocation62_spill] sm:$0xff] }
 0x3d4   :  { %7608 = vpow2.f32 %v5413_v47  ;;  %v10320_v47 = vld [vmem:[#allocation66_spill] sm:$0xff] }
 0x3d5   :  { %7610 = vtanh.f32 %v7452_v14  ;;  %v10321_v14 = vld [vmem:[#allocation67_spill] sm:$0xff] }
 0x3d9   :  { %v7603_v7 = vpop.eup %7602 }
 0x3da   :  { %v8903_v20 = vmul.f32 %v7603_v7, %v7601_v46  ;;  %v10318_v46 = vld [vmem:[#allocation64_spill] sm:$0xff]  ;;  %v10319_v7 = vld [vmem:[#allocation65_spill] sm:$0xff] }
 0x3dc   :  { %v7605_v42 = vpop.eup %7604  ;;  %2232 = vmatmul.mubr.f32.vlgmr.msra.gmra.mrb[24].mxu0 %v8903_v20  ;;  %2303 = vmatmul.mubr.f32.vlgmr.msra.gmra.mrb[24].mxu1 %v8903_v20 }
 0x3dd   :  { %v7607_v36 = vpop.eup %7606  ;;  %v2130_v57 = vadd.f32 1.0, %v7605_v42  ;;  %6315 = vmatpush1.bf16.msra.mxu0 %v10311_v1  ;;  %6347 = vmatpush1.bf16.msra.mxu1 %v10312_v38  ;;  %v10322_v42 = vld [vmem:[#allocation68_spill] sm:$0xff] }
 0x3de   :  { %v2136_v35 = vadd.f32 1.0, %v7607_v36  ;;  %6317 = vmatprep.subr.bf16.mxu0 %v10313_v29  ;;  %6349 = vmatprep.subr.bf16.mxu1 %v10314_v30  ;;  %v7609_v36 = vpop.eup %7608 }
 0x3df   :  { %7612 = vrcp.f32 %v2130_v57  ;;  %2373 = vmatprep.mubr.f32.mxu0 %v10172_v26  ;;  %2444 = vmatprep.mubr.f32.mxu1 %v10172_v26  ;;  %v7611_v57 = vpop.eup %7610 }
 0x3e0   :  { %7614 = vrcp.f32 %v2136_v35  ;;  %v10323_v35 = vld [vmem:[#allocation69_spill] sm:$0xff] }
 0x3e1   :  { %6319 = vmatpush1.bf16.msra.mxu0 %v10315_v10  ;;  %6351 = vmatpush1.bf16.msra.mxu1 %v10316_v4 }
 0x3e2   :  { %6321 = vmatprep.subr.bf16.mxu0 %v10317_v50  ;;  %6353 = vmatprep.subr.bf16.mxu1 %v10318_v46  ;;  %v2143_v50 = vadd.f32 1.0, %v7609_v36  ;;  %v10326_v46 = vld [vmem:[#allocation75_spill] sm:$0xff]  ;;  %v10329_v36 = vld [vmem:[#allocation78_spill] sm:$0xff] }
 0x3e4   :  { %7616 = vrcp.f32 %v2143_v50  ;;  %v10332_v50 = vld [vmem:[#allocation87_spill] sm:$0xff] }
 0x3e5   :  { %6323 = vmatpush1.bf16.msra.mxu0 %v10319_v7  ;;  %6355 = vmatpush1.bf16.msra.mxu1 %v10320_v47 }
 0x3e6   :  { %6325 = vmatprep.subr.bf16.mxu0 %v10321_v14  ;;  %6357 = vmatprep.subr.bf16.mxu1 %v10322_v42  ;;  %v10324_v14 = vld [vmem:[#allocation73_spill] sm:$0xff]  ;;  %v10325_v42 = vld [vmem:[#allocation74_spill] sm:$0xff] }
 0x3e9   :  { %v7613_v30 = vpop.eup %7612  ;;  %6327 = vmatpush1.bf16.msra.mxu0 %v10323_v35  ;;  %6359 = vmatpush1.bf16.msra.mxu1 %v10266_v9  ;;  %v10327_v35 = vld [vmem:[#allocation76_spill] sm:$0xff] }
 0x3ea   :  { %v7615_v4 = vpop.eup %7614  ;;  %v2147_v10 = vmul.f32 %v7613_v30, %v7611_v57  ;;  %6329 = vmatprep.subr.bf16.mxu0 %v10267_v13  ;;  %6361 = vmatprep.subr.bf16.mxu1 %v10268_v39  ;;  %v10328_v30 = vld [vmem:[#allocation77_spill] sm:$0xff]  ;;  %v10330_v57 = vld [vmem:[#allocation79_spill] sm:$0xff] }
 0x3eb   :  { %v2146_v47 = vmul.f32 %v7615_v4, %v8804_v31  ;;  %v10331_v4 = vld [vmem:[#allocation86_spill] sm:$0xff] }
 0x3ed   :  { %v8926_v7 = vadd.f32 %v2147_v10, %v2146_v47  ;;  %6331 = vmatpush1.bf16.msra.mxu0 %v10324_v14  ;;  %6363 = vmatpush1.bf16.msra.mxu1 %v10325_v42  ;;  %v10333_v47 = vld [vmem:[#allocation88_spill] sm:$0xff] }
 0x3ee   :  { %6333 = vmatprep.subr.bf16.mxu0 %v10326_v46  ;;  %6365 = vmatprep.subr.bf16.mxu1 %v10327_v35  ;;  %v7617_v31 = vpop.eup %7616 }
 0x3ef   :  { %7618 = vtanh.f32 %v8926_v7 }
 0x3f1   :  { %6335 = vmatpush1.bf16.msra.mxu0 %v10328_v30  ;;  %6367 = vmatpush1.bf16.msra.mxu1 %v10329_v36 }
 0x3f2   :  { %6337 = vmatprep.subr.bf16.mxu0 %v10330_v57  ;;  %6369 = vmatprep.subr.bf16.mxu1 %v10276_v55 }
 0x3f5   :  { %6339 = vmatpush1.bf16.msra.mxu0 %v10277_v53  ;;  %6371 = vmatpush1.bf16.msra.mxu1 %v10278_v40 }
 0x3f6   :  { %6341 = vmatprep.subr.bf16.mxu0 %v10279_v19  ;;  %6373 = vmatprep.subr.bf16.mxu1 %v10280_v45 }
 0x3f9   :  { %v7619_v10 = vpop.eup %7618  ;;  %6343 = vmatpush1.bf16.msra.mxu0 %v10281_v63  ;;  %6375 = vmatpush1.bf16.msra.mxu1 %v10331_v4 }
 0x3fa   :  { %6377 = vmatprep.subr.bf16.mxu0 %v10332_v50  ;;  %6409 = vmatprep.subr.bf16.mxu1 %v10333_v47  ;;  %v2150_v57 = vmul.f32 %v7619_v10, %v7617_v31  ;;  %v10334_v31 = vld [vmem:[#allocation23_spill] sm:$0xff]  ;;  %v10335_v10 = vld [vmem:[#allocation24_spill] sm:$0xff] }
 0x3fc   :  { %2374 = vmatmul.mubr.f32.vlgmr.msra.gmra.mrb[24].mxu0 %v2150_v57  ;;  %2445 = vmatmul.mubr.f32.vlgmr.msra.gmra.mrb[24].mxu1 %v2150_v57 }
 0x3fd   :  { %6379 = vmatpush1.bf16.msra.mxu0 %v10222_v48  ;;  %6411 = vmatpush1.bf16.msra.mxu1 %v10223_v6 }
 0x3fe   :  { %6381 = vmatprep.subr.bf16.mxu0 %v10224_v51  ;;  %6413 = vmatprep.subr.bf16.mxu1 %v10225_v16 }
 0x3ff   :  { %2548 = vmatprep.mubr.f32.mxu0 %v10172_v26  ;;  %2619 = vmatprep.mubr.f32.mxu1 %v10172_v26 }
 0x401   :  { %6383 = vmatpush1.bf16.msra.mxu0 %v10285_v61  ;;  %6415 = vmatpush1.bf16.msra.mxu1 %v10286_v32 }
 0x402   :  { %6385 = vmatprep.subr.bf16.mxu0 %v10287_v27  ;;  %6417 = vmatprep.subr.bf16.mxu1 %v10288_v58 }
 0x405   :  { %6387 = vmatpush1.bf16.msra.mxu0 %v10289_v24  ;;  %6419 = vmatpush1.bf16.msra.mxu1 %v10231_v12 }
 0x406   :  { %6389 = vmatprep.subr.bf16.mxu0 %v10232_v11  ;;  %6421 = vmatprep.subr.bf16.mxu1 %v10233_v62 }
 0x409   :  { %6391 = vmatpush1.bf16.msra.mxu0 %v10234_v56  ;;  %6423 = vmatpush1.bf16.msra.mxu1 %v10235_v22 }
 0x40a   :  { %6393 = vmatprep.subr.bf16.mxu0 %v10236_v33  ;;  %6425 = vmatprep.subr.bf16.mxu1 %v10237_v44 }
 0x40d   :  { %6395 = vmatpush1.bf16.msra.mxu0 %v10238_v8  ;;  %6427 = vmatpush1.bf16.msra.mxu1 %v10239_v0 }
 0x40e   :  { %6397 = vmatprep.subr.bf16.mxu0 %v10240_v25  ;;  %6429 = vmatprep.subr.bf16.mxu1 %v10241_v43 }
 0x411   :  { %6399 = vmatpush1.bf16.msra.mxu0 %v8508_v2  ;;  %6431 = vmatpush1.bf16.msra.mxu1 %v8512_v15  ;;  %v10368_v15 = vld [vmem:[#allocation89_spill] sm:$0xff] }
 0x412   :  { %6401 = vmatprep.subr.bf16.mxu0 %v8514_v41  ;;  %6433 = vmatprep.subr.bf16.mxu1 %v8526_v28  ;;  %v10336_v41 = vld [vmem:[#allocation25_spill] sm:$0xff]  ;;  %v10337_v28 = vld [vmem:[#allocation26_spill] sm:$0xff] }
 0x415   :  { %6403 = vmatpush1.bf16.msra.mxu0 %v8544_v3  ;;  %6435 = vmatpush1.bf16.msra.mxu1 %v8548_v34  ;;  %v10338_v3 = vld [vmem:[#allocation27_spill] sm:$0xff]  ;;  %v10339_v34 = vld [vmem:[#allocation28_spill] sm:$0xff] }
 0x416   :  { %6405 = vmatprep.subr.bf16.mxu0 %v8550_v52  ;;  %6437 = vmatprep.subr.bf16.mxu1 %v8559_v37  ;;  %v10349_v37 = vld [vmem:[#allocation38_spill] sm:$0xff]  ;;  %v10350_v52 = vld [vmem:[#allocation39_spill] sm:$0xff] }
 0x419   :  { %6407 = vmatpush1.bf16.msra.mxu0 %v8568_v59  ;;  %6439 = vmatpush1.bf16.msra.mxu1 %v8572_v21  ;;  %v10340_v59 = vld [vmem:[#allocation29_spill] sm:$0xff]  ;;  %v10341_v21 = vld [vmem:[#allocation30_spill] sm:$0xff] }
 0x41a   :  { %6441 = vmatprep.subr.bf16.mxu0 %v10334_v31  ;;  %6473 = vmatprep.subr.bf16.mxu1 %v10335_v10  ;;  %v10342_v31 = vld [vmem:[#allocation31_spill] sm:$0xff]  ;;  %v10343_v10 = vld [vmem:[#allocation32_spill] sm:$0xff] }
 0x41c   :  { %2549 = vmatmul.mubr.f32.vlgmr.msra.gmra.mrb[6].mxu0 %v2150_v57  ;;  %2620 = vmatmul.mubr.f32.vlgmr.msra.gmra.mrb[6].mxu1 %v2150_v57  ;;  %v10344_v57 = vld [vmem:[#allocation33_spill] sm:$0xff] }
 0x41d   :  { %6443 = vmatpush1.bf16.msra.mxu0 %v10336_v41  ;;  %6475 = vmatpush1.bf16.msra.mxu1 %v10337_v28  ;;  %v10345_v41 = vld [vmem:[#allocation34_spill] sm:$0xff]  ;;  %v10346_v28 = vld [vmem:[#allocation35_spill] sm:$0xff] }
 0x41e   :  { %6445 = vmatprep.subr.bf16.mxu0 %v10338_v3  ;;  %6477 = vmatprep.subr.bf16.mxu1 %v10339_v34  ;;  %v10347_v3 = vld [vmem:[#allocation36_spill] sm:$0xff]  ;;  %v10348_v34 = vld [vmem:[#allocation37_spill] sm:$0xff] }
 0x41f   :  { %2734 = vmatprep.mubr.f32.mxu0 %v10172_v26  ;;  %2805 = vmatprep.mubr.f32.mxu1 %v10172_v26 }
 0x421   :  { %6447 = vmatpush1.bf16.msra.mxu0 %v10340_v59  ;;  %6479 = vmatpush1.bf16.msra.mxu1 %v10341_v21  ;;  %v10351_v59 = vld [vmem:[#allocation40_spill] sm:$0xff]  ;;  %v10352_v21 = vld [vmem:[#allocation41_spill] sm:$0xff] }
 0x422   :  { %6449 = vmatprep.subr.bf16.mxu0 %v10342_v31  ;;  %6481 = vmatprep.subr.bf16.mxu1 %v10343_v10  ;;  %v10353_v31 = vld [vmem:[#allocation42_spill] sm:$0xff]  ;;  %v10354_v10 = vld [vmem:[#allocation43_spill] sm:$0xff] }
 0x425   :  { %6451 = vmatpush1.bf16.msra.mxu0 %v10344_v57  ;;  %6483 = vmatpush1.bf16.msra.mxu1 %v10345_v41  ;;  %v10355_v57 = vld [vmem:[#allocation44_spill] sm:$0xff]  ;;  %v10356_v41 = vld [vmem:[#allocation45_spill] sm:$0xff] }
 0x426   :  { %6453 = vmatprep.subr.bf16.mxu0 %v10346_v28  ;;  %6485 = vmatprep.subr.bf16.mxu1 %v10347_v3  ;;  %v10357_v28 = vld [vmem:[#allocation46_spill] sm:$0xff]  ;;  %v10358_v3 = vld [vmem:[#allocation47_spill] sm:$0xff] }
 0x429   :  { %6455 = vmatpush1.bf16.msra.mxu0 %v10348_v34  ;;  %6487 = vmatpush1.bf16.msra.mxu1 %v10349_v37  ;;  %v10359_v34 = vld [vmem:[#allocation48_spill] sm:$0xff]  ;;  %v10360_v37 = vld [vmem:[#allocation49_spill] sm:$0xff] }
 0x42a   :  { %6457 = vmatprep.subr.bf16.mxu0 %v10350_v52  ;;  %6489 = vmatprep.subr.bf16.mxu1 %v10351_v59  ;;  %v10361_v52 = vld [vmem:[#allocation50_spill] sm:$0xff]  ;;  %v10362_v59 = vld [vmem:[#allocation51_spill] sm:$0xff] }
 0x42d   :  { %6459 = vmatpush1.bf16.msra.mxu0 %v10352_v21  ;;  %6491 = vmatpush1.bf16.msra.mxu1 %v10353_v31  ;;  %v10363_v21 = vld [vmem:[#allocation52_spill] sm:$0xff]  ;;  %v10364_v31 = vld [vmem:[#allocation53_spill] sm:$0xff] }
 0x42e   :  { %6461 = vmatprep.subr.bf16.mxu0 %v10354_v10  ;;  %6493 = vmatprep.subr.bf16.mxu1 %v10355_v57  ;;  %v10365_v10 = vld [vmem:[#allocation54_spill] sm:$0xff]  ;;  %v10366_v57 = vld [vmem:[#allocation55_spill] sm:$0xff] }
 0x431   :  { %6463 = vmatpush1.bf16.msra.mxu0 %v10356_v41  ;;  %6495 = vmatpush1.bf16.msra.mxu1 %v10357_v28  ;;  %v10367_v41 = vld [vmem:[#allocation56_spill] sm:$0xff] }
 0x432   :  { %6465 = vmatprep.subr.bf16.mxu0 %v10358_v3  ;;  %6497 = vmatprep.subr.bf16.mxu1 %v10359_v34 }
 0x435   :  { %6467 = vmatpush1.bf16.msra.mxu0 %v10360_v37  ;;  %6499 = vmatpush1.bf16.msra.mxu1 %v10361_v52 }
 0x436   :  { %6469 = vmatprep.subr.bf16.mxu0 %v10362_v59  ;;  %6501 = vmatprep.subr.bf16.mxu1 %v10363_v21 }
 0x439   :  { %6471 = vmatpush1.bf16.msra.mxu0 %v10364_v31  ;;  %6503 = vmatpush1.bf16.msra.mxu1 %v10365_v10  ;;  %v10369_v10 = vld [vmem:[#allocation122_spill] sm:$0xff] }
 0x43a   :  { %6505 = vmatprep.subr.bf16.mxu0 %v10366_v57  ;;  %6537 = vmatprep.subr.bf16.mxu1 %v10367_v41 }
 0x4cf   :  { %v2375_v28 = vpop.f32.mrb[24].mxu0  ;;  %v2446_v3 = vpop.f32.mrb[24].mxu1 }
 0x4d0   :  { %v2451_v34 = vadd.f32 %v2375_v28, %v10368_v15  ;;  %v2377_v2 = vpop.f32.mrb[25].mxu0  ;;  %v2448_v37 = vpop.f32.mrb[25].mxu1  ;;  %v2453_v25 = vadd.f32 %v2446_v3, %v10369_v10 }
 0x4d1   :  { %v2452_v52 = vadd.f32 %v2377_v2, %v8760_v5  ;;  %v2454_v31 = vadd.f32 %v2448_v37, %v10308_v54 }
 0x4d2   :  { %v5414_v43 = vmul.f32 -1.442695, %v2451_v34 }
 0x4d3   :  { %v5415_v59 = vmul.f32 -1.442695, %v2452_v52  ;;  %v5416_v21 = vmul.f32 -1.442695, %v2454_v31 }
 0x4d4   :  { %7620 = vpow2.f32 %v5414_v43 }
 0x4d5   :  { %7622 = vpow2.f32 %v5415_v59 }
 0x4d6   :  { %7624 = vpow2.f32 %v5416_v21 }
 0x4d7   :  { %7626 = vtanh.f32 %v2453_v25 }
 0x4de   :  { %v7621_v57 = vpop.eup %7620 }
 0x4df   :  { %v7623_v0 = vpop.eup %7622  ;;  %v2458_v41 = vadd.f32 1.0, %v7621_v57 }
 0x4e0   :  { %v2464_v8 = vadd.f32 1.0, %v7623_v0  ;;  %v7625_v28 = vpop.eup %7624 }
 0x4e1   :  { %7628 = vrcp.f32 %v2458_v41  ;;  %v7627_v15 = vpop.eup %7626  ;;  %v2471_v43 = vadd.f32 1.0, %v7625_v28 }
 0x4e2   :  { %7630 = vrcp.f32 %v2464_v8 }
 0x4e3   :  { %7632 = vrcp.f32 %v2471_v43 }
 0x4eb   :  { %v7629_v2 = vpop.eup %7628 }
 0x4ec   :  { %v7631_v34 = vpop.eup %7630  ;;  %v2475_v52 = vmul.f32 %v7629_v2, %v7627_v15 }
 0x4ed   :  { %v2474_v59 = vmul.f32 %v7631_v34, %v8896_v17  ;;  %v7633_v17 = vpop.eup %7632  ;;  %v10370_v34 = vld [vmem:[#allocation120_spill] sm:$0xff] }
 0x4ef   :  { %v9018_v37 = vadd.f32 %v2475_v52, %v2474_v59  ;;  %v2550_v31 = vpop.f32.mrb[6].mxu0  ;;  %v2621_v3 = vpop.f32.mrb[6].mxu1  ;;  %v2160_v52 = vadd.f32 %v8903_v20, %v10370_v34 }
 0x4f0   :  { %v7438_v57 = vadd.f32 %v2550_v31, %v10310_v60  ;;  %v2552_v21 = vpop.f32.mrb[7].mxu0  ;;  %v2623_v25 = vpop.f32.mrb[7].mxu1  ;;  %v7454_v43 = vadd.f32 %v2621_v3, %v8677_v18  ;;  %v2164_v31 = vmin.f32 %v10370_v34, %v8903_v20 }
 0x4f1   :  { %7634 = vtanh.f32 %v9018_v37  ;;  %v7439_v41 = vadd.f32 %v2552_v21, %v10250_v23  ;;  %v7455_v15 = vadd.f32 %v2623_v25, %v10251_v49 }
 0x4f2   :  { %v5417_v8 = vmul.f32 -1.442695, %v7438_v57  ;;  %v2162_v57 = vmax.f32 %v10370_v34, %v8903_v20  ;;  %v10371_v20 = vld [vmem:[#allocation60_spill] sm:$0xff] }
 0x4f3   :  { %v5418_v0 = vmul.f32 -1.442695, %v7439_v41  ;;  %v5419_v2 = vmul.f32 -1.442695, %v7455_v15  ;;  %v10375_v34 = vld [vmem:[#allocation64_spill] sm:$0xff] }
 0x4f4   :  { %7636 = vpow2.f32 %v5417_v8 }
 0x4f5   :  { %7638 = vpow2.f32 %v5418_v0 }
 0x4f6   :  { %7640 = vpow2.f32 %v5419_v2  ;;  %v10374_v2 = vld [vmem:[#allocation63_spill] sm:$0xff] }
 0x4f7   :  { %7642 = vtanh.f32 %v7454_v43  ;;  %v10377_v43 = vld [vmem:[#allocation66_spill] sm:$0xff] }
 0x4fb   :  { %v7635_v28 = vpop.eup %7634 }
 0x4fc   :  { %v2478_v59 = vmul.f32 %v7635_v28, %v7633_v17  ;;  %v10372_v17 = vld [vmem:[#allocation61_spill] sm:$0xff]  ;;  %v10373_v28 = vld [vmem:[#allocation62_spill] sm:$0xff] }
 0x4fe   :  { %v7637_v21 = vpop.eup %7636  ;;  %2735 = vmatmul.mubr.f32.vlgmr.msra.gmra.mrb[26].mxu0 %v2478_v59  ;;  %2806 = vmatmul.mubr.f32.vlgmr.msra.gmra.mrb[26].mxu1 %v2478_v59  ;;  %v9031_v41 = vadd.f32 %v2478_v59, %v2160_v52  ;;  %v9033_v25 = vmin.f32 %v2164_v31, %v2478_v59  ;;  %v9035_v8 = vmax.f32 %v2162_v57, %v2478_v59  ;;  %v10376_v52 = vld [vmem:[#allocation65_spill] sm:$0xff]  ;;  %v10378_v59 = vld [vmem:[#allocation67_spill] sm:$0xff]  ;;  %v10379_v31 = vld [vmem:[#allocation68_spill] sm:$0xff] }
 0x4ff   :  { %v7639_v0 = vpop.eup %7638  ;;  %v2633_v15 = vadd.f32 1.0, %v7637_v21  ;;  %6507 = vmatpush1.bf16.msra.mxu0 %v10311_v1  ;;  %6539 = vmatpush1.bf16.msra.mxu1 %v10312_v38 }
 0x500   :  { %v2639_v3 = vadd.f32 1.0, %v7639_v0  ;;  %6509 = vmatprep.subr.bf16.mxu0 %v10313_v29  ;;  %6541 = vmatprep.subr.bf16.mxu1 %v10371_v20  ;;  %v7641_v57 = vpop.eup %7640 }
 0x501   :  { %7644 = vrcp.f32 %v2633_v15  ;;  %2876 = vmatprep.mubr.f32.mxu0 %v10172_v26  ;;  %2947 = vmatprep.mubr.f32.mxu1 %v10172_v26  ;;  %v7643_v21 = vpop.eup %7642  ;;  %v10380_v15 = vld [vmem:[#allocation69_spill] sm:$0xff] }
 0x502   :  { %7646 = vrcp.f32 %v2639_v3 }
 0x503   :  { %6511 = vmatpush1.bf16.msra.mxu0 %v10372_v17  ;;  %6543 = vmatpush1.bf16.msra.mxu1 %v10373_v28 }
 0x504   :  { %6513 = vmatprep.subr.bf16.mxu0 %v10374_v2  ;;  %6545 = vmatprep.subr.bf16.mxu1 %v10375_v34  ;;  %v2646_v2 = vadd.f32 1.0, %v7641_v57  ;;  %v10381_v57 = vld [vmem:[#allocation79_spill] sm:$0xff] }
 0x506   :  { %7648 = vrcp.f32 %v2646_v2 }
 0x507   :  { %6515 = vmatpush1.bf16.msra.mxu0 %v10376_v52  ;;  %6547 = vmatpush1.bf16.msra.mxu1 %v10377_v43 }
 0x508   :  { %6517 = vmatprep.subr.bf16.mxu0 %v10378_v59  ;;  %6549 = vmatprep.subr.bf16.mxu1 %v10379_v31 }
 0x50b   :  { %v7645_v0 = vpop.eup %7644  ;;  %6519 = vmatpush1.bf16.msra.mxu0 %v10380_v15  ;;  %6551 = vmatpush1.bf16.msra.mxu1 %v10266_v9 }
 0x50c   :  { %v7647_v3 = vpop.eup %7646  ;;  %v2650_v28 = vmul.f32 %v7645_v0, %v7643_v21  ;;  %6521 = vmatprep.subr.bf16.mxu0 %v10267_v13  ;;  %6553 = vmatprep.subr.bf16.mxu1 %v10268_v39  ;;  %v10383_v21 = vld [vmem:[#allocation106_spill] sm:$0xff]  ;;  %v10384_v0 = vld [vmem:[#allocation107_spill] sm:$0xff] }
 0x50d   :  { %v2649_v43 = vmul.f32 %v7647_v3, %v8926_v7  ;;  %v10385_v3 = vld [vmem:[#allocation108_spill] sm:$0xff] }
 0x50f   :  { %v9056_v52 = vadd.f32 %v2650_v28, %v2649_v43  ;;  %6523 = vmatpush1.bf16.msra.mxu0 %v10324_v14  ;;  %6555 = vmatpush1.bf16.msra.mxu1 %v10325_v42  ;;  %v10382_v43 = vld [vmem:[#allocation105_spill] sm:$0xff] }
 0x510   :  { %6525 = vmatprep.subr.bf16.mxu0 %v10326_v46  ;;  %6557 = vmatprep.subr.bf16.mxu1 %v10327_v35  ;;  %v7649_v7 = vpop.eup %7648 }
 0x511   :  { %7650 = vtanh.f32 %v9056_v52 }
 0x513   :  { %6527 = vmatpush1.bf16.msra.mxu0 %v10328_v30  ;;  %6559 = vmatpush1.bf16.msra.mxu1 %v10329_v36 }
 0x514   :  { %6529 = vmatprep.subr.bf16.mxu0 %v10381_v57  ;;  %6561 = vmatprep.subr.bf16.mxu1 %v10276_v55 }
 0x517   :  { %6531 = vmatpush1.bf16.msra.mxu0 %v10277_v53  ;;  %6563 = vmatpush1.bf16.msra.mxu1 %v10278_v40 }
 0x518   :  { %6533 = vmatprep.subr.bf16.mxu0 %v10279_v19  ;;  %6565 = vmatprep.subr.bf16.mxu1 %v10280_v45 }
 0x51b   :  { %v7651_v28 = vpop.eup %7650  ;;  %6535 = vmatpush1.bf16.msra.mxu0 %v10281_v63  ;;  %6567 = vmatpush1.bf16.msra.mxu1 %v10331_v4 }
 0x51c   :  { %v2653_v2 = vmul.f32 %v7651_v28, %v7649_v7  ;;  %6569 = vmatprep.subr.bf16.mxu0 %v10332_v50  ;;  %6601 = vmatprep.subr.bf16.mxu1 %v10333_v47  ;;  %v10386_v7 = vld [vmem:[#allocation109_spill] sm:$0xff]  ;;  %v10387_v28 = vld [vmem:[#allocation110_spill] sm:$0xff] }
 0x51e   :  { %2877 = vmatmul.mubr.f32.vlgmr.msra.gmra.mrb[26].mxu0 %v2653_v2  ;;  %2948 = vmatmul.mubr.f32.vlgmr.msra.gmra.mrb[26].mxu1 %v2653_v2 }
 0x51f   :  { %6571 = vmatpush1.bf16.msra.mxu0 %v10222_v48  ;;  %6603 = vmatpush1.bf16.msra.mxu1 %v10223_v6 }
 0x520   :  { %6573 = vmatprep.subr.bf16.mxu0 %v10224_v51  ;;  %6605 = vmatprep.subr.bf16.mxu1 %v10225_v16 }
 0x521   :  { %3051 = vmatprep.mubr.f32.mxu0 %v10172_v26  ;;  %3122 = vmatprep.mubr.f32.mxu1 %v10172_v26 }
 0x523   :  { %6575 = vmatpush1.bf16.msra.mxu0 %v10285_v61  ;;  %6607 = vmatpush1.bf16.msra.mxu1 %v10286_v32 }
 0x524   :  { %6577 = vmatprep.subr.bf16.mxu0 %v10287_v27  ;;  %6609 = vmatprep.subr.bf16.mxu1 %v10288_v58 }
 0x527   :  { %6579 = vmatpush1.bf16.msra.mxu0 %v10289_v24  ;;  %6611 = vmatpush1.bf16.msra.mxu1 %v10231_v12 }
 0x528   :  { %6581 = vmatprep.subr.bf16.mxu0 %v10232_v11  ;;  %6613 = vmatprep.subr.bf16.mxu1 %v10233_v62  ;;  %v10388_v62 = vld [vmem:[#allocation111_spill] sm:$0xff] }
 0x52b   :  { %6583 = vmatpush1.bf16.msra.mxu0 %v10234_v56  ;;  %6615 = vmatpush1.bf16.msra.mxu1 %v10235_v22  ;;  %v10389_v56 = vld [vmem:[#allocation112_spill] sm:$0xff]  ;;  %v10390_v22 = vld [vmem:[#allocation113_spill] sm:$0xff] }
 0x52c   :  { %6585 = vmatprep.subr.bf16.mxu0 %v10236_v33  ;;  %6617 = vmatprep.subr.bf16.mxu1 %v10237_v44  ;;  %v10391_v33 = vld [vmem:[#allocation114_spill] sm:$0xff]  ;;  %v10392_v44 = vld [vmem:[#allocation115_spill] sm:$0xff] }
 0x52f   :  { %6587 = vmatpush1.bf16.msra.mxu0 %v10382_v43  ;;  %6619 = vmatpush1.bf16.msra.mxu1 %v10383_v21  ;;  %v10393_v43 = vld [vmem:[#allocation116_spill] sm:$0xff]  ;;  %v10394_v21 = vld [vmem:[#allocation117_spill] sm:$0xff] }
 0x530   :  { %6589 = vmatprep.subr.bf16.mxu0 %v10384_v0  ;;  %6621 = vmatprep.subr.bf16.mxu1 %v10385_v3  ;;  %v10395_v0 = vld [vmem:[#allocation118_spill] sm:$0xff]  ;;  %v10396_v3 = vld [vmem:[#allocation23_spill] sm:$0xff] }
 0x533   :  { %6591 = vmatpush1.bf16.msra.mxu0 %v10386_v7  ;;  %6623 = vmatpush1.bf16.msra.mxu1 %v10387_v28  ;;  %v10397_v7 = vld [vmem:[#allocation24_spill] sm:$0xff]  ;;  %v10430_v28 = vld [vmem:[#allocation89_spill] sm:$0xff] }
 0x534   :  { %6593 = vmatprep.subr.bf16.mxu0 %v10388_v62  ;;  %6625 = vmatprep.subr.bf16.mxu1 %v10389_v56  ;;  %v10398_v62 = vld [vmem:[#allocation25_spill] sm:$0xff]  ;;  %v10399_v56 = vld [vmem:[#allocation26_spill] sm:$0xff] }
 0x537   :  { %6595 = vmatpush1.bf16.msra.mxu0 %v10390_v22  ;;  %6627 = vmatpush1.bf16.msra.mxu1 %v10391_v33  ;;  %v10400_v22 = vld [vmem:[#allocation27_spill] sm:$0xff]  ;;  %v10401_v33 = vld [vmem:[#allocation28_spill] sm:$0xff] }
 0x538   :  { %6597 = vmatprep.subr.bf16.mxu0 %v10392_v44  ;;  %6629 = vmatprep.subr.bf16.mxu1 %v10393_v43  ;;  %v10411_v43 = vld [vmem:[#allocation38_spill] sm:$0xff]  ;;  %v10412_v44 = vld [vmem:[#allocation39_spill] sm:$0xff] }
 0x53b   :  { %6599 = vmatpush1.bf16.msra.mxu0 %v10394_v21  ;;  %6631 = vmatpush1.bf16.msra.mxu1 %v10395_v0  ;;  %v10402_v21 = vld [vmem:[#allocation29_spill] sm:$0xff]  ;;  %v10403_v0 = vld [vmem:[#allocation30_spill] sm:$0xff] }
 0x53c   :  { %6633 = vmatprep.subr.bf16.mxu0 %v10396_v3  ;;  %6665 = vmatprep.subr.bf16.mxu1 %v10397_v7  ;;  %v10404_v3 = vld [vmem:[#allocation31_spill] sm:$0xff]  ;;  %v10405_v7 = vld [vmem:[#allocation32_spill] sm:$0xff] }
 0x53e   :  { %3052 = vmatmul.mubr.f32.vlgmr.msra.gmra.mrb[8].mxu0 %v2653_v2  ;;  %3123 = vmatmul.mubr.f32.vlgmr.msra.gmra.mrb[8].mxu1 %v2653_v2  ;;  %v10406_v2 = vld [vmem:[#allocation33_spill] sm:$0xff] }
 0x53f   :  { %6635 = vmatpush1.bf16.msra.mxu0 %v10398_v62  ;;  %6667 = vmatpush1.bf16.msra.mxu1 %v10399_v56  ;;  %v10407_v62 = vld [vmem:[#allocation34_spill] sm:$0xff]  ;;  %v10408_v56 = vld [vmem:[#allocation35_spill] sm:$0xff] }
 0x540   :  { %6637 = vmatprep.subr.bf16.mxu0 %v10400_v22  ;;  %6669 = vmatprep.subr.bf16.mxu1 %v10401_v33  ;;  %v10409_v22 = vld [vmem:[#allocation36_spill] sm:$0xff]  ;;  %v10410_v33 = vld [vmem:[#allocation37_spill] sm:$0xff] }
 0x541   :  { %3237 = vmatprep.mubr.f32.mxu0 %v10172_v26  ;;  %3308 = vmatprep.mubr.f32.mxu1 %v10172_v26 }
 0x543   :  { %6639 = vmatpush1.bf16.msra.mxu0 %v10402_v21  ;;  %6671 = vmatpush1.bf16.msra.mxu1 %v10403_v0  ;;  %v10413_v21 = vld [vmem:[#allocation40_spill] sm:$0xff]  ;;  %v10414_v0 = vld [vmem:[#allocation41_spill] sm:$0xff] }
 0x544   :  { %6641 = vmatprep.subr.bf16.mxu0 %v10404_v3  ;;  %6673 = vmatprep.subr.bf16.mxu1 %v10405_v7  ;;  %v10415_v3 = vld [vmem:[#allocation42_spill] sm:$0xff]  ;;  %v10416_v7 = vld [vmem:[#allocation43_spill] sm:$0xff] }
 0x547   :  { %6643 = vmatpush1.bf16.msra.mxu0 %v10406_v2  ;;  %6675 = vmatpush1.bf16.msra.mxu1 %v10407_v62  ;;  %v10417_v2 = vld [vmem:[#allocation44_spill] sm:$0xff]  ;;  %v10418_v62 = vld [vmem:[#allocation45_spill] sm:$0xff] }
 0x548   :  { %6645 = vmatprep.subr.bf16.mxu0 %v10408_v56  ;;  %6677 = vmatprep.subr.bf16.mxu1 %v10409_v22  ;;  %v10419_v56 = vld [vmem:[#allocation46_spill] sm:$0xff]  ;;  %v10420_v22 = vld [vmem:[#allocation47_spill] sm:$0xff] }
 0x54b   :  { %6647 = vmatpush1.bf16.msra.mxu0 %v10410_v33  ;;  %6679 = vmatpush1.bf16.msra.mxu1 %v10411_v43  ;;  %v10421_v33 = vld [vmem:[#allocation48_spill] sm:$0xff]  ;;  %v10422_v43 = vld [vmem:[#allocation49_spill] sm:$0xff] }
 0x54c   :  { %6649 = vmatprep.subr.bf16.mxu0 %v10412_v44  ;;  %6681 = vmatprep.subr.bf16.mxu1 %v10413_v21  ;;  %v10423_v44 = vld [vmem:[#allocation50_spill] sm:$0xff]  ;;  %v10424_v21 = vld [vmem:[#allocation51_spill] sm:$0xff] }
 0x54f   :  { %6651 = vmatpush1.bf16.msra.mxu0 %v10414_v0  ;;  %6683 = vmatpush1.bf16.msra.mxu1 %v10415_v3  ;;  %v10425_v0 = vld [vmem:[#allocation52_spill] sm:$0xff]  ;;  %v10426_v3 = vld [vmem:[#allocation53_spill] sm:$0xff] }
 0x550   :  { %6653 = vmatprep.subr.bf16.mxu0 %v10416_v7  ;;  %6685 = vmatprep.subr.bf16.mxu1 %v10417_v2  ;;  %v10427_v7 = vld [vmem:[#allocation54_spill] sm:$0xff]  ;;  %v10428_v2 = vld [vmem:[#allocation55_spill] sm:$0xff] }
 0x553   :  { %6655 = vmatpush1.bf16.msra.mxu0 %v10418_v62  ;;  %6687 = vmatpush1.bf16.msra.mxu1 %v10419_v56  ;;  %v10429_v62 = vld [vmem:[#allocation56_spill] sm:$0xff] }
 0x554   :  { %6657 = vmatprep.subr.bf16.mxu0 %v10420_v22  ;;  %6689 = vmatprep.subr.bf16.mxu1 %v10421_v33 }
 0x557   :  { %6659 = vmatpush1.bf16.msra.mxu0 %v10422_v43  ;;  %6691 = vmatpush1.bf16.msra.mxu1 %v10423_v44 }
 0x558   :  { %6661 = vmatprep.subr.bf16.mxu0 %v10424_v21  ;;  %6693 = vmatprep.subr.bf16.mxu1 %v10425_v0 }
 0x55b   :  { %6663 = vmatpush1.bf16.msra.mxu0 %v10426_v3  ;;  %6695 = vmatpush1.bf16.msra.mxu1 %v10427_v7 }
 0x55c   :  { %6697 = vmatprep.subr.bf16.mxu0 %v10428_v2  ;;  %6729 = vmatprep.subr.bf16.mxu1 %v10429_v62 }
 0x5f1   :  { %v2878_v56 = vpop.f32.mrb[26].mxu0  ;;  %v2949_v22 = vpop.f32.mrb[26].mxu1 }
 0x5f2   :  { %v2954_v33 = vadd.f32 %v2878_v56, %v10430_v28  ;;  %v2880_v11 = vpop.f32.mrb[27].mxu0  ;;  %v2951_v43 = vpop.f32.mrb[27].mxu1  ;;  %v2956_v7 = vadd.f32 %v2949_v22, %v10369_v10 }
 0x5f3   :  { %v2955_v44 = vadd.f32 %v2880_v11, %v8760_v5  ;;  %v2957_v3 = vadd.f32 %v2951_v43, %v10308_v54 }
 0x5f4   :  { %v5420_v12 = vmul.f32 -1.442695, %v2954_v33 }
 0x5f5   :  { %v5421_v21 = vmul.f32 -1.442695, %v2955_v44  ;;  %v5422_v0 = vmul.f32 -1.442695, %v2957_v3 }
 0x5f6   :  { %7652 = vpow2.f32 %v5420_v12 }
 0x5f7   :  { %7654 = vpow2.f32 %v5421_v21 }
 0x5f8   :  { %7656 = vpow2.f32 %v5422_v0 }
 0x5f9   :  { %7658 = vtanh.f32 %v2956_v7 }
 0x600   :  { %v7653_v2 = vpop.eup %7652 }
 0x601   :  { %v7655_v24 = vpop.eup %7654  ;;  %v2961_v62 = vadd.f32 1.0, %v7653_v2 }
 0x602   :  { %v2967_v58 = vadd.f32 1.0, %v7655_v24  ;;  %v7657_v56 = vpop.eup %7656 }
 0x603   :  { %7660 = vrcp.f32 %v2961_v62  ;;  %v7659_v28 = vpop.eup %7658  ;;  %v2974_v12 = vadd.f32 1.0, %v7657_v56 }
 0x604   :  { %7662 = vrcp.f32 %v2967_v58 }
 0x605   :  { %7664 = vrcp.f32 %v2974_v12 }
 0x60d   :  { %v7661_v11 = vpop.eup %7660 }
 0x60e   :  { %v7663_v33 = vpop.eup %7662  ;;  %v2978_v44 = vmul.f32 %v7661_v11, %v7659_v28 }
 0x60f   :  { %v2977_v21 = vmul.f32 %v7663_v33, %v9018_v37  ;;  %v7665_v37 = vpop.eup %7664 }
 0x611   :  { %v9148_v43 = vadd.f32 %v2978_v44, %v2977_v21  ;;  %v3053_v3 = vpop.f32.mrb[8].mxu0  ;;  %v3124_v22 = vpop.f32.mrb[8].mxu1 }
 0x612   :  { %v7440_v2 = vadd.f32 %v3053_v3, %v10310_v60  ;;  %v3055_v0 = vpop.f32.mrb[9].mxu0  ;;  %v3126_v7 = vpop.f32.mrb[9].mxu1  ;;  %v7456_v33 = vadd.f32 %v3124_v22, %v8677_v18  ;;  %v10444_v3 = vld [vmem:[#allocation105_spill] sm:$0xff] }
 0x613   :  { %7666 = vtanh.f32 %v9148_v43  ;;  %v7441_v62 = vadd.f32 %v3055_v0, %v10250_v23  ;;  %v7457_v28 = vadd.f32 %v3126_v7, %v10251_v49 }
 0x614   :  { %v5423_v24 = vmul.f32 -1.442695, %v7440_v2  ;;  %v10443_v2 = vld [vmem:[#allocation104_spill] sm:$0xff] }
 0x615   :  { %v5424_v58 = vmul.f32 -1.442695, %v7441_v62  ;;  %v5425_v11 = vmul.f32 -1.442695, %v7457_v28  ;;  %v10432_v62 = vld [vmem:[#allocation63_spill] sm:$0xff] }
 0x616   :  { %7668 = vpow2.f32 %v5423_v24  ;;  %v10433_v24 = vld [vmem:[#allocation65_spill] sm:$0xff] }
 0x617   :  { %7670 = vpow2.f32 %v5424_v58  ;;  %v10434_v58 = vld [vmem:[#allocation66_spill] sm:$0xff] }
 0x618   :  { %7672 = vpow2.f32 %v5425_v11 }
 0x619   :  { %7674 = vtanh.f32 %v7456_v33 }
 0x61d   :  { %v7667_v56 = vpop.eup %7666 }
 0x61e   :  { %v9155_v44 = vmul.f32 %v7667_v56, %v7665_v37 }
 0x620   :  { %v7669_v12 = vpop.eup %7668  ;;  %3238 = vmatmul.mubr.f32.vlgmr.msra.gmra.mrb[28].mxu0 %v9155_v44  ;;  %3309 = vmatmul.mubr.f32.vlgmr.msra.gmra.mrb[28].mxu1 %v9155_v44  ;;  %v9161_v21 = vadd.f32 %v9155_v44, %v9031_v41  ;;  %v10431_v41 = vld [vmem:[#allocation62_spill] sm:$0xff] }
 0x621   :  { %v7671_v0 = vpop.eup %7670  ;;  %v3136_v7 = vadd.f32 1.0, %v7669_v12  ;;  %6699 = vmatpush1.bf16.msra.mxu0 %v10311_v1  ;;  %6731 = vmatpush1.bf16.msra.mxu1 %v10312_v38 }
 0x622   :  { %v3142_v22 = vadd.f32 1.0, %v7671_v0  ;;  %6701 = vmatprep.subr.bf16.mxu0 %v10313_v29  ;;  %6733 = vmatprep.subr.bf16.mxu1 %v10371_v20  ;;  %v7673_v28 = vpop.eup %7672 }
 0x623   :  { %7676 = vrcp.f32 %v3136_v7  ;;  %3379 = vmatprep.mubr.f32.mxu0 %v10172_v26  ;;  %3450 = vmatprep.mubr.f32.mxu1 %v10172_v26  ;;  %v7675_v37 = vpop.eup %7674  ;;  %v3149_v12 = vadd.f32 1.0, %v7673_v28 }
 0x624   :  { %7678 = vrcp.f32 %v3142_v22 }
 0x625   :  { %6703 = vmatpush1.bf16.msra.mxu0 %v10372_v17  ;;  %6735 = vmatpush1.bf16.msra.mxu1 %v10431_v41  ;;  %7680 = vrcp.f32 %v3149_v12  ;;  %v10439_v12 = vld [vmem:[#allocation100_spill] sm:$0xff] }
 0x626   :  { %6705 = vmatprep.subr.bf16.mxu0 %v10432_v62  ;;  %6737 = vmatprep.subr.bf16.mxu1 %v10375_v34 }
 0x629   :  { %6707 = vmatpush1.bf16.msra.mxu0 %v10433_v24  ;;  %6739 = vmatpush1.bf16.msra.mxu1 %v10434_v58 }
 0x62a   :  { %6709 = vmatprep.subr.bf16.mxu0 %v10378_v59  ;;  %6741 = vmatprep.subr.bf16.mxu1 %v10379_v31 }
 0x62d   :  { %v7677_v56 = vpop.eup %7676  ;;  %6711 = vmatpush1.bf16.msra.mxu0 %v10380_v15  ;;  %6743 = vmatpush1.bf16.msra.mxu1 %v10266_v9 }
 0x62e   :  { %v7679_v11 = vpop.eup %7678  ;;  %v3153_v33 = vmul.f32 %v7677_v56, %v7675_v37  ;;  %6713 = vmatprep.subr.bf16.mxu0 %v10267_v13  ;;  %6745 = vmatprep.subr.bf16.mxu1 %v10268_v39  ;;  %v10435_v37 = vld [vmem:[#allocation96_spill] sm:$0xff]  ;;  %v10436_v56 = vld [vmem:[#allocation97_spill] sm:$0xff] }
 0x62f   :  { %v3152_v0 = vmul.f32 %v7679_v11, %v9056_v52  ;;  %v7681_v52 = vpop.eup %7680  ;;  %v10437_v11 = vld [vmem:[#allocation98_spill] sm:$0xff] }
 0x631   :  { %v9186_v7 = vadd.f32 %v3153_v33, %v3152_v0  ;;  %6715 = vmatpush1.bf16.msra.mxu0 %v10324_v14  ;;  %6747 = vmatpush1.bf16.msra.mxu1 %v10325_v42  ;;  %v10438_v33 = vld [vmem:[#allocation99_spill] sm:$0xff]  ;;  %v10440_v0 = vld [vmem:[#allocation101_spill] sm:$0xff] }
 0x632   :  { %6717 = vmatprep.subr.bf16.mxu0 %v10326_v46  ;;  %6749 = vmatprep.subr.bf16.mxu1 %v10327_v35 }
 0x633   :  { %7682 = vtanh.f32 %v9186_v7 }
 0x635   :  { %6719 = vmatpush1.bf16.msra.mxu0 %v10328_v30  ;;  %6751 = vmatpush1.bf16.msra.mxu1 %v10329_v36 }
 0x636   :  { %6721 = vmatprep.subr.bf16.mxu0 %v10381_v57  ;;  %6753 = vmatprep.subr.bf16.mxu1 %v10276_v55 }
 0x639   :  { %6723 = vmatpush1.bf16.msra.mxu0 %v10277_v53  ;;  %6755 = vmatpush1.bf16.msra.mxu1 %v10278_v40 }
 0x63a   :  { %6725 = vmatprep.subr.bf16.mxu0 %v10279_v19  ;;  %6757 = vmatprep.subr.bf16.mxu1 %v10280_v45 }
 0x63d   :  { %v7683_v22 = vpop.eup %7682  ;;  %6727 = vmatpush1.bf16.msra.mxu0 %v10281_v63  ;;  %6759 = vmatpush1.bf16.msra.mxu1 %v10331_v4 }
 0x63e   :  { %6761 = vmatprep.subr.bf16.mxu0 %v10332_v50  ;;  %6793 = vmatprep.subr.bf16.mxu1 %v10333_v47  ;;  %v3156_v28 = vmul.f32 %v7683_v22, %v7681_v52  ;;  %v10441_v52 = vld [vmem:[#allocation102_spill] sm:$0xff]  ;;  %v10442_v22 = vld [vmem:[#allocation103_spill] sm:$0xff] }
 0x640   :  { %3380 = vmatmul.mubr.f32.vlgmr.msra.gmra.mrb[28].mxu0 %v3156_v28  ;;  %3451 = vmatmul.mubr.f32.vlgmr.msra.gmra.mrb[28].mxu1 %v3156_v28 }
 0x641   :  { %6763 = vmatpush1.bf16.msra.mxu0 %v10222_v48  ;;  %6795 = vmatpush1.bf16.msra.mxu1 %v10223_v6 }
 0x642   :  { %6765 = vmatprep.subr.bf16.mxu0 %v10224_v51  ;;  %6797 = vmatprep.subr.bf16.mxu1 %v10225_v16 }
 0x643   :  { %3554 = vmatprep.mubr.f32.mxu0 %v10172_v26  ;;  %3625 = vmatprep.mubr.f32.mxu1 %v10172_v26 }
 0x645   :  { %6767 = vmatpush1.bf16.msra.mxu0 %v10285_v61  ;;  %6799 = vmatpush1.bf16.msra.mxu1 %v10286_v32 }
 0x646   :  { %6769 = vmatprep.subr.bf16.mxu0 %v10287_v27  ;;  %6801 = vmatprep.subr.bf16.mxu1 %v10435_v37  ;;  %v10445_v27 = vld [vmem:[#allocation106_spill] sm:$0xff]  ;;  %v10446_v37 = vld [vmem:[#allocation107_spill] sm:$0xff] }
 0x649   :  { %6771 = vmatpush1.bf16.msra.mxu0 %v10436_v56  ;;  %6803 = vmatpush1.bf16.msra.mxu1 %v10437_v11  ;;  %v10447_v56 = vld [vmem:[#allocation108_spill] sm:$0xff]  ;;  %v10448_v11 = vld [vmem:[#allocation109_spill] sm:$0xff] }
 0x64a   :  { %6773 = vmatprep.subr.bf16.mxu0 %v10438_v33  ;;  %6805 = vmatprep.subr.bf16.mxu1 %v10439_v12  ;;  %v10449_v33 = vld [vmem:[#allocation110_spill] sm:$0xff]  ;;  %v10450_v12 = vld [vmem:[#allocation111_spill] sm:$0xff] }
 0x64d   :  { %6775 = vmatpush1.bf16.msra.mxu0 %v10440_v0  ;;  %6807 = vmatpush1.bf16.msra.mxu1 %v10441_v52  ;;  %v10451_v0 = vld [vmem:[#allocation112_spill] sm:$0xff]  ;;  %v10452_v52 = vld [vmem:[#allocation113_spill] sm:$0xff] }
 0x64e   :  { %6777 = vmatprep.subr.bf16.mxu0 %v10442_v22  ;;  %6809 = vmatprep.subr.bf16.mxu1 %v10443_v2  ;;  %v10453_v22 = vld [vmem:[#allocation114_spill] sm:$0xff]  ;;  %v10454_v2 = vld [vmem:[#allocation115_spill] sm:$0xff] }
 0x651   :  { %6779 = vmatpush1.bf16.msra.mxu0 %v10444_v3  ;;  %6811 = vmatpush1.bf16.msra.mxu1 %v10445_v27  ;;  %v10455_v3 = vld [vmem:[#allocation116_spill] sm:$0xff]  ;;  %v10456_v27 = vld [vmem:[#allocation117_spill] sm:$0xff] }
 0x652   :  { %6781 = vmatprep.subr.bf16.mxu0 %v10446_v37  ;;  %6813 = vmatprep.subr.bf16.mxu1 %v10447_v56  ;;  %v10457_v37 = vld [vmem:[#allocation118_spill] sm:$0xff]  ;;  %v10458_v56 = vld [vmem:[#allocation23_spill] sm:$0xff] }
 0x655   :  { %6783 = vmatpush1.bf16.msra.mxu0 %v10448_v11  ;;  %6815 = vmatpush1.bf16.msra.mxu1 %v10449_v33  ;;  %v10459_v11 = vld [vmem:[#allocation24_spill] sm:$0xff]  ;;  %v10492_v33 = vld [vmem:[#allocation89_spill] sm:$0xff] }
 0x656   :  { %6785 = vmatprep.subr.bf16.mxu0 %v10450_v12  ;;  %6817 = vmatprep.subr.bf16.mxu1 %v10451_v0  ;;  %v10460_v12 = vld [vmem:[#allocation25_spill] sm:$0xff]  ;;  %v10461_v0 = vld [vmem:[#allocation26_spill] sm:$0xff] }
 0x659   :  { %6787 = vmatpush1.bf16.msra.mxu0 %v10452_v52  ;;  %6819 = vmatpush1.bf16.msra.mxu1 %v10453_v22  ;;  %v10462_v52 = vld [vmem:[#allocation27_spill] sm:$0xff]  ;;  %v10463_v22 = vld [vmem:[#allocation28_spill] sm:$0xff] }
 0x65a   :  { %6789 = vmatprep.subr.bf16.mxu0 %v10454_v2  ;;  %6821 = vmatprep.subr.bf16.mxu1 %v10455_v3  ;;  %v10473_v3 = vld [vmem:[#allocation38_spill] sm:$0xff]  ;;  %v10474_v2 = vld [vmem:[#allocation39_spill] sm:$0xff] }
 0x65d   :  { %6791 = vmatpush1.bf16.msra.mxu0 %v10456_v27  ;;  %6823 = vmatpush1.bf16.msra.mxu1 %v10457_v37  ;;  %v10464_v27 = vld [vmem:[#allocation29_spill] sm:$0xff]  ;;  %v10465_v37 = vld [vmem:[#allocation30_spill] sm:$0xff] }
 0x65e   :  { %6825 = vmatprep.subr.bf16.mxu0 %v10458_v56  ;;  %6857 = vmatprep.subr.bf16.mxu1 %v10459_v11  ;;  %v10466_v56 = vld [vmem:[#allocation31_spill] sm:$0xff]  ;;  %v10467_v11 = vld [vmem:[#allocation32_spill] sm:$0xff] }
 0x660   :  { %3555 = vmatmul.mubr.f32.vlgmr.msra.gmra.mrb[10].mxu0 %v3156_v28  ;;  %3626 = vmatmul.mubr.f32.vlgmr.msra.gmra.mrb[10].mxu1 %v3156_v28  ;;  %v10468_v28 = vld [vmem:[#allocation33_spill] sm:$0xff] }
 0x661   :  { %6827 = vmatpush1.bf16.msra.mxu0 %v10460_v12  ;;  %6859 = vmatpush1.bf16.msra.mxu1 %v10461_v0  ;;  %v10469_v12 = vld [vmem:[#allocation34_spill] sm:$0xff]  ;;  %v10470_v0 = vld [vmem:[#allocation35_spill] sm:$0xff] }
 0x662   :  { %6829 = vmatprep.subr.bf16.mxu0 %v10462_v52  ;;  %6861 = vmatprep.subr.bf16.mxu1 %v10463_v22  ;;  %v10471_v52 = vld [vmem:[#allocation36_spill] sm:$0xff]  ;;  %v10472_v22 = vld [vmem:[#allocation37_spill] sm:$0xff] }
 0x663   :  { %3740 = vmatprep.mubr.f32.mxu0 %v10172_v26  ;;  %3811 = vmatprep.mubr.f32.mxu1 %v10172_v26 }
 0x665   :  { %6831 = vmatpush1.bf16.msra.mxu0 %v10464_v27  ;;  %6863 = vmatpush1.bf16.msra.mxu1 %v10465_v37  ;;  %v10475_v27 = vld [vmem:[#allocation40_spill] sm:$0xff]  ;;  %v10476_v37 = vld [vmem:[#allocation41_spill] sm:$0xff] }
 0x666   :  { %6833 = vmatprep.subr.bf16.mxu0 %v10466_v56  ;;  %6865 = vmatprep.subr.bf16.mxu1 %v10467_v11  ;;  %v10477_v56 = vld [vmem:[#allocation42_spill] sm:$0xff]  ;;  %v10478_v11 = vld [vmem:[#allocation43_spill] sm:$0xff] }
 0x669   :  { %6835 = vmatpush1.bf16.msra.mxu0 %v10468_v28  ;;  %6867 = vmatpush1.bf16.msra.mxu1 %v10469_v12  ;;  %v10479_v28 = vld [vmem:[#allocation44_spill] sm:$0xff]  ;;  %v10480_v12 = vld [vmem:[#allocation45_spill] sm:$0xff] }
 0x66a   :  { %6837 = vmatprep.subr.bf16.mxu0 %v10470_v0  ;;  %6869 = vmatprep.subr.bf16.mxu1 %v10471_v52  ;;  %v10481_v0 = vld [vmem:[#allocation46_spill] sm:$0xff]  ;;  %v10482_v52 = vld [vmem:[#allocation47_spill] sm:$0xff] }
 0x66d   :  { %6839 = vmatpush1.bf16.msra.mxu0 %v10472_v22  ;;  %6871 = vmatpush1.bf16.msra.mxu1 %v10473_v3  ;;  %v10483_v22 = vld [vmem:[#allocation48_spill] sm:$0xff]  ;;  %v10484_v3 = vld [vmem:[#allocation49_spill] sm:$0xff] }
 0x66e   :  { %6841 = vmatprep.subr.bf16.mxu0 %v10474_v2  ;;  %6873 = vmatprep.subr.bf16.mxu1 %v10475_v27  ;;  %v10485_v2 = vld [vmem:[#allocation50_spill] sm:$0xff]  ;;  %v10486_v27 = vld [vmem:[#allocation51_spill] sm:$0xff] }
 0x671   :  { %6843 = vmatpush1.bf16.msra.mxu0 %v10476_v37  ;;  %6875 = vmatpush1.bf16.msra.mxu1 %v10477_v56  ;;  %v10487_v37 = vld [vmem:[#allocation52_spill] sm:$0xff]  ;;  %v10488_v56 = vld [vmem:[#allocation53_spill] sm:$0xff] }
 0x672   :  { %6845 = vmatprep.subr.bf16.mxu0 %v10478_v11  ;;  %6877 = vmatprep.subr.bf16.mxu1 %v10479_v28  ;;  %v10489_v11 = vld [vmem:[#allocation54_spill] sm:$0xff]  ;;  %v10490_v28 = vld [vmem:[#allocation55_spill] sm:$0xff] }
 0x675   :  { %6847 = vmatpush1.bf16.msra.mxu0 %v10480_v12  ;;  %6879 = vmatpush1.bf16.msra.mxu1 %v10481_v0  ;;  %v10491_v12 = vld [vmem:[#allocation56_spill] sm:$0xff] }
 0x676   :  { %6849 = vmatprep.subr.bf16.mxu0 %v10482_v52  ;;  %6881 = vmatprep.subr.bf16.mxu1 %v10483_v22 }
 0x679   :  { %6851 = vmatpush1.bf16.msra.mxu0 %v10484_v3  ;;  %6883 = vmatpush1.bf16.msra.mxu1 %v10485_v2 }
 0x67a   :  { %6853 = vmatprep.subr.bf16.mxu0 %v10486_v27  ;;  %6885 = vmatprep.subr.bf16.mxu1 %v10487_v37 }
 0x67d   :  { %6855 = vmatpush1.bf16.msra.mxu0 %v10488_v56  ;;  %6887 = vmatpush1.bf16.msra.mxu1 %v10489_v11 }
 0x67e   :  { %6889 = vmatprep.subr.bf16.mxu0 %v10490_v28  ;;  %6921 = vmatprep.subr.bf16.mxu1 %v10491_v12 }
 0x713   :  { %v3381_v0 = vpop.f32.mrb[28].mxu0  ;;  %v3452_v52 = vpop.f32.mrb[28].mxu1 }
 0x714   :  { %v3457_v22 = vadd.f32 %v3381_v0, %v10492_v33  ;;  %v3383_v32 = vpop.f32.mrb[29].mxu0  ;;  %v3454_v3 = vpop.f32.mrb[29].mxu1  ;;  %v3459_v11 = vadd.f32 %v3452_v52, %v10369_v10 }
 0x715   :  { %v3458_v2 = vadd.f32 %v3383_v32, %v8760_v5  ;;  %v3460_v56 = vadd.f32 %v3454_v3, %v10308_v54 }
 0x716   :  { %v5426_v61 = vmul.f32 -1.442695, %v3457_v22 }
 0x717   :  { %v5427_v27 = vmul.f32 -1.442695, %v3458_v2  ;;  %v5428_v37 = vmul.f32 -1.442695, %v3460_v56 }
 0x718   :  { %7684 = vpow2.f32 %v5426_v61 }
 0x719   :  { %7686 = vpow2.f32 %v5427_v27 }
 0x71a   :  { %7688 = vpow2.f32 %v5428_v37 }
 0x71b   :  { %7690 = vtanh.f32 %v3459_v11 }
 0x722   :  { %v7685_v28 = vpop.eup %7684 }
 0x723   :  { %v7687_v16 = vpop.eup %7686  ;;  %v3464_v12 = vadd.f32 1.0, %v7685_v28 }
 0x724   :  { %v3470_v51 = vadd.f32 1.0, %v7687_v16  ;;  %v7689_v0 = vpop.eup %7688 }
 0x725   :  { %7692 = vrcp.f32 %v3464_v12  ;;  %v7691_v33 = vpop.eup %7690  ;;  %v3477_v61 = vadd.f32 1.0, %v7689_v0 }
 0x726   :  { %7694 = vrcp.f32 %v3470_v51 }
 0x727   :  { %7696 = vrcp.f32 %v3477_v61 }
 0x72f   :  { %v7693_v32 = vpop.eup %7692 }
 0x730   :  { %v7695_v22 = vpop.eup %7694  ;;  %v3481_v2 = vmul.f32 %v7693_v32, %v7691_v33 }
 0x731   :  { %v3480_v27 = vmul.f32 %v7695_v22, %v9148_v43  ;;  %v7697_v43 = vpop.eup %7696 }
 0x733   :  { %v9278_v3 = vadd.f32 %v3481_v2, %v3480_v27  ;;  %v3556_v56 = vpop.f32.mrb[10].mxu0  ;;  %v3627_v52 = vpop.f32.mrb[10].mxu1 }
 0x734   :  { %v7442_v28 = vadd.f32 %v3556_v56, %v10310_v60  ;;  %v3558_v37 = vpop.f32.mrb[11].mxu0  ;;  %v3629_v11 = vpop.f32.mrb[11].mxu1  ;;  %v7458_v22 = vadd.f32 %v3627_v52, %v8677_v18  ;;  %v10493_v56 = vmin.f32 %v9033_v25, %v9155_v44 }
 0x735   :  { %7698 = vtanh.f32 %v9278_v3  ;;  %v7443_v51 = vadd.f32 %v3558_v37, %v10250_v23  ;;  %v7459_v33 = vadd.f32 %v3629_v11, %v10251_v49  ;;  %v10494_v37 = vmax.f32 %v9035_v8, %v9155_v44 }
 0x736   :  { %v5429_v16 = vmul.f32 -1.442695, %v7442_v28 }
 0x737   :  { %v5430_v12 = vmul.f32 -1.442695, %v7443_v51  ;;  %v5431_v32 = vmul.f32 -1.442695, %v7459_v33 }
 0x738   :  { %7700 = vpow2.f32 %v5429_v16 }
 0x739   :  { %7702 = vpow2.f32 %v5430_v12 }
 0x73a   :  { %7704 = vpow2.f32 %v5431_v32 }
 0x73b   :  { %7706 = vtanh.f32 %v7458_v22 }
 0x73f   :  { %v7699_v0 = vpop.eup %7698 }
 0x740   :  { %v3484_v2 = vmul.f32 %v7699_v0, %v7697_v43 }
 0x742   :  { %v7701_v61 = vpop.eup %7700  ;;  %3741 = vmatmul.mubr.f32.vlgmr.msra.gmra.mrb[30].mxu0 %v3484_v2  ;;  %3812 = vmatmul.mubr.f32.vlgmr.msra.gmra.mrb[30].mxu1 %v3484_v2  ;;  %v9286_v27 = vadd.f32 %v3484_v2, %v9161_v21  ;;  %v9291_v28 = vmin.f32 %v10493_v56, %v3484_v2  ;;  %v9296_v11 = vmax.f32 %v10494_v37, %v3484_v2  ;;  %v10495_v2 = vld [vmem:[#allocation91_spill] sm:$0xff]  ;;  %v10497_v56 = vld [vmem:[#allocation93_spill] sm:$0xff]  ;;  %v10498_v37 = vld [vmem:[#allocation94_spill] sm:$0xff] }
 0x743   :  { %v7703_v51 = vpop.eup %7702  ;;  %v3639_v16 = vadd.f32 1.0, %v7701_v61  ;;  %6891 = vmatpush1.bf16.msra.mxu0 %v10311_v1  ;;  %6923 = vmatpush1.bf16.msra.mxu1 %v10312_v38  ;;  %v10496_v61 = vld [vmem:[#allocation92_spill] sm:$0xff] }
 0x744   :  { %v3645_v21 = vadd.f32 1.0, %v7703_v51  ;;  %6893 = vmatprep.subr.bf16.mxu0 %v10313_v29  ;;  %6925 = vmatprep.subr.bf16.mxu1 %v10371_v20  ;;  %v7705_v25 = vpop.eup %7704  ;;  %v10499_v51 = vld [vmem:[#allocation95_spill] sm:$0xff] }
 0x745   :  { %7708 = vrcp.f32 %v3639_v16  ;;  %3882 = vmatprep.mubr.f32.mxu0 %v10172_v26  ;;  %3953 = vmatprep.mubr.f32.mxu1 %v10172_v26  ;;  %v7707_v8 = vpop.eup %7706  ;;  %v3652_v33 = vadd.f32 1.0, %v7705_v25  ;;  %v10500_v16 = vld [vmem:[#allocation96_spill] sm:$0xff]  ;;  %v10502_v25 = vld [vmem:[#allocation98_spill] sm:$0xff] }
 0x746   :  { %7710 = vrcp.f32 %v3645_v21  ;;  %v10501_v21 = vld [vmem:[#allocation97_spill] sm:$0xff] }
 0x747   :  { %6895 = vmatpush1.bf16.msra.mxu0 %v10372_v17  ;;  %6927 = vmatpush1.bf16.msra.mxu1 %v10431_v41  ;;  %7712 = vrcp.f32 %v3652_v33  ;;  %v10507_v33 = vld [vmem:[#allocation103_spill] sm:$0xff] }
 0x748   :  { %6897 = vmatprep.subr.bf16.mxu0 %v10432_v62  ;;  %6929 = vmatprep.subr.bf16.mxu1 %v10375_v34 }
 0x74b   :  { %6899 = vmatpush1.bf16.msra.mxu0 %v10433_v24  ;;  %6931 = vmatpush1.bf16.msra.mxu1 %v10434_v58 }
 0x74c   :  { %6901 = vmatprep.subr.bf16.mxu0 %v10378_v59  ;;  %6933 = vmatprep.subr.bf16.mxu1 %v10379_v31 }
 0x74f   :  { %v7709_v44 = vpop.eup %7708  ;;  %6903 = vmatpush1.bf16.msra.mxu0 %v10380_v15  ;;  %6935 = vmatpush1.bf16.msra.mxu1 %v10266_v9 }
 0x750   :  { %v7711_v52 = vpop.eup %7710  ;;  %v3656_v12 = vmul.f32 %v7709_v44, %v7707_v8  ;;  %6905 = vmatprep.subr.bf16.mxu0 %v10267_v13  ;;  %6937 = vmatprep.subr.bf16.mxu1 %v10268_v39  ;;  %v10503_v8 = vld [vmem:[#allocation99_spill] sm:$0xff]  ;;  %v10504_v44 = vld [vmem:[#allocation100_spill] sm:$0xff] }
 0x751   :  { %v3655_v43 = vmul.f32 %v7711_v52, %v9186_v7  ;;  %v7713_v7 = vpop.eup %7712  ;;  %v10505_v52 = vld [vmem:[#allocation101_spill] sm:$0xff] }
 0x753   :  { %v9317_v0 = vadd.f32 %v3656_v12, %v3655_v43  ;;  %6907 = vmatpush1.bf16.msra.mxu0 %v10324_v14  ;;  %6939 = vmatpush1.bf16.msra.mxu1 %v10325_v42  ;;  %v10506_v12 = vld [vmem:[#allocation102_spill] sm:$0xff]  ;;  %v10508_v43 = vld [vmem:[#allocation104_spill] sm:$0xff] }
 0x754   :  { %6909 = vmatprep.subr.bf16.mxu0 %v10326_v46  ;;  %6941 = vmatprep.subr.bf16.mxu1 %v10327_v35 }
 0x755   :  { %7714 = vtanh.f32 %v9317_v0 }
 0x757   :  { %6911 = vmatpush1.bf16.msra.mxu0 %v10328_v30  ;;  %6943 = vmatpush1.bf16.msra.mxu1 %v10329_v36 }
 0x758   :  { %6913 = vmatprep.subr.bf16.mxu0 %v10381_v57  ;;  %6945 = vmatprep.subr.bf16.mxu1 %v10276_v55 }
 0x75b   :  { %6915 = vmatpush1.bf16.msra.mxu0 %v10277_v53  ;;  %6947 = vmatpush1.bf16.msra.mxu1 %v10278_v40 }
 0x75c   :  { %6917 = vmatprep.subr.bf16.mxu0 %v10279_v19  ;;  %6949 = vmatprep.subr.bf16.mxu1 %v10280_v45 }
 0x75f   :  { %v7715_v32 = vpop.eup %7714  ;;  %6919 = vmatpush1.bf16.msra.mxu0 %v10281_v63  ;;  %6951 = vmatpush1.bf16.msra.mxu1 %v10331_v4 }
 0x760   :  { %v3659_v22 = vmul.f32 %v7715_v32, %v7713_v7  ;;  %6953 = vmatprep.subr.bf16.mxu0 %v10332_v50  ;;  %6985 = vmatprep.subr.bf16.mxu1 %v10333_v47  ;;  %v10509_v7 = vld [vmem:[#allocation105_spill] sm:$0xff]  ;;  %v10510_v32 = vld [vmem:[#allocation106_spill] sm:$0xff] }
 0x762   :  { %3883 = vmatmul.mubr.f32.vlgmr.msra.gmra.mrb[30].mxu0 %v3659_v22  ;;  %3954 = vmatmul.mubr.f32.vlgmr.msra.gmra.mrb[30].mxu1 %v3659_v22 }
 0x763   :  { %6955 = vmatpush1.bf16.msra.mxu0 %v10222_v48  ;;  %6987 = vmatpush1.bf16.msra.mxu1 %v10223_v6 }
 0x764   :  { %6957 = vmatprep.subr.bf16.mxu0 %v10495_v2  ;;  %6989 = vmatprep.subr.bf16.mxu1 %v10496_v61 }
 0x765   :  { %4057 = vmatprep.mubr.f32.mxu0 %v10172_v26  ;;  %4128 = vmatprep.mubr.f32.mxu1 %v10172_v26 }
 0x767   :  { %6959 = vmatpush1.bf16.msra.mxu0 %v10497_v56  ;;  %6991 = vmatpush1.bf16.msra.mxu1 %v10498_v37 }
 0x768   :  { %6961 = vmatprep.subr.bf16.mxu0 %v10499_v51  ;;  %6993 = vmatprep.subr.bf16.mxu1 %v10500_v16  ;;  %v10511_v16 = vld [vmem:[#allocation107_spill] sm:$0xff] }
 0x76b   :  { %6963 = vmatpush1.bf16.msra.mxu0 %v10501_v21  ;;  %6995 = vmatpush1.bf16.msra.mxu1 %v10502_v25  ;;  %v10512_v21 = vld [vmem:[#allocation108_spill] sm:$0xff]  ;;  %v10513_v25 = vld [vmem:[#allocation109_spill] sm:$0xff] }
 0x76c   :  { %6965 = vmatprep.subr.bf16.mxu0 %v10503_v8  ;;  %6997 = vmatprep.subr.bf16.mxu1 %v10504_v44  ;;  %v10514_v8 = vld [vmem:[#allocation110_spill] sm:$0xff]  ;;  %v10515_v44 = vld [vmem:[#allocation111_spill] sm:$0xff] }
 0x76f   :  { %6967 = vmatpush1.bf16.msra.mxu0 %v10505_v52  ;;  %6999 = vmatpush1.bf16.msra.mxu1 %v10506_v12  ;;  %v10516_v52 = vld [vmem:[#allocation112_spill] sm:$0xff]  ;;  %v10517_v12 = vld [vmem:[#allocation113_spill] sm:$0xff] }
 0x770   :  { %6969 = vmatprep.subr.bf16.mxu0 %v10507_v33  ;;  %7001 = vmatprep.subr.bf16.mxu1 %v10508_v43  ;;  %v10518_v33 = vld [vmem:[#allocation114_spill] sm:$0xff]  ;;  %v10519_v43 = vld [vmem:[#allocation115_spill] sm:$0xff] }
 0x773   :  { %6971 = vmatpush1.bf16.msra.mxu0 %v10509_v7  ;;  %7003 = vmatpush1.bf16.msra.mxu1 %v10510_v32  ;;  %v10520_v7 = vld [vmem:[#allocation116_spill] sm:$0xff]  ;;  %v10521_v32 = vld [vmem:[#allocation117_spill] sm:$0xff] }
 0x774   :  { %6973 = vmatprep.subr.bf16.mxu0 %v10511_v16  ;;  %7005 = vmatprep.subr.bf16.mxu1 %v10512_v21  ;;  %v10522_v16 = vld [vmem:[#allocation118_spill] sm:$0xff]  ;;  %v10523_v21 = vld [vmem:[#allocation23_spill] sm:$0xff] }
 0x777   :  { %6975 = vmatpush1.bf16.msra.mxu0 %v10513_v25  ;;  %7007 = vmatpush1.bf16.msra.mxu1 %v10514_v8  ;;  %v10524_v25 = vld [vmem:[#allocation24_spill] sm:$0xff]  ;;  %v10557_v8 = vld [vmem:[#allocation89_spill] sm:$0xff] }
 0x778   :  { %6977 = vmatprep.subr.bf16.mxu0 %v10515_v44  ;;  %7009 = vmatprep.subr.bf16.mxu1 %v10516_v52  ;;  %v10525_v44 = vld [vmem:[#allocation25_spill] sm:$0xff]  ;;  %v10526_v52 = vld [vmem:[#allocation26_spill] sm:$0xff] }
 0x77b   :  { %6979 = vmatpush1.bf16.msra.mxu0 %v10517_v12  ;;  %7011 = vmatpush1.bf16.msra.mxu1 %v10518_v33  ;;  %v10527_v12 = vld [vmem:[#allocation27_spill] sm:$0xff]  ;;  %v10528_v33 = vld [vmem:[#allocation28_spill] sm:$0xff] }
 0x77c   :  { %6981 = vmatprep.subr.bf16.mxu0 %v10519_v43  ;;  %7013 = vmatprep.subr.bf16.mxu1 %v10520_v7  ;;  %v10538_v7 = vld [vmem:[#allocation38_spill] sm:$0xff]  ;;  %v10539_v43 = vld [vmem:[#allocation39_spill] sm:$0xff] }
 0x77f   :  { %6983 = vmatpush1.bf16.msra.mxu0 %v10521_v32  ;;  %7015 = vmatpush1.bf16.msra.mxu1 %v10522_v16  ;;  %v10529_v32 = vld [vmem:[#allocation29_spill] sm:$0xff]  ;;  %v10530_v16 = vld [vmem:[#allocation30_spill] sm:$0xff] }
 0x780   :  { %7017 = vmatprep.subr.bf16.mxu0 %v10523_v21  ;;  %7049 = vmatprep.subr.bf16.mxu1 %v10524_v25  ;;  %v10531_v21 = vld [vmem:[#allocation31_spill] sm:$0xff]  ;;  %v10532_v25 = vld [vmem:[#allocation32_spill] sm:$0xff] }
 0x782   :  { %4058 = vmatmul.mubr.f32.vlgmr.msra.gmra.mrb[12].mxu0 %v3659_v22  ;;  %4129 = vmatmul.mubr.f32.vlgmr.msra.gmra.mrb[12].mxu1 %v3659_v22  ;;  %v10533_v22 = vld [vmem:[#allocation33_spill] sm:$0xff] }
 0x783   :  { %7019 = vmatpush1.bf16.msra.mxu0 %v10525_v44  ;;  %7051 = vmatpush1.bf16.msra.mxu1 %v10526_v52  ;;  %v10534_v44 = vld [vmem:[#allocation34_spill] sm:$0xff]  ;;  %v10535_v52 = vld [vmem:[#allocation35_spill] sm:$0xff] }
 0x784   :  { %7021 = vmatprep.subr.bf16.mxu0 %v10527_v12  ;;  %7053 = vmatprep.subr.bf16.mxu1 %v10528_v33  ;;  %v10536_v12 = vld [vmem:[#allocation36_spill] sm:$0xff]  ;;  %v10537_v33 = vld [vmem:[#allocation37_spill] sm:$0xff] }
 0x785   :  { %4243 = vmatprep.mubr.f32.mxu0 %v10172_v26  ;;  %4314 = vmatprep.mubr.f32.mxu1 %v10172_v26 }
 0x787   :  { %7023 = vmatpush1.bf16.msra.mxu0 %v10529_v32  ;;  %7055 = vmatpush1.bf16.msra.mxu1 %v10530_v16  ;;  %v10540_v32 = vld [vmem:[#allocation40_spill] sm:$0xff]  ;;  %v10541_v16 = vld [vmem:[#allocation41_spill] sm:$0xff] }
 0x788   :  { %7025 = vmatprep.subr.bf16.mxu0 %v10531_v21  ;;  %7057 = vmatprep.subr.bf16.mxu1 %v10532_v25  ;;  %v10542_v21 = vld [vmem:[#allocation42_spill] sm:$0xff]  ;;  %v10543_v25 = vld [vmem:[#allocation43_spill] sm:$0xff] }
 0x78b   :  { %7027 = vmatpush1.bf16.msra.mxu0 %v10533_v22  ;;  %7059 = vmatpush1.bf16.msra.mxu1 %v10534_v44  ;;  %v10544_v22 = vld [vmem:[#allocation44_spill] sm:$0xff]  ;;  %v10545_v44 = vld [vmem:[#allocation45_spill] sm:$0xff] }
 0x78c   :  { %7029 = vmatprep.subr.bf16.mxu0 %v10535_v52  ;;  %7061 = vmatprep.subr.bf16.mxu1 %v10536_v12  ;;  %v10546_v52 = vld [vmem:[#allocation46_spill] sm:$0xff]  ;;  %v10547_v12 = vld [vmem:[#allocation47_spill] sm:$0xff] }
 0x78f   :  { %7031 = vmatpush1.bf16.msra.mxu0 %v10537_v33  ;;  %7063 = vmatpush1.bf16.msra.mxu1 %v10538_v7  ;;  %v10548_v33 = vld [vmem:[#allocation48_spill] sm:$0xff]  ;;  %v10549_v7 = vld [vmem:[#allocation49_spill] sm:$0xff] }
 0x790   :  { %7033 = vmatprep.subr.bf16.mxu0 %v10539_v43  ;;  %7065 = vmatprep.subr.bf16.mxu1 %v10540_v32  ;;  %v10550_v43 = vld [vmem:[#allocation50_spill] sm:$0xff]  ;;  %v10551_v32 = vld [vmem:[#allocation51_spill] sm:$0xff] }
 0x793   :  { %7035 = vmatpush1.bf16.msra.mxu0 %v10541_v16  ;;  %7067 = vmatpush1.bf16.msra.mxu1 %v10542_v21  ;;  %v10552_v16 = vld [vmem:[#allocation52_spill] sm:$0xff]  ;;  %v10553_v21 = vld [vmem:[#allocation53_spill] sm:$0xff] }
 0x794   :  { %7037 = vmatprep.subr.bf16.mxu0 %v10543_v25  ;;  %7069 = vmatprep.subr.bf16.mxu1 %v10544_v22  ;;  %v10554_v25 = vld [vmem:[#allocation54_spill] sm:$0xff]  ;;  %v10555_v22 = vld [vmem:[#allocation55_spill] sm:$0xff] }
 0x797   :  { %7039 = vmatpush1.bf16.msra.mxu0 %v10545_v44  ;;  %7071 = vmatpush1.bf16.msra.mxu1 %v10546_v52  ;;  %v10556_v44 = vld [vmem:[#allocation56_spill] sm:$0xff] }
 0x798   :  { %7041 = vmatprep.subr.bf16.mxu0 %v10547_v12  ;;  %7073 = vmatprep.subr.bf16.mxu1 %v10548_v33 }
 0x79b   :  { %7043 = vmatpush1.bf16.msra.mxu0 %v10549_v7  ;;  %7075 = vmatpush1.bf16.msra.mxu1 %v10550_v43 }
 0x79c   :  { %7045 = vmatprep.subr.bf16.mxu0 %v10551_v32  ;;  %7077 = vmatprep.subr.bf16.mxu1 %v10552_v16 }
 0x79f   :  { %7047 = vmatpush1.bf16.msra.mxu0 %v10553_v21  ;;  %7079 = vmatpush1.bf16.msra.mxu1 %v10554_v25 }
 0x7a0   :  { %7081 = vmatprep.subr.bf16.mxu0 %v10555_v22  ;;  %7113 = vmatprep.subr.bf16.mxu1 %v10556_v44 }
 0x835   :  { %v3884_v52 = vpop.f32.mrb[30].mxu0  ;;  %v3955_v12 = vpop.f32.mrb[30].mxu1 }
 0x836   :  { %v3960_v33 = vadd.f32 %v3884_v52, %v10557_v8  ;;  %v3886_v51 = vpop.f32.mrb[31].mxu0  ;;  %v3957_v7 = vpop.f32.mrb[31].mxu1  ;;  %v3962_v25 = vadd.f32 %v3955_v12, %v10369_v10 }
 0x837   :  { %v3961_v43 = vadd.f32 %v3886_v51, %v8760_v5  ;;  %v3963_v21 = vadd.f32 %v3957_v7, %v10308_v54 }
 0x838   :  { %v5432_v37 = vmul.f32 -1.442695, %v3960_v33 }
 0x839   :  { %v5433_v32 = vmul.f32 -1.442695, %v3961_v43  ;;  %v5434_v16 = vmul.f32 -1.442695, %v3963_v21 }
 0x83a   :  { %7716 = vpow2.f32 %v5432_v37 }
 0x83b   :  { %7718 = vpow2.f32 %v5433_v32 }
 0x83c   :  { %7720 = vpow2.f32 %v5434_v16 }
 0x83d   :  { %7722 = vtanh.f32 %v3962_v25 }
 0x844   :  { %v7717_v22 = vpop.eup %7716 }
 0x845   :  { %v7719_v56 = vpop.eup %7718  ;;  %v3967_v44 = vadd.f32 1.0, %v7717_v22 }
 0x846   :  { %v3973_v61 = vadd.f32 1.0, %v7719_v56  ;;  %v7721_v52 = vpop.eup %7720 }
 0x847   :  { %7724 = vrcp.f32 %v3967_v44  ;;  %v7723_v8 = vpop.eup %7722  ;;  %v3980_v37 = vadd.f32 1.0, %v7721_v52 }
 0x848   :  { %7726 = vrcp.f32 %v3973_v61 }
 0x849   :  { %7728 = vrcp.f32 %v3980_v37 }
 0x851   :  { %v7725_v51 = vpop.eup %7724 }
 0x852   :  { %v7727_v33 = vpop.eup %7726  ;;  %v3984_v43 = vmul.f32 %v7725_v51, %v7723_v8 }
 0x853   :  { %v3983_v32 = vmul.f32 %v7727_v33, %v9278_v3  ;;  %v7729_v3 = vpop.eup %7728 }
 0x855   :  { %v9409_v7 = vadd.f32 %v3984_v43, %v3983_v32  ;;  %v4059_v21 = vpop.f32.mrb[12].mxu0  ;;  %v4130_v12 = vpop.f32.mrb[12].mxu1 }
 0x856   :  { %v7444_v22 = vadd.f32 %v4059_v21, %v10310_v60  ;;  %v4061_v16 = vpop.f32.mrb[13].mxu0  ;;  %v4132_v25 = vpop.f32.mrb[13].mxu1  ;;  %v7460_v33 = vadd.f32 %v4130_v12, %v8677_v18 }
 0x857   :  { %7730 = vtanh.f32 %v9409_v7  ;;  %v7445_v61 = vadd.f32 %v4061_v16, %v10250_v23  ;;  %v7461_v8 = vadd.f32 %v4132_v25, %v10251_v49 }
 0x858   :  { %v5435_v56 = vmul.f32 -1.442695, %v7444_v22 }
 0x859   :  { %v5436_v44 = vmul.f32 -1.442695, %v7445_v61  ;;  %v5437_v51 = vmul.f32 -1.442695, %v7461_v8 }
 0x85a   :  { %7732 = vpow2.f32 %v5435_v56 }
 0x85b   :  { %7734 = vpow2.f32 %v5436_v44 }
 0x85c   :  { %7736 = vpow2.f32 %v5437_v51 }
 0x85d   :  { %7738 = vtanh.f32 %v7460_v33 }
 0x861   :  { %v7731_v52 = vpop.eup %7730 }
 0x862   :  { %v9416_v43 = vmul.f32 %v7731_v52, %v7729_v3 }
 0x864   :  { %v7733_v37 = vpop.eup %7732  ;;  %4244 = vmatmul.mubr.f32.vlgmr.msra.gmra.mrb[32].mxu0 %v9416_v43  ;;  %4315 = vmatmul.mubr.f32.vlgmr.msra.gmra.mrb[32].mxu1 %v9416_v43  ;;  %v9422_v32 = vadd.f32 %v9416_v43, %v9286_v27  ;;  %v4176_v21 = vmin.f32 %v9291_v28, %v9416_v43  ;;  %v4174_v22 = vmax.f32 %v9296_v11, %v9416_v43  ;;  %v5014_v11 = vld [vmem:[%s9866_s7 + $0x38] sm:$0xff] }
 0x865   :  { %v7735_v16 = vpop.eup %7734  ;;  %v4142_v25 = vadd.f32 1.0, %v7733_v37  ;;  %7083 = vmatpush1.bf16.msra.mxu0 %v10311_v1  ;;  %7115 = vmatpush1.bf16.msra.mxu1 %v10312_v38 }
 0x866   :  { %v4148_v12 = vadd.f32 1.0, %v7735_v16  ;;  %7085 = vmatprep.subr.bf16.mxu0 %v10313_v29  ;;  %7117 = vmatprep.subr.bf16.mxu1 %v10371_v20  ;;  %v7737_v27 = vpop.eup %7736  ;;  %v10558_v16 = vld [vmem:[#allocation92_spill] sm:$0xff] }
 0x867   :  { %7740 = vrcp.f32 %v4142_v25  ;;  %4385 = vmatprep.mubr.f32.mxu0 %v10172_v26  ;;  %4456 = vmatprep.mubr.f32.mxu1 %v10172_v26  ;;  %v7739_v61 = vpop.eup %7738  ;;  %v4155_v3 = vadd.f32 1.0, %v7737_v27  ;;  %v10559_v25 = vld [vmem:[#allocation93_spill] sm:$0xff] }
 0x868   :  { %7742 = vrcp.f32 %v4148_v12  ;;  %v10562_v12 = vld [vmem:[#allocation96_spill] sm:$0xff]  ;;  %v10563_v27 = vld [vmem:[#allocation97_spill] sm:$0xff] }
 0x869   :  { %7087 = vmatpush1.bf16.msra.mxu0 %v10372_v17  ;;  %7119 = vmatpush1.bf16.msra.mxu1 %v10431_v41  ;;  %7744 = vrcp.f32 %v4155_v3  ;;  %v10571_v3 = vld [vmem:[#allocation105_spill] sm:$0xff] }
 0x86a   :  { %7089 = vmatprep.subr.bf16.mxu0 %v10432_v62  ;;  %7121 = vmatprep.subr.bf16.mxu1 %v10375_v34 }
 0x86d   :  { %7091 = vmatpush1.bf16.msra.mxu0 %v10433_v24  ;;  %7123 = vmatpush1.bf16.msra.mxu1 %v10434_v58 }
 0x86e   :  { %7093 = vmatprep.subr.bf16.mxu0 %v10378_v59  ;;  %7125 = vmatprep.subr.bf16.mxu1 %v10379_v31 }
 0x871   :  { %v7741_v56 = vpop.eup %7740  ;;  %7095 = vmatpush1.bf16.msra.mxu0 %v10380_v15  ;;  %7127 = vmatpush1.bf16.msra.mxu1 %v10266_v9 }
 0x872   :  { %v7743_v44 = vpop.eup %7742  ;;  %v4159_v8 = vmul.f32 %v7741_v56, %v7739_v61  ;;  %7097 = vmatprep.subr.bf16.mxu0 %v10267_v13  ;;  %7129 = vmatprep.subr.bf16.mxu1 %v10268_v39  ;;  %v10567_v61 = vld [vmem:[#allocation101_spill] sm:$0xff]  ;;  %v10568_v56 = vld [vmem:[#allocation102_spill] sm:$0xff] }
 0x873   :  { %v4158_v52 = vmul.f32 %v7743_v44, %v9317_v0  ;;  %v7745_v0 = vpop.eup %7744  ;;  %v10569_v44 = vld [vmem:[#allocation103_spill] sm:$0xff] }
 0x875   :  { %v9447_v51 = vadd.f32 %v4159_v8, %v4158_v52  ;;  %7099 = vmatpush1.bf16.msra.mxu0 %v10324_v14  ;;  %7131 = vmatpush1.bf16.msra.mxu1 %v10325_v42  ;;  %v10570_v8 = vld [vmem:[#allocation104_spill] sm:$0xff]  ;;  %v10572_v52 = vld [vmem:[#allocation106_spill] sm:$0xff] }
 0x876   :  { %7101 = vmatprep.subr.bf16.mxu0 %v10326_v46  ;;  %7133 = vmatprep.subr.bf16.mxu1 %v10327_v35 }
 0x877   :  { %7746 = vtanh.f32 %v9447_v51 }
 0x879   :  { %7103 = vmatpush1.bf16.msra.mxu0 %v10328_v30  ;;  %7135 = vmatpush1.bf16.msra.mxu1 %v10329_v36 }
 0x87a   :  { %7105 = vmatprep.subr.bf16.mxu0 %v10381_v57  ;;  %7137 = vmatprep.subr.bf16.mxu1 %v10276_v55 }
 0x87d   :  { %7107 = vmatpush1.bf16.msra.mxu0 %v10277_v53  ;;  %7139 = vmatpush1.bf16.msra.mxu1 %v10278_v40 }
 0x87e   :  { %7109 = vmatprep.subr.bf16.mxu0 %v10279_v19  ;;  %7141 = vmatprep.subr.bf16.mxu1 %v10280_v45 }
 0x881   :  { %v7747_v33 = vpop.eup %7746  ;;  %7111 = vmatpush1.bf16.msra.mxu0 %v10281_v63  ;;  %7143 = vmatpush1.bf16.msra.mxu1 %v10331_v4 }
 0x882   :  { %7145 = vmatprep.subr.bf16.mxu0 %v10332_v50  ;;  %7177 = vmatprep.subr.bf16.mxu1 %v10333_v47  ;;  %v4162_v37 = vmul.f32 %v7747_v33, %v7745_v0  ;;  %v10560_v50 = vld [vmem:[#allocation94_spill] sm:$0xff]  ;;  %v10561_v47 = vld [vmem:[#allocation95_spill] sm:$0xff]  ;;  %v10574_v33 = vld [vmem:[#allocation108_spill] sm:$0xff] }
 0x883   :  { %v10573_v0 = vld [vmem:[#allocation107_spill] sm:$0xff] }
 0x884   :  { %4386 = vmatmul.mubr.f32.vlgmr.msra.gmra.mrb[32].mxu0 %v4162_v37  ;;  %4457 = vmatmul.mubr.f32.vlgmr.msra.gmra.mrb[32].mxu1 %v4162_v37 }
 0x885   :  { %7147 = vmatpush1.bf16.msra.mxu0 %v10222_v48  ;;  %7179 = vmatpush1.bf16.msra.mxu1 %v10223_v6  ;;  %v10564_v48 = vld [vmem:[#allocation98_spill] sm:$0xff]  ;;  %v10565_v6 = vld [vmem:[#allocation99_spill] sm:$0xff] }
 0x886   :  { %7149 = vmatprep.subr.bf16.mxu0 %v10495_v2  ;;  %7181 = vmatprep.subr.bf16.mxu1 %v10558_v16  ;;  %v10566_v2 = vld [vmem:[#allocation100_spill] sm:$0xff]  ;;  %v10575_v16 = vld [vmem:[#allocation109_spill] sm:$0xff] }
 0x887   :  { %4560 = vmatprep.mubr.f32.mxu0 %v10172_v26  ;;  %4631 = vmatprep.mubr.f32.mxu1 %v10172_v26 }
 0x889   :  { %7151 = vmatpush1.bf16.msra.mxu0 %v10559_v25  ;;  %7183 = vmatpush1.bf16.msra.mxu1 %v10560_v50  ;;  %v10576_v25 = vld [vmem:[#allocation110_spill] sm:$0xff]  ;;  %v10577_v50 = vld [vmem:[#allocation111_spill] sm:$0xff] }
 0x88a   :  { %7153 = vmatprep.subr.bf16.mxu0 %v10561_v47  ;;  %7185 = vmatprep.subr.bf16.mxu1 %v10562_v12  ;;  %v10578_v47 = vld [vmem:[#allocation112_spill] sm:$0xff]  ;;  %v10579_v12 = vld [vmem:[#allocation113_spill] sm:$0xff] }
 0x88d   :  { %7155 = vmatpush1.bf16.msra.mxu0 %v10563_v27  ;;  %7187 = vmatpush1.bf16.msra.mxu1 %v10564_v48  ;;  %v10580_v27 = vld [vmem:[#allocation114_spill] sm:$0xff]  ;;  %v10581_v48 = vld [vmem:[#allocation115_spill] sm:$0xff] }
 0x88e   :  { %7157 = vmatprep.subr.bf16.mxu0 %v10565_v6  ;;  %7189 = vmatprep.subr.bf16.mxu1 %v10566_v2  ;;  %v10582_v6 = vld [vmem:[#allocation116_spill] sm:$0xff]  ;;  %v10583_v2 = vld [vmem:[#allocation117_spill] sm:$0xff] }
 0x891   :  { %7159 = vmatpush1.bf16.msra.mxu0 %v10567_v61  ;;  %7191 = vmatpush1.bf16.msra.mxu1 %v10568_v56  ;;  %v10584_v61 = vld [vmem:[#allocation118_spill] sm:$0xff]  ;;  %v10585_v56 = vld [vmem:[#allocation23_spill] sm:$0xff] }
 0x892   :  { %7161 = vmatprep.subr.bf16.mxu0 %v10569_v44  ;;  %7193 = vmatprep.subr.bf16.mxu1 %v10570_v8  ;;  %v10586_v44 = vld [vmem:[#allocation24_spill] sm:$0xff]  ;;  %v10587_v8 = vld [vmem:[#allocation25_spill] sm:$0xff] }
 0x895   :  { %7163 = vmatpush1.bf16.msra.mxu0 %v10571_v3  ;;  %7195 = vmatpush1.bf16.msra.mxu1 %v10572_v52  ;;  %v10588_v3 = vld [vmem:[#allocation26_spill] sm:$0xff]  ;;  %v10589_v52 = vld [vmem:[#allocation27_spill] sm:$0xff] }
 0x896   :  { %7165 = vmatprep.subr.bf16.mxu0 %v10573_v0  ;;  %7197 = vmatprep.subr.bf16.mxu1 %v10574_v33  ;;  %v10590_v0 = vld [vmem:[#allocation28_spill] sm:$0xff]  ;;  %v10591_v33 = vld [vmem:[#allocation29_spill] sm:$0xff] }
 0x899   :  { %7167 = vmatpush1.bf16.msra.mxu0 %v10575_v16  ;;  %7199 = vmatpush1.bf16.msra.mxu1 %v10576_v25  ;;  %v10592_v16 = vld [vmem:[#allocation30_spill] sm:$0xff]  ;;  %v10593_v25 = vld [vmem:[#allocation31_spill] sm:$0xff] }
 0x89a   :  { %7169 = vmatprep.subr.bf16.mxu0 %v10577_v50  ;;  %7201 = vmatprep.subr.bf16.mxu1 %v10578_v47  ;;  %v10594_v50 = vld [vmem:[#allocation32_spill] sm:$0xff]  ;;  %v10596_v47 = vld [vmem:[#allocation34_spill] sm:$0xff] }
 0x89d   :  { %7171 = vmatpush1.bf16.msra.mxu0 %v10579_v12  ;;  %7203 = vmatpush1.bf16.msra.mxu1 %v10580_v27  ;;  %v10597_v12 = vld [vmem:[#allocation35_spill] sm:$0xff]  ;;  %v10598_v27 = vld [vmem:[#allocation36_spill] sm:$0xff] }
 0x89e   :  { %7173 = vmatprep.subr.bf16.mxu0 %v10581_v48  ;;  %7205 = vmatprep.subr.bf16.mxu1 %v10582_v6  ;;  %v10599_v48 = vld [vmem:[#allocation37_spill] sm:$0xff]  ;;  %v10600_v6 = vld [vmem:[#allocation38_spill] sm:$0xff] }
 0x8a1   :  { %7175 = vmatpush1.bf16.msra.mxu0 %v10583_v2  ;;  %7207 = vmatpush1.bf16.msra.mxu1 %v10584_v61  ;;  %v10601_v2 = vld [vmem:[#allocation39_spill] sm:$0xff]  ;;  %v10602_v61 = vld [vmem:[#allocation40_spill] sm:$0xff] }
 0x8a2   :  { %7209 = vmatprep.subr.bf16.mxu0 %v10585_v56  ;;  %7241 = vmatprep.subr.bf16.mxu1 %v10586_v44  ;;  %v10603_v56 = vld [vmem:[#allocation41_spill] sm:$0xff]  ;;  %v10604_v44 = vld [vmem:[#allocation42_spill] sm:$0xff] }
 0x8a4   :  { %4561 = vmatmul.mubr.f32.vlgmr.msra.gmra.mrb[14].mxu0 %v4162_v37  ;;  %4632 = vmatmul.mubr.f32.vlgmr.msra.gmra.mrb[14].mxu1 %v4162_v37  ;;  %v10595_v37 = vld [vmem:[#allocation33_spill] sm:$0xff] }
 0x8a5   :  { %7211 = vmatpush1.bf16.msra.mxu0 %v10587_v8  ;;  %7243 = vmatpush1.bf16.msra.mxu1 %v10588_v3  ;;  %v10605_v8 = vld [vmem:[#allocation43_spill] sm:$0xff]  ;;  %v10606_v3 = vld [vmem:[#allocation44_spill] sm:$0xff] }
 0x8a6   :  { %7213 = vmatprep.subr.bf16.mxu0 %v10589_v52  ;;  %7245 = vmatprep.subr.bf16.mxu1 %v10590_v0  ;;  %v10607_v52 = vld [vmem:[#allocation45_spill] sm:$0xff]  ;;  %v10608_v0 = vld [vmem:[#allocation46_spill] sm:$0xff] }
 0x8a7   :  { %4755 = vmatprep.mubr.f32.mxu0 %v10172_v26  ;;  %4826 = vmatprep.mubr.f32.mxu1 %v10172_v26 }
 0x8a9   :  { %7215 = vmatpush1.bf16.msra.mxu0 %v10591_v33  ;;  %7247 = vmatpush1.bf16.msra.mxu1 %v10592_v16  ;;  %v10609_v33 = vld [vmem:[#allocation47_spill] sm:$0xff]  ;;  %v10610_v16 = vld [vmem:[#allocation48_spill] sm:$0xff] }
 0x8aa   :  { %7217 = vmatprep.subr.bf16.mxu0 %v10593_v25  ;;  %7249 = vmatprep.subr.bf16.mxu1 %v10594_v50  ;;  %v10611_v25 = vld [vmem:[#allocation49_spill] sm:$0xff]  ;;  %v10612_v50 = vld [vmem:[#allocation50_spill] sm:$0xff] }
 0x8ad   :  { %7219 = vmatpush1.bf16.msra.mxu0 %v10595_v37  ;;  %7251 = vmatpush1.bf16.msra.mxu1 %v10596_v47  ;;  %v10613_v37 = vld [vmem:[#allocation51_spill] sm:$0xff]  ;;  %v10614_v47 = vld [vmem:[#allocation52_spill] sm:$0xff] }
 0x8ae   :  { %7221 = vmatprep.subr.bf16.mxu0 %v10597_v12  ;;  %7253 = vmatprep.subr.bf16.mxu1 %v10598_v27  ;;  %v10615_v12 = vld [vmem:[#allocation53_spill] sm:$0xff]  ;;  %v10616_v27 = vld [vmem:[#allocation54_spill] sm:$0xff] }
 0x8b1   :  { %7223 = vmatpush1.bf16.msra.mxu0 %v10599_v48  ;;  %7255 = vmatpush1.bf16.msra.mxu1 %v10600_v6  ;;  %v10617_v48 = vld [vmem:[#allocation55_spill] sm:$0xff]  ;;  %v10618_v6 = vld [vmem:[#allocation56_spill] sm:$0xff] }
 0x8b2   :  { %7225 = vmatprep.subr.bf16.mxu0 %v10601_v2  ;;  %7257 = vmatprep.subr.bf16.mxu1 %v10602_v61 }
 0x8b5   :  { %7227 = vmatpush1.bf16.msra.mxu0 %v10603_v56  ;;  %7259 = vmatpush1.bf16.msra.mxu1 %v10604_v44  ;;  %v10619_v56 = vld [vmem:[#allocation89_spill] sm:$0xff] }
 0x8b6   :  { %7229 = vmatprep.subr.bf16.mxu0 %v10605_v8  ;;  %7261 = vmatprep.subr.bf16.mxu1 %v10606_v3 }
 0x8b9   :  { %7231 = vmatpush1.bf16.msra.mxu0 %v10607_v52  ;;  %7263 = vmatpush1.bf16.msra.mxu1 %v10608_v0 }
 0x8ba   :  { %7233 = vmatprep.subr.bf16.mxu0 %v10609_v33  ;;  %7265 = vmatprep.subr.bf16.mxu1 %v10610_v16 }
 0x8bd   :  { %7235 = vmatpush1.bf16.msra.mxu0 %v10611_v25  ;;  %7267 = vmatpush1.bf16.msra.mxu1 %v10612_v50 }
 0x8be   :  { %7237 = vmatprep.subr.bf16.mxu0 %v10613_v37  ;;  %7269 = vmatprep.subr.bf16.mxu1 %v10614_v47 }
 0x8c1   :  { %7239 = vmatpush1.bf16.msra.mxu0 %v10615_v12  ;;  %7271 = vmatpush1.bf16.msra.mxu1 %v10616_v27 }
 0x8c2   :  { %7273 = vmatprep.subr.bf16.mxu0 %v10617_v48  ;;  %7305 = vmatprep.subr.bf16.mxu1 %v10618_v6 }
 0x957   :  { %v4387_v2 = vpop.f32.mrb[32].mxu0  ;;  %v4458_v61 = vpop.f32.mrb[32].mxu1 }
 0x958   :  { %v4463_v44 = vadd.f32 %v4387_v2, %v10619_v56  ;;  %v4389_v8 = vpop.f32.mrb[33].mxu0  ;;  %v4460_v3 = vpop.f32.mrb[33].mxu1  ;;  %v4465_v50 = vadd.f32 %v4458_v61, %v10369_v10 }
 0x959   :  { %v4464_v52 = vadd.f32 %v4389_v8, %v8760_v5  ;;  %v4466_v16 = vadd.f32 %v4460_v3, %v10308_v54 }
 0x95a   :  { %v5438_v0 = vmul.f32 -1.442695, %v4463_v44 }
 0x95b   :  { %v5439_v33 = vmul.f32 -1.442695, %v4464_v52  ;;  %v5440_v25 = vmul.f32 -1.442695, %v4466_v16 }
 0x95c   :  { %7748 = vpow2.f32 %v5438_v0 }
 0x95d   :  { %7750 = vpow2.f32 %v5439_v33 }
 0x95e   :  { %7752 = vpow2.f32 %v5440_v25 }
 0x95f   :  { %7754 = vtanh.f32 %v4465_v50 }
 0x966   :  { %v7749_v37 = vpop.eup %7748 }
 0x967   :  { %v7751_v47 = vpop.eup %7750  ;;  %v4470_v12 = vadd.f32 1.0, %v7749_v37 }
 0x968   :  { %v4476_v27 = vadd.f32 1.0, %v7751_v47  ;;  %v7753_v48 = vpop.eup %7752 }
 0x969   :  { %7756 = vrcp.f32 %v4470_v12  ;;  %v7755_v6 = vpop.eup %7754  ;;  %v4483_v52 = vadd.f32 1.0, %v7753_v48 }
 0x96a   :  { %7758 = vrcp.f32 %v4476_v27 }
 0x96b   :  { %7760 = vrcp.f32 %v4483_v52 }
 0x973   :  { %v7757_v2 = vpop.eup %7756 }
 0x974   :  { %v7759_v44 = vpop.eup %7758  ;;  %v4487_v8 = vmul.f32 %v7757_v2, %v7755_v6 }
 0x975   :  { %v4486_v0 = vmul.f32 %v7759_v44, %v9409_v7  ;;  %v7761_v7 = vpop.eup %7760 }
 0x977   :  { %v9539_v3 = vadd.f32 %v4487_v8, %v4486_v0  ;;  %v4562_v33 = vpop.f32.mrb[14].mxu0  ;;  %v4633_v61 = vpop.f32.mrb[14].mxu1 }
 0x978   :  { %v7446_v16 = vadd.f32 %v4562_v33, %v10310_v60  ;;  %v4564_v25 = vpop.f32.mrb[15].mxu0  ;;  %v4635_v50 = vpop.f32.mrb[15].mxu1  ;;  %v7462_v2 = vadd.f32 %v4633_v61, %v8677_v18  ;;  %v5016_v33 = vld [vmem:[%s9866_s7 + $0x48] sm:$0xff] }
 0x979   :  { %7762 = vtanh.f32 %v9539_v3  ;;  %v7447_v37 = vadd.f32 %v4564_v25, %v10250_v23  ;;  %v7463_v27 = vadd.f32 %v4635_v50, %v10251_v49  ;;  %v5032_v25 = vld [vmem:[%s9867_s8 + $0x48] sm:$0xff]  ;;  %v5017_v50 = vld [vmem:[%s9866_s7 + $0x50] sm:$0xff] }
 0x97a   :  { %v5441_v47 = vmul.f32 -1.442695, %v7446_v16  ;;  %v5031_v16 = vld [vmem:[%s9867_s8 + $0x40] sm:$0xff] }
 0x97b   :  { %v5442_v12 = vmul.f32 -1.442695, %v7447_v37  ;;  %v5443_v6 = vmul.f32 -1.442695, %v7463_v27  ;;  %v7349_v37 = vpack.c.bf16 %v5032_v25, %v5031_v16  ;;  %v5034_v27 = vld [vmem:[%s9867_s8 + $0x58] sm:$0xff]  ;;  %v5181_v16 = vld [vmem:[%s9868_s9 + $0x10] sm:$0xff] }
 0x97c   :  { %7764 = vpow2.f32 %v5441_v47  ;;  %v5018_v47 = vld [vmem:[%s9866_s7 + $0x58] sm:$0xff] }
 0x97d   :  { %7766 = vpow2.f32 %v5442_v12  ;;  %v5033_v12 = vld [vmem:[%s9867_s8 + $0x50] sm:$0xff] }
 0x97e   :  { %7768 = vpow2.f32 %v5443_v6  ;;  %v5020_v6 = vld [vmem:[%s9866_s7 + $0x68] sm:$0xff] }
 0x97f   :  { %7770 = vtanh.f32 %v7462_v2  ;;  %v7352_v2 = vpack.c.bf16 %v5034_v27, %v5033_v12  ;;  %v5183_v27 = vld [vmem:[%s9868_s9 + $0x20] sm:$0xff] }
 0x983   :  { %v7763_v48 = vpop.eup %7762 }
 0x984   :  { %v4490_v44 = vmul.f32 %v7763_v48, %v7761_v7  ;;  %v7376_v7 = vpack.c.bf16 %v5018_v47, %v5017_v50  ;;  %v5019_v48 = vld [vmem:[%s9866_s7 + $0x60] sm:$0xff] }
 0x985   :  { %v5270_v50 = vld [vmem:[%s9869_s10 + $0x20] sm:$0xff] }
 0x986   :  { %v7765_v8 = vpop.eup %7764  ;;  %4756 = vmatmul.mubr.f32.vlgmr.msra.gmra.mrb[34].mxu0 %v4490_v44  ;;  %4827 = vmatmul.mubr.f32.vlgmr.msra.gmra.mrb[34].mxu1 %v4490_v44  ;;  %v9547_v60 = vadd.f32 %v4490_v44, %v9422_v32  ;;  %v9552_v23 = vmin.f32 %v4176_v21, %v4490_v44  ;;  %v9557_v49 = vmax.f32 %v4174_v22, %v4490_v44  ;;  %v5029_v32 = vld [vmem:[%s9867_s8 + $0x30] sm:$0xff]  ;;  %v5030_v21 = vld [vmem:[%s9867_s8 + $0x38] sm:$0xff]  ;;  %v5015_v22 = vld [vmem:[%s9866_s7 + $0x40] sm:$0xff] }
 0x987   :  { %v7767_v52 = vpop.eup %7766  ;;  %v4645_v0 = vadd.f32 1.0, %v7765_v8  ;;  %7275 = vmatpush1.bf16.msra.mxu0 %v10311_v1  ;;  %7307 = vmatpush1.bf16.msra.mxu1 %v10312_v38  ;;  %v7373_v61 = vpack.c.bf16 %v5016_v33, %v5015_v22  ;;  %v7379_v44 = vpack.c.bf16 %v5020_v6, %v5019_v48  ;;  %v5035_v8 = vld [vmem:[%s9867_s8 + $0x60] sm:$0xff]  ;;  %v5272_v48 = vld [vmem:[%s9869_s10 + $0x30] sm:$0xff]  ;;  %v5273_v6 = vld [vmem:[%s9869_s10 + $0x38] sm:$0xff] }
 0x988   :  { %v4651_v18 = vadd.f32 1.0, %v7767_v52  ;;  %7277 = vmatprep.subr.bf16.mxu0 %v10313_v29  ;;  %7309 = vmatprep.subr.bf16.mxu1 %v10371_v20  ;;  %v7769_v1 = vpop.eup %7768  ;;  %v5036_v52 = vld [vmem:[%s9867_s8 + $0x68] sm:$0xff] }
 0x989   :  { %7772 = vrcp.f32 %v4645_v0  ;;  %4897 = vmatprep.mubr.f32.mxu0 %v10172_v26  ;;  %4968 = vmatprep.mubr.f32.mxu1 %v10172_v26  ;;  %v7771_v38 = vpop.eup %7770  ;;  %v5021_v0 = vld [vmem:[%s9866_s7 + $0x70] sm:$0xff] }
 0x98a   :  { %7774 = vrcp.f32 %v4651_v18  ;;  %v5022_v18 = vld [vmem:[%s9866_s7 + $0x78] sm:$0xff] }
 0x98b   :  { %7279 = vmatpush1.bf16.msra.mxu0 %v10372_v17  ;;  %7311 = vmatpush1.bf16.msra.mxu1 %v10431_v41  ;;  %v4658_v41 = vadd.f32 1.0, %v7769_v1  ;;  %v7355_v1 = vpack.c.bf16 %v5036_v52, %v5035_v8  ;;  %v5185_v8 = vld [vmem:[%s9868_s9 + $0x30] sm:$0xff]  ;;  %v5186_v52 = vld [vmem:[%s9868_s9 + $0x38] sm:$0xff] }
 0x98c   :  { %7281 = vmatprep.subr.bf16.mxu0 %v10432_v62  ;;  %7313 = vmatprep.subr.bf16.mxu1 %v10375_v34 }
 0x98d   :  { %7776 = vrcp.f32 %v4658_v41 }
 0x98f   :  { %7283 = vmatpush1.bf16.msra.mxu0 %v10433_v24  ;;  %7315 = vmatpush1.bf16.msra.mxu1 %v10434_v58  ;;  %v5028_v24 = vld [vmem:[%s9867_s8 + $0x28] sm:$0xff]  ;;  %v5013_v58 = vld [vmem:[%s9866_s7 + $0x30] sm:$0xff] }
 0x990   :  { %7285 = vmatprep.subr.bf16.mxu0 %v10378_v59  ;;  %7317 = vmatprep.subr.bf16.mxu1 %v10379_v31  ;;  %v5012_v31 = vld [vmem:[%s9866_s7 + $0x28] sm:$0xff]  ;;  %v7370_v43 = vpack.c.bf16 %v5014_v11, %v5013_v58 }
 0x993   :  { %v7773_v29 = vpop.eup %7772  ;;  %7287 = vmatpush1.bf16.msra.mxu0 %v10380_v15  ;;  %7319 = vmatpush1.bf16.msra.mxu1 %v10266_v9 }
 0x994   :  { %v7775_v20 = vpop.eup %7774  ;;  %v4662_v17 = vmul.f32 %v7773_v29, %v7771_v38  ;;  %7289 = vmatprep.subr.bf16.mxu0 %v10267_v13  ;;  %7321 = vmatprep.subr.bf16.mxu1 %v10268_v39  ;;  %v7382_v38 = vpack.c.bf16 %v5022_v18, %v5021_v0  ;;  %v5037_v29 = vld [vmem:[%s9867_s8 + $0x70] sm:$0xff]  ;;  %v5275_v0 = vld [vmem:[%s9869_s10 + $0x48] sm:$0xff]  ;;  %v7394_v18 = vpack.c.bf16 %v5186_v52, %v5185_v8 }
 0x995   :  { %v4661_v34 = vmul.f32 %v7775_v20, %v9447_v51  ;;  %v7346_v51 = vpack.c.bf16 %v5030_v21, %v5029_v32  ;;  %v5038_v20 = vld [vmem:[%s9867_s8 + $0x78] sm:$0xff] }
 0x996   :  { %v5269_v32 = vld [vmem:[%s9869_s10 + $0x18] sm:$0xff] }
 0x997   :  { %v4663_v62 = vadd.f32 %v4662_v17, %v4661_v34  ;;  %7291 = vmatpush1.bf16.msra.mxu0 %v10324_v14  ;;  %7323 = vmatpush1.bf16.msra.mxu1 %v10325_v42  ;;  %v7777_v13 = vpop.eup %7776  ;;  %v5010_v42 = vld [vmem:[%s9866_s7 + $0x18] sm:$0xff]  ;;  %v7358_v17 = vpack.c.bf16 %v5038_v20, %v5037_v29  ;;  %v5188_v29 = vld [vmem:[%s9868_s9 + $0x48] sm:$0xff]  ;;  %v5276_v20 = vld [vmem:[%s9869_s10 + $0x50] sm:$0xff] }
 0x998   :  { %7293 = vmatprep.subr.bf16.mxu0 %v10326_v46  ;;  %7325 = vmatprep.subr.bf16.mxu1 %v10327_v35  ;;  %v5009_v46 = vld [vmem:[%s9866_s7 + $0x10] sm:$0xff] }
 0x999   :  { %7778 = vtanh.f32 %v4663_v62  ;;  %v7364_v35 = vpack.c.bf16 %v5010_v42, %v5009_v46 }
 0x99b   :  { %7295 = vmatpush1.bf16.msra.mxu0 %v10328_v30  ;;  %7327 = vmatpush1.bf16.msra.mxu1 %v10329_v36  ;;  %v5025_v30 = vld [vmem:[%s9867_s8 + $0x10] sm:$0xff]  ;;  %v5026_v36 = vld [vmem:[%s9867_s8 + $0x18] sm:$0xff] }
 0x99c   :  { %7297 = vmatprep.subr.bf16.mxu0 %v10381_v57  ;;  %7329 = vmatprep.subr.bf16.mxu1 %v10276_v55  ;;  %v5007_v55 = vld [vmem:[%s9866_s7] sm:$0xff]  ;;  %v7340_v59 = vpack.c.bf16 %v5026_v36, %v5025_v30 }
 0x99d   :  { %v5027_v57 = vld [vmem:[%s9867_s8 + $0x20] sm:$0xff] }
 0x99e   :  { %v7343_v28 = vpack.c.bf16 %v5028_v24, %v5027_v57 }
 0x99f   :  { %7299 = vmatpush1.bf16.msra.mxu0 %v10277_v53  ;;  %7331 = vmatpush1.bf16.msra.mxu1 %v10278_v40  ;;  %v5008_v53 = vld [vmem:[%s9866_s7 + $0x8] sm:$0xff] }
 0x9a0   :  { %7301 = vmatprep.subr.bf16.mxu0 %v10279_v19  ;;  %7333 = vmatprep.subr.bf16.mxu1 %v10280_v45  ;;  %v7361_v40 = vpack.c.bf16 %v5008_v53, %v5007_v55  ;;  %v7923_v19 = vmov 0.0|0.0   ;;  %v5024_v45 = vld [vmem:[%s9867_s8 + $0x8] sm:$0xff] }
 0x9a3   :  { %v7779_v9 = vpop.eup %7778  ;;  %7303 = vmatpush1.bf16.msra.mxu0 %v10281_v63  ;;  %7335 = vmatpush1.bf16.msra.mxu1 %v10331_v4  ;;  %v5023_v63 = vld [vmem:[%s9867_s8] sm:$0xff] }
 0x9a4   :  { %v4665_v39 = vmul.f32 %v7779_v9, %v7777_v13  ;;  %7360 = vmatprep.subr.bf16.mxu1 %v7923_v19  ;;  %7336 = vmatprep.subr.bf16.mxu0 %v7923_v19  ;;  %v7337_v14 = vpack.c.bf16 %v5024_v45, %v5023_v63  ;;  %v5011_v4 = vld [vmem:[%s9866_s7 + $0x20] sm:$0xff] }
 0x9a5   :  { %v7367_v15 = vpack.c.bf16 %v5012_v31, %v5011_v4 }
 0x9a6   :  { %4898 = vmatmul.mubr.f32.vlgmr.msra.gmra.mrb[34].mxu0 %v4665_v39  ;;  %4969 = vmatmul.mubr.f32.vlgmr.msra.gmra.mrb[34].mxu1 %v4665_v39 }
 0x9a7   :  { %7362 = vmatpush3.bf16.msra.mxu1 %v7361_v40  ;;  %7338 = vmatpush3.bf16.msra.mxu0 %v7337_v14 }
 0x9a8   :  { %7363 = vmatprep.subr.bf16.mxu1 %v7923_v19  ;;  %7339 = vmatprep.subr.bf16.mxu0 %v7923_v19 }
 0x9a9   :  { %5583 = vmatprep.mubr.msk.f32.mxu1 %vm7924_vm1, %v10172_v26  ;;  %5548 = vmatprep.mubr.msk.f32.mxu0 %vm7924_vm1, %v10172_v26 }
 0x9ab   :  { %7365 = vmatpush3.bf16.msra.mxu1 %v7364_v35  ;;  %7341 = vmatpush3.bf16.msra.mxu0 %v7340_v59 }
 0x9ac   :  { %7366 = vmatprep.subr.bf16.mxu1 %v7923_v19  ;;  %7342 = vmatprep.subr.bf16.mxu0 %v7923_v19 }
 0x9af   :  { %7368 = vmatpush3.bf16.msra.mxu1 %v7367_v15  ;;  %7344 = vmatpush3.bf16.msra.mxu0 %v7343_v28  ;;  %v5267_v15 = vld [vmem:[%s9869_s10 + $0x8] sm:$0xff]  ;;  %v5179_v28 = vld [vmem:[%s9868_s9] sm:$0xff] }
 0x9b0   :  { %7369 = vmatprep.subr.bf16.mxu1 %v7923_v19  ;;  %7345 = vmatprep.subr.bf16.mxu0 %v7923_v19 }
 0x9b3   :  { %7371 = vmatpush3.bf16.msra.mxu1 %v7370_v43  ;;  %7347 = vmatpush3.bf16.msra.mxu0 %v7346_v51  ;;  %v5268_v43 = vld [vmem:[%s9869_s10 + $0x10] sm:$0xff] }
 0x9b4   :  { %7372 = vmatprep.subr.bf16.mxu1 %v7923_v19  ;;  %7348 = vmatprep.subr.bf16.mxu0 %v7923_v19 }
 0x9b7   :  { %7374 = vmatpush3.bf16.msra.mxu1 %v7373_v61  ;;  %7350 = vmatpush3.bf16.msra.mxu0 %v7349_v37  ;;  %v7412_v61 = vpack.c.bf16 %v5269_v32, %v5268_v43  ;;  %v5271_v37 = vld [vmem:[%s9869_s10 + $0x28] sm:$0xff] }
 0x9b8   :  { %7375 = vmatprep.subr.bf16.mxu1 %v7923_v19  ;;  %7351 = vmatprep.subr.bf16.mxu0 %v7923_v19  ;;  %v7415_v12 = vpack.c.bf16 %v5271_v37, %v5270_v50 }
 0x9bb   :  { %7377 = vmatpush3.bf16.msra.mxu1 %v7376_v7  ;;  %7353 = vmatpush3.bf16.msra.mxu0 %v7352_v2  ;;  %v5184_v7 = vld [vmem:[%s9868_s9 + $0x28] sm:$0xff] }
 0x9bc   :  { %7378 = vmatprep.subr.bf16.mxu1 %v7923_v19  ;;  %7354 = vmatprep.subr.bf16.mxu0 %v7923_v19  ;;  %v7391_v2 = vpack.c.bf16 %v5184_v7, %v5183_v27 }
 0x9bf   :  { %7380 = vmatpush3.bf16.msra.mxu1 %v7379_v44  ;;  %7356 = vmatpush3.bf16.msra.mxu0 %v7355_v1  ;;  %v7418_v44 = vpack.c.bf16 %v5273_v6, %v5272_v48 }
 0x9c0   :  { %7381 = vmatprep.subr.bf16.mxu1 %v7923_v19  ;;  %7357 = vmatprep.subr.bf16.mxu0 %v7923_v19 }
 0x9c3   :  { %7383 = vmatpush3.bf16.msra.mxu1 %v7382_v38  ;;  %7359 = vmatpush3.bf16.msra.mxu0 %v7358_v17  ;;  %v5187_v38 = vld [vmem:[%s9868_s9 + $0x40] sm:$0xff]  ;;  %v5277_v17 = vld [vmem:[%s9869_s10 + $0x58] sm:$0xff] }
 0x9c4   :  { %7408 = vmatprep.subr.bf16.mxu1 %v7923_v19  ;;  %7384 = vmatprep.subr.bf16.mxu0 %v7923_v19 }
 0xa79   :  { %v4899_v41 = vpop.f32.mrb[34].mxu0  ;;  %v4970_v34 = vpop.f32.mrb[34].mxu1 }
 0xa7a   :  { %v4975_v62 = vadd.f32 %v4899_v41, %v10619_v56  ;;  %v4901_v13 = vpop.f32.mrb[35].mxu0  ;;  %v4972_v9 = vpop.f32.mrb[35].mxu1  ;;  %v4977_v45 = vadd.f32 %v4970_v34, %v10369_v10  ;;  %v5266_v10 = vld [vmem:[%s9869_s10] sm:$0xff]  ;;  %v7397_v41 = vpack.c.bf16 %v5188_v29, %v5187_v38  ;;  %v7424_v34 = vpack.c.bf16 %v5277_v17, %v5276_v20 }
 0xa7b   :  { %v4976_v39 = vadd.f32 %v4901_v13, %v8760_v5  ;;  %v4978_v40 = vadd.f32 %v4972_v9, %v10308_v54  ;;  %v7409_v58 = vpack.c.bf16 %v5267_v15, %v5266_v10  ;;  %v5190_v13 = vld [vmem:[%s9868_s9 + $0x58] sm:$0xff]  ;;  %v5278_v9 = vld [vmem:[%s9869_s10 + $0x60] sm:$0xff] }
 0xa7c   :  { %v5444_v55 = vmul.f32 -1.442695, %v4975_v62  ;;  %v5189_v62 = vld [vmem:[%s9868_s9 + $0x50] sm:$0xff] }
 0xa7d   :  { %v5445_v53 = vmul.f32 -1.442695, %v4976_v39  ;;  %v5446_v63 = vmul.f32 -1.442695, %v4978_v40  ;;  %v5279_v39 = vld [vmem:[%s9869_s10 + $0x68] sm:$0xff]  ;;  %v5191_v40 = vld [vmem:[%s9868_s9 + $0x60] sm:$0xff] }
 0xa7e   :  { %7780 = vpow2.f32 %v5444_v55  ;;  %v7400_v55 = vpack.c.bf16 %v5190_v13, %v5189_v62 }
 0xa7f   :  { %7782 = vpow2.f32 %v5445_v53  ;;  %v7427_v53 = vpack.c.bf16 %v5279_v39, %v5278_v9 }
 0xa80   :  { %7784 = vpow2.f32 %v5446_v63  ;;  %v5192_v63 = vld [vmem:[%s9868_s9 + $0x68] sm:$0xff] }
 0xa81   :  { %7786 = vtanh.f32 %v4977_v45  ;;  %v5280_v45 = vld [vmem:[%s9869_s10 + $0x70] sm:$0xff] }
 0xa88   :  { %v7781_v46 = vpop.eup %7780 }
 0xa89   :  { %v7783_v14 = vpop.eup %7782  ;;  %v4982_v42 = vadd.f32 1.0, %v7781_v46  ;;  %v5281_v46 = vld [vmem:[%s9869_s10 + $0x78] sm:$0xff] }
 0xa8a   :  { %v4988_v35 = vadd.f32 1.0, %v7783_v14  ;;  %v7785_v56 = vpop.eup %7784  ;;  %v7403_v14 = vpack.c.bf16 %v5192_v63, %v5191_v40 }
 0xa8b   :  { %7788 = vrcp.f32 %v4982_v42  ;;  %v7787_v30 = vpop.eup %7786  ;;  %v4995_v59 = vadd.f32 1.0, %v7785_v56  ;;  %v7430_v42 = vpack.c.bf16 %v5281_v46, %v5280_v45  ;;  %v5194_v56 = vld [vmem:[%s9868_s9 + $0x78] sm:$0xff] }
 0xa8c   :  { %7790 = vrcp.f32 %v4988_v35  ;;  %v5193_v35 = vld [vmem:[%s9868_s9 + $0x70] sm:$0xff] }
 0xa8d   :  { %7792 = vrcp.f32 %v4995_v59 }
 0xa95   :  { %v7789_v5 = vpop.eup %7788 }
 0xa96   :  { %v7791_v36 = vpop.eup %7790  ;;  %v4999_v4 = vmul.f32 %v7789_v5, %v7787_v30  ;;  %v7406_v30 = vpack.c.bf16 %v5194_v56, %v5193_v35 }
 0xa97   :  { %v4998_v31 = vmul.f32 %v7791_v36, %v9539_v3  ;;  %v7793_v57 = vpop.eup %7792  ;;  %v5180_v3 = vld [vmem:[%s9868_s9 + $0x8] sm:$0xff] }
 0xa98   :  { %v7385_v33 = vpack.c.bf16 %v5180_v3, %v5179_v28 }
 0xa99   :  { %v5000_v54 = vadd.f32 %v4999_v4, %v4998_v31 }
 0xa9b   :  { %7794 = vtanh.f32 %v5000_v54 }
 0xaa5   :  { %v7795_v24 = vpop.eup %7794 }
 0xaa6   :  { %v9724_v11 = vmul.f32 %v7795_v24, %v7793_v57 }
 0xaa8   :  { %5584 = vmatmul.mubr.f32.vlgmr.msra.gmra.mrb[36].mxu1 %v9724_v11  ;;  %v5003_v21 = vadd.f32 %v9724_v11, %v9547_v60  ;;  %v5005_v22 = vmin.f32 %v9552_v23, %v9724_v11  ;;  %v5004_v51 = vmax.f32 %v9557_v49, %v9724_v11  ;;  %v5182_v60 = vld [vmem:[%s9868_s9 + $0x18] sm:$0xff]  ;;  %v5447_v23 = vld [vmem:[%s9870_s11] ss:$0 sm:$0xff] }
 0xaa9   :  { %7410 = vmatpush3.bf16.msra.mxu1 %v7409_v58  ;;  %5653 = vmatprep.mubr.msk.f32.mxu1 %vm7924_vm1, %v10172_v26  ;;  %v7388_v47 = vpack.c.bf16 %v5182_v60, %v5181_v16 }
 0xaaa   :  { %7411 = vmatprep.subr.bf16.mxu1 %v7923_v19  ;;  %v5006_v25 = vmul.f32 0.125, %v5003_v21 }
 0xaac   :  { %5549 = vmatmul.mubr.f32.vlgmr.msra.gmra.mrb[36].mxu0 %v5006_v25 }
 0xaad   :  { %7386 = vmatpush3.bf16.msra.mxu0 %v7385_v33  ;;  %7413 = vmatpush3.bf16.msra.mxu1 %v7412_v61 }
 0xaae   :  { %7387 = vmatprep.subr.bf16.mxu0 %v7923_v19  ;;  %7414 = vmatprep.subr.bf16.mxu1 %v7923_v19 }
 0xaaf   :  { %5618 = vmatprep.mubr.msk.f32.mxu0 %vm7924_vm1, %v10172_v26  ;;  %v5274_v26 = vld [vmem:[%s9869_s10 + $0x40] sm:$0xff] }
 0xab0   :  { %v7421_v1 = vpack.c.bf16 %v5275_v0, %v5274_v26 }
 0xab1   :  { %7389 = vmatpush3.bf16.msra.mxu0 %v7388_v47  ;;  %7416 = vmatpush3.bf16.msra.mxu1 %v7415_v12 }
 0xab2   :  { %7390 = vmatprep.subr.bf16.mxu0 %v7923_v19  ;;  %7417 = vmatprep.subr.bf16.mxu1 %v7923_v19 }
 0xab5   :  { %7392 = vmatpush3.bf16.msra.mxu0 %v7391_v2  ;;  %7419 = vmatpush3.bf16.msra.mxu1 %v7418_v44 }
 0xab6   :  { %7393 = vmatprep.subr.bf16.mxu0 %v7923_v19  ;;  %7420 = vmatprep.subr.bf16.mxu1 %v7923_v19 }
 0xab9   :  { %7395 = vmatpush3.bf16.msra.mxu0 %v7394_v18  ;;  %7422 = vmatpush3.bf16.msra.mxu1 %v7421_v1 }
 0xaba   :  { %7396 = vmatprep.subr.bf16.mxu0 %v7923_v19  ;;  %7423 = vmatprep.subr.bf16.mxu1 %v7923_v19 }
 0xabd   :  { %7398 = vmatpush3.bf16.msra.mxu0 %v7397_v41  ;;  %7425 = vmatpush3.bf16.msra.mxu1 %v7424_v34 }
 0xabe   :  { %7399 = vmatprep.subr.bf16.mxu0 %v7923_v19  ;;  %7426 = vmatprep.subr.bf16.mxu1 %v7923_v19 }
 0xac1   :  { %7401 = vmatpush3.bf16.msra.mxu0 %v7400_v55  ;;  %7428 = vmatpush3.bf16.msra.mxu1 %v7427_v53 }
 0xac2   :  { %7402 = vmatprep.subr.bf16.mxu0 %v7923_v19  ;;  %7429 = vmatprep.subr.bf16.mxu1 %v7923_v19 }
 0xac5   :  { %7404 = vmatpush3.bf16.msra.mxu0 %v7403_v14  ;;  %7431 = vmatpush3.bf16.msra.mxu1 %v7430_v42 }
 0xac6   :  { %7405 = vmatprep.subr.bf16.mxu0 %v7923_v19 }
 0xac8   :  { %5654 = vmatmul.mubr.f32.vlgmr.msra.gmra.mrb[38].mxu1 %v5005_v22 }
 0xac9   :  { %7407 = vmatpush3.bf16.msra.mxu0 %v7406_v30 }
 0xacc   :  { %5619 = vmatmul.mubr.f32.vlgmr.msra.gmra.mrb[38].mxu0 %v5004_v51 }
 0xb7b   :  { %v5175_v5 = vpop.f32.mrb[36].mxu1 }
 0xb7c   :  { %v5585_v36 = vpop.f32.mrb[37].mxu1 }
 0xb7f   :  { %v5105_v4 = vpop.f32.mrb[36].mxu0 }
 0xb80   :  { %v5176_v59 = vadd.f32 %v5175_v5, %v5105_v4  ;;  %v5550_v31 = vpop.f32.mrb[37].mxu0 }
 0xb9b   :  { %v5348_v54 = vpop.f32.mrb[38].mxu1 }
 0xb9c   :  { %v5655_v10 = vpop.f32.mrb[39].mxu1 }
 0xb9f   :  { %v5261_v15 = vpop.f32.mrb[38].mxu0 }
 0xba0   :  { %v5265_v57 = vadd.f32 %v5261_v15, %v5176_v59  ;;  %v5620_v24 = vpop.f32.mrb[39].mxu0 }
 0xba2   :  { %v5352_v19 = vadd.f32 %v5348_v54, %v5265_v57 }
 0xba4   :  { %v5360_v49 = vadd.f32 %v5447_v23, %v5352_v19 }
 0xba6   :  { %5362 = vst.msk [vmem:[#allocation18] sm:$0xff] %vm5361_vm2, %v5360_v49 }
 0xba7   :  { %7895 = shalt.err (!%p7892_p8)
}
 0xba8   :  { %s7896_s15 = scalar_lea.hbm %s9871_s12, 128 }
 0xba9   :  { %p7897_p9 = scmp.ne.s32.totalorder %s9871_s12, %s7896_s15  ;;  %p7900_p10 = scmp.lt.u32.totalorder %s7896_s15, %s9871_s12 }
 0xbab   :  { %p7902_p11 = pnand %p7900_p10, %p7897_p9 }
 0xbad   :  { %7905 = shalt.err (!%p7902_p11)
}
 0xbae   :  { %5372 = dma.vmem_to_hbm [thread:$0]  %s5370_s2, 128, %s9871_s12, [#allocation12]  }
 0xbaf   :  { %7912 = dma.done.wait [#allocation12], 128  }
 0xbb0   :  { %7913 = vsyncadd [#allocation12], 4294967168 }
 0xbb1   :  { %5376 = vsyncpa [#allocation11], 1 }
 0xbb2   :  { %5377 = vsyncpa [#allocation14], 1 }
 0xbb3   :  { %5378 = vsyncpa [#allocation17], 1 }
 0xbb4   :  { %5379 = vsyncpa [#allocation12], 1 }

</bundles_post_ra>
